<compile_context>
chip_gen: v7x
topology: tpu7x:2x2x1
jax: 0.10.0
libtpu: 0.0.40
codegen_flags: <defaults>
</compile_context>

<pallas_src>
import functools

import jax
import jax.numpy as jnp
from jax import lax
from jax.experimental import pallas as pl
from jax.experimental.pallas import tpu as pltpu

F32 = jnp.float32
BF16 = jnp.bfloat16
EPS_BN = 1e-5
EPS_LN = 1e-5
HEADS = 4                     # LinformerEncoderBlock default num_heads
K_LIN = 256                   # Linformer(k=256) low-rank projection length
VMEM_LIMIT = 32 * 1024 * 1024


# ---------------------------------------------------------------------------
# in-kernel helpers
# ---------------------------------------------------------------------------

def _ln(x, g, b):
    """LayerNorm over the last axis (PyTorch eps=1e-5, biased variance)."""
    mu = jnp.mean(x, axis=-1, keepdims=True)
    xc = x - mu
    var = jnp.mean(xc * xc, axis=-1, keepdims=True)
    return xc * lax.rsqrt(var + EPS_LN) * g + b


def _mm(a, w_bf16, b=None):
    """bf16 MXU matmul with f32 accumulation; optional f32 bias row."""
    out = jnp.dot(a.astype(BF16), w_bf16, preferred_element_type=F32)
    if b is not None:
        out = out + b
    return out


def _im2col3(x, t_out):
    """3-tap im2col of a time-padded (T+2, C) block -> (T, 3C) bf16 slab."""
    return jnp.concatenate(
        [x[0:t_out, :], x[1:t_out + 1, :], x[2:t_out + 2, :]], axis=-1).astype(BF16)


def _linformer_block(u, ln, wqkv, pk, pv, wout, bout, wff1, bff1, wff2, bff2,
                     wprj, bprj, wfb1, bfb1, wfb2, bfb2, heads):
    """One LinformerEncoderBlock on a single (T, E) channel-last sample."""
    T, E = u.shape
    DH = E // heads

    z = _ln(u, ln[0], ln[1])                      # outer LayerNorm (ResidualAdd 1)
    a_in = _ln(z, ln[2], ln[3])                   # PreNorm inside Linformer
    qkv = _mm(a_in, wqkv)                         # (T, 3E); Q cols pre-scaled by DH**-0.5
    q = qkv[:, :E].astype(BF16)
    k = qkv[:, E:2 * E].astype(BF16)
    v = qkv[:, 2 * E:].astype(BF16)

    # Linformer low-rank sequence projection: (KL, T) x (T, E) -> (KL, E); no broadcast
    kp = jnp.dot(pk, k, preferred_element_type=F32).astype(BF16)
    vp = jnp.dot(pv, v, preferred_element_type=F32).astype(BF16)

    head_outs = []
    for h in range(heads):                        # static loop; DH-wide slices are tiny
        lo = h * DH
        qh = q[:, lo:lo + DH]                     # (T, DH)
        kph = kp[:, lo:lo + DH]                   # (KL, DH)
        vph = vp[:, lo:lo + DH]
        dots = jnp.einsum('td,kd->tk', qh, kph,
                          preferred_element_type=F32)           # (T, KL)
        m = jnp.max(dots, axis=-1, keepdims=True)
        p = jnp.exp(dots - m)
        s = jnp.sum(p, axis=-1, keepdims=True)
        attn = p * pl.reciprocal(s, approx=True)                # softmax over KL (EUP)
        head_outs.append(jnp.dot(attn.astype(BF16), vph,
                                 preferred_element_type=F32))   # (T, DH)
    o = jnp.concatenate(head_outs, axis=-1)       # (T, E)
    z = z + _mm(o, wout, bout)                    # to_out (single matmul) + residual 1

    f = _ln(z, ln[4], ln[5])                      # PreNorm of inner FF
    f = jax.nn.gelu(_mm(f, wff1, bff1), approximate=True)       # tanh GELU (EUP)
    z = z + _mm(f, wff2, bff2)                    # inner residual 2

    z = _mm(z, wprj, bprj)                        # LinformerAttention.projection
    u1 = u + z                                    # outer residual 1

    g = _ln(u1, ln[6], ln[7])                     # second encoder LayerNorm
    g = _mm(g, wfb1, bfb1)
    g = g * jax.nn.sigmoid(g)                     # Swish
    g = _mm(g, wfb2, bfb2)
    return u1 + g                                 # outer residual 2


# ---------------------------------------------------------------------------
# Pallas kernels
# ---------------------------------------------------------------------------

_ATT_ARGS = ("ln", "wqkv", "pk", "pv", "wout", "bout", "wff1", "bff1",
             "wff2", "bff2", "wprj", "bprj", "wfb1", "bfb1", "wfb2", "bfb2")


def _conv_att_kernel(x_ref, cw_ref, cb_ref, pool_ref, ln_ref, wqkv_ref, pk_ref, pv_ref,
                     wout_ref, bout_ref, wff1_ref, bff1_ref, wff2_ref, bff2_ref,
                     wprj_ref, bprj_ref, wfb1_ref, bfb1_ref, wfb2_ref, bfb2_ref,
                     o_ref, *, first_stage, heads):
    E = o_ref.shape[2]

    if first_stage:
        # Conv1d(1->32)+BN+ReLU, time along lanes: (32,3) x (3,L) then pool via matmul.
        xr = x_ref[0]                                             # (1, L+2)
        Lc = xr.shape[1] - 2
        x3 = jnp.concatenate([xr[:, 0:Lc], xr[:, 1:Lc + 1], xr[:, 2:Lc + 2]], axis=0)
        yT = jnp.dot(cw_ref[...], x3, preferred_element_type=F32) + cb_ref[...]
        yT = jnp.maximum(yT, 0.0)                                 # (32, L)
        uT = jnp.dot(yT, pool_ref[...], preferred_element_type=F32)   # AvgPool1d(2,2)
        u = uT.T                                                  # (T, 32)
    else:
        # Conv1d(Cin->Cout)+BN+ReLU: one deep (Lc,3Cin)x(3Cin,Cout) bf16 MXU matmul.
        x = x_ref[0]                                              # (Lc+2, Cin)
        Lc = x.shape[0] - 2
        y = jnp.dot(_im2col3(x, Lc), cw_ref[...],
                    preferred_element_type=F32) + cb_ref[...]
        y = jnp.maximum(y, 0.0)                                   # (Lc, Cout)
        u = jnp.dot(pool_ref[...], y, preferred_element_type=F32)     # AvgPool1d(2,2)

    out = _linformer_block(
        u, ln_ref[...], wqkv_ref[...], pk_ref[...], pv_ref[...],
        wout_ref[...], bout_ref[...], wff1_ref[...], bff1_ref[...],
        wff2_ref[...], bff2_ref[...], wprj_ref[...], bprj_ref[...],
        wfb1_ref[...], bfb1_ref[...], wfb2_ref[...], bfb2_ref[...], heads)

    # emit output already zero-padded in time for the next conv stage
    zrow = jnp.zeros((1, E), F32)
    o_ref[0] = jnp.concatenate([zrow, out, zrow], axis=0)


def _conv_up_kernel(x_ref, cw_ref, cb_ref, wu_ref, bu_ref, o_ref):
    """Conv1d(64->32)+BN+ReLU then ConvTranspose1d(32->32, k=4, s=4)."""
    x = x_ref[0]                                                  # (T+2, 64)
    T = x.shape[0] - 2
    y = jnp.dot(_im2col3(x, T), cw_ref[...],
                preferred_element_type=F32) + cb_ref[...]
    y = jnp.maximum(y, 0.0)                                       # (T, 32)
    # lane-dense (T, 128) slab, columns indexed cout*4 + tap
    o_ref[0] = jnp.dot(y.astype(BF16), wu_ref[...],
                       preferred_element_type=F32) + bu_ref[...]


# ---------------------------------------------------------------------------
# pallas_call wrappers
# ---------------------------------------------------------------------------

def _wspec(arr):
    zeros = (0,) * arr.ndim
    return pl.BlockSpec(arr.shape, lambda i: zeros)


def _compiler_params():
    return pltpu.CompilerParams(dimension_semantics=("parallel",),
                                vmem_limit_bytes=VMEM_LIMIT)


def _conv_att_call(x_in, cw, cb, pool, att, *, first_stage):
    N = x_in.shape[0]
    T = pool.shape[1] if first_stage else pool.shape[0]
    E = att["wqkv"].shape[0]
    weights = [cw, cb, pool] + [att[k] for k in _ATT_ARGS]
    kernel = functools.partial(_conv_att_kernel, first_stage=first_stage, heads=HEADS)
    blk_x = (1,) + x_in.shape[1:]
    return pl.pallas_call(
        kernel,
        grid=(N,),
        in_specs=[pl.BlockSpec(blk_x, lambda i: (i, 0, 0))] + [_wspec(w) for w in weights],
        out_specs=pl.BlockSpec((1, T + 2, E), lambda i: (i, 0, 0)),
        out_shape=jax.ShapeDtypeStruct((N, T + 2, E), F32),
        compiler_params=_compiler_params(),
    )(x_in, *weights)


def _conv_up_call(x_in, cw, cb, wu, bu):
    N, Lp, cin = x_in.shape
    T = Lp - 2
    weights = [cw, cb, wu, bu]
    return pl.pallas_call(
        _conv_up_kernel,
        grid=(N,),
        in_specs=[pl.BlockSpec((1, Lp, cin), lambda i: (i, 0, 0))]
                 + [_wspec(w) for w in weights],
        out_specs=pl.BlockSpec((1, T, 128), lambda i: (i, 0, 0)),
        out_shape=jax.ShapeDtypeStruct((N, T, 128), F32),
        compiler_params=_compiler_params(),
    )(x_in, *weights)


# ---------------------------------------------------------------------------
# Model composition
# ---------------------------------------------------------------------------

def linformer_ext(xc, W):
    """LinformerEXt forward (eval).  xc: (N, 1, L) -> (N, 32, L)."""
    N, _, L = xc.shape
    assert L % 4 == 0
    h = jnp.pad(xc.astype(F32), ((0, 0), (0, 0), (1, 1)))                  # (N, 1, L+2)
    h = _conv_att_call(h, W["c1_w"], W["c1_b"], W["pool1"], W["a1"],
                       first_stage=True)                                   # (N, L/2+2, 32)
    h = _conv_att_call(h, W["c2_w"], W["c2_b"], W["pool2"], W["a2"],
                       first_stage=False)                                  # (N, L/4+2, 64)
    y = _conv_up_call(h, W["c3_w"], W["c3_b"], W["up_w"], W["up_b"])       # (N, L/4, 128)
    T2 = L // 4
    y = y.reshape(N, T2, 32, 4)
    return jnp.transpose(y, (0, 2, 1, 3)).reshape(N, 32, L)


def scfe_block_linformer(x, W):
    """SCFE_Block_Linformer forward.  x: (B, 1, CHA, L) -> (B, 32, CHA, L).

    The reference per-EEG-channel loop with shared weights is batched over (B, CHA).
    """
    B, _, CHA, L = x.shape
    xc = jnp.transpose(x, (0, 2, 1, 3)).reshape(B * CHA, 1, L)
    h = linformer_ext(xc, W)                                               # (B*CHA, 32, L)
    return jnp.transpose(h.reshape(B, CHA, 32, L), (0, 2, 1, 3))


# ---------------------------------------------------------------------------
# One-time parameter preparation (outside the jitted forward)
# ---------------------------------------------------------------------------

def _pool_matrix(t_out, transpose=False):
    """AvgPool1d(2, 2) as a (t_out, 2*t_out) 0/0.5 matrix (or its transpose)."""
    r = jnp.arange(t_out)[:, None]
    c = jnp.arange(2 * t_out)[None, :]
    m = jnp.where((c == 2 * r) | (c == 2 * r + 1), 0.5, 0.0).astype(F32)
    return m.T if transpose else m


def prepare_params(P):
    """Fold eval-mode BN into the convs, pack / transpose / bf16-cast all weights and
    fold the 1/sqrt(head_dim) attention scale into the Q projection."""

    def fold_bn(w, b, bn):
        scale = bn["g"] * lax.rsqrt(bn["v"] + EPS_BN)
        return w * scale[:, None, None], (b - bn["m"]) * scale + bn["b"]

    def pack_conv(w_f, b_f):
        cout, cin, _ = w_f.shape
        wp = jnp.transpose(w_f, (2, 1, 0)).reshape(3 * cin, cout)   # rows = tap*Cin + cin
        return wp.astype(BF16), b_f.reshape(1, cout).astype(F32)

    def pack_att(p, heads):
        emb = p["wq"].shape[0]
        dh = emb // heads
        ln = jnp.stack([p["ln1_g"], p["ln1_b"], p["attn_ln_g"], p["attn_ln_b"],
                        p["ff_ln_g"], p["ff_ln_b"], p["ln2_g"], p["ln2_b"]], 0)
        wq = (p["wq"] * (dh ** -0.5)).T                  # fold 1/sqrt(head_dim) into Q
        wqkv = jnp.concatenate([wq, p["wk"].T, p["wv"].T], axis=1)
        return dict(
            ln=ln.astype(F32),
            wqkv=wqkv.astype(BF16),
            pk=p["proj_k"].T.astype(BF16),               # (KL, seq)
            pv=p["proj_v"].T.astype(BF16),
            wout=p["out_w"].T.astype(BF16), bout=p["out_b"].reshape(1, -1).astype(F32),
            wff1=p["ff1_w"].T.astype(BF16), bff1=p["ff1_b"].reshape(1, -1).astype(F32),
            wff2=p["ff2_w"].T.astype(BF16), bff2=p["ff2_b"].reshape(1, -1).astype(F32),
            wprj=p["proj_w"].T.astype(BF16), bprj=p["proj_b"].reshape(1, -1).astype(F32),
            wfb1=p["fb1_w"].T.astype(BF16), bfb1=p["fb1_b"].reshape(1, -1).astype(F32),
            wfb2=p["fb2_w"].T.astype(BF16), bfb2=p["fb2_b"].reshape(1, -1).astype(F32),
        )

    T1 = P["att1"]["proj_k"].shape[0]            # = L // 2
    T2 = P["att2"]["proj_k"].shape[0]            # = L // 4

    w1, b1 = fold_bn(P["con1_w"], P["con1_b"], P["bn1"])
    w2, b2 = fold_bn(P["con2_w"], P["con2_b"], P["bn2"])
    w3, b3 = fold_bn(P["con3_w"], P["con3_b"], P["bn3"])
    c2_w, c2_b = pack_conv(w2, b2)
    c3_w, c3_b = pack_conv(w3, b3)
    return dict(
        c1_w=w1[:, 0, :].astype(F32),                     # (32, 3) for the time-in-lanes path
        c1_b=b1.reshape(-1, 1).astype(F32),               # (32, 1)
        pool1=_pool_matrix(T1, transpose=True),           # (L, T1)
        a1=pack_att(P["att1"], HEADS),
        c2_w=c2_w, c2_b=c2_b,
        pool2=_pool_matrix(T2),                           # (T2, T1)
        a2=pack_att(P["att2"], HEADS),
        c3_w=c3_w, c3_b=c3_b,
        up_w=P["up_w"].reshape(32, 32 * 4).astype(BF16),  # cols = cout*4 + tap
        up_b=jnp.repeat(P["up_b"], 4).reshape(1, 32 * 4).astype(F32),
    )


# ---------------------------------------------------------------------------
# Deterministic synthetic parameters (PyTorch layouts; no checkpoint loading)
# ---------------------------------------------------------------------------

def init_params(key, L, klin=K_LIN):
    cnt = [0]

    def rand(shape, scale=0.1):
        cnt[0] += 1
        return scale * jax.random.normal(jax.random.fold_in(key, cnt[0]), shape, dtype=F32)

    def bn(c):
        return dict(g=jnp.ones((c,), F32), b=jnp.zeros((c,), F32),
                    m=jnp.zeros((c,), F32), v=jnp.ones((c,), F32))

    def enc(emb, seq):
        return dict(
            ln1_g=jnp.ones((emb,), F32), ln1_b=jnp.zeros((emb,), F32),
            attn_ln_g=jnp.ones((emb,), F32), attn_ln_b=jnp.zeros((emb,), F32),
            wq=rand((emb, emb)), wk=rand((emb, emb)), wv=rand((emb, emb)),  # bias=False
            proj_k=rand((seq, klin)), proj_v=rand((seq, klin)),
            out_w=rand((emb, emb)), out_b=rand((emb,)),
            ff_ln_g=jnp.ones((emb,), F32), ff_ln_b=jnp.zeros((emb,), F32),
            ff1_w=rand((4 * emb, emb)), ff1_b=rand((4 * emb,)),
            ff2_w=rand((emb, 4 * emb)), ff2_b=rand((emb,)),
            proj_w=rand((emb, emb)), proj_b=rand((emb,)),
            ln2_g=jnp.ones((emb,), F32), ln2_b=jnp.zeros((emb,), F32),
            fb1_w=rand((emb, emb)), fb1_b=rand((emb,)),
            fb2_w=rand((emb, emb)), fb2_b=rand((emb,)),
        )

    # TODO(synk): LinformerEXt.linear (nn.Linear(32*250, data_num)) is unused in the
    # reference forward pass, so it is not instantiated here.
    return dict(
        con1_w=rand((32, 1, 3)), con1_b=rand((32,)), bn1=bn(32),
        att1=enc(32, L // 2),
        con2_w=rand((64, 32, 3)), con2_b=rand((64,)), bn2=bn(64),
        att2=enc(64, L // 4),
        con3_w=rand((32, 64, 3)), con3_b=rand((32,)), bn3=bn(32),
        up_w=rand((32, 32, 4)), up_b=rand((32,)),
    )


# ---------------------------------------------------------------------------

if __name__ == "__main__":
    B, CHA, L = 2, 4, 32          # batch, EEG channels, EEG length (divisible by 4)
    key = jax.random.PRNGKey(0)
    x = jax.random.normal(jax.random.fold_in(key, 9999), (B, 1, CHA, L), dtype=F32)

    P = init_params(key, L)
    W = prepare_params(P)         # one-time packing, outside the jitted forward

    fwd = jax.jit(scfe_block_linformer)
    out = jax.block_until_ready(fwd(x, W))

    assert out.shape == (B, 32, CHA, L), out.shape
    assert bool(jnp.all(jnp.isfinite(out)))
    print("KERNEL_OK")
</pallas_src>

<mosaic_0001>
module attributes {stable_mosaic.version = 11 : i64} {
  func.func @_conv_att_kernel(%arg0: i32, %arg1: memref<1x1x34xf32, #tpu.memory_space<vmem>>, %arg2: memref<32x3xf32, #tpu.memory_space<vmem>>, %arg3: memref<32x1xf32, #tpu.memory_space<vmem>>, %arg4: memref<32x16xf32, #tpu.memory_space<vmem>>, %arg5: memref<8x32xf32, #tpu.memory_space<vmem>>, %arg6: memref<32x96xbf16, #tpu.memory_space<vmem>>, %arg7: memref<256x16xbf16, #tpu.memory_space<vmem>>, %arg8: memref<256x16xbf16, #tpu.memory_space<vmem>>, %arg9: memref<32x32xbf16, #tpu.memory_space<vmem>>, %arg10: memref<1x32xf32, #tpu.memory_space<vmem>>, %arg11: memref<32x128xbf16, #tpu.memory_space<vmem>>, %arg12: memref<1x128xf32, #tpu.memory_space<vmem>>, %arg13: memref<128x32xbf16, #tpu.memory_space<vmem>>, %arg14: memref<1x32xf32, #tpu.memory_space<vmem>>, %arg15: memref<32x32xbf16, #tpu.memory_space<vmem>>, %arg16: memref<1x32xf32, #tpu.memory_space<vmem>>, %arg17: memref<32x32xbf16, #tpu.memory_space<vmem>>, %arg18: memref<1x32xf32, #tpu.memory_space<vmem>>, %arg19: memref<32x32xbf16, #tpu.memory_space<vmem>>, %arg20: memref<1x32xf32, #tpu.memory_space<vmem>>, %arg21: memref<1x18x32xf32, #tpu.memory_space<vmem>>) attributes {dimension_semantics = [#tpu.dimension_semantics<parallel>], iteration_bounds = array<i64: 8>, scalar_prefetch = 0 : i64, scratch_operands = 0 : i64, tpu.core_type = #tpu.core_type<tc>, window_params = [{transform_indices = @transform_0, window_bounds = array<i64: 1, 1, 34>}, {pipeline_mode = #tpu.pipeline_mode<synchronous>, transform_indices = @transform_1, window_bounds = array<i64: 32, 3>}, {pipeline_mode = #tpu.pipeline_mode<synchronous>, transform_indices = @transform_2, window_bounds = array<i64: 32, 1>}, {pipeline_mode = #tpu.pipeline_mode<synchronous>, transform_indices = @transform_3, window_bounds = array<i64: 32, 16>}, {pipeline_mode = #tpu.pipeline_mode<synchronous>, transform_indices = @transform_4, window_bounds = array<i64: 8, 32>}, {pipeline_mode = #tpu.pipeline_mode<synchronous>, transform_indices = @transform_5, window_bounds = array<i64: 32, 96>}, {pipeline_mode = #tpu.pipeline_mode<synchronous>, transform_indices = @transform_6, window_bounds = array<i64: 256, 16>}, {pipeline_mode = #tpu.pipeline_mode<synchronous>, transform_indices = @transform_7, window_bounds = array<i64: 256, 16>}, {pipeline_mode = #tpu.pipeline_mode<synchronous>, transform_indices = @transform_8, window_bounds = array<i64: 32, 32>}, {pipeline_mode = #tpu.pipeline_mode<synchronous>, transform_indices = @transform_9, window_bounds = array<i64: 1, 32>}, {pipeline_mode = #tpu.pipeline_mode<synchronous>, transform_indices = @transform_10, window_bounds = array<i64: 32, 128>}, {pipeline_mode = #tpu.pipeline_mode<synchronous>, transform_indices = @transform_11, window_bounds = array<i64: 1, 128>}, {pipeline_mode = #tpu.pipeline_mode<synchronous>, transform_indices = @transform_12, window_bounds = array<i64: 128, 32>}, {pipeline_mode = #tpu.pipeline_mode<synchronous>, transform_indices = @transform_13, window_bounds = array<i64: 1, 32>}, {pipeline_mode = #tpu.pipeline_mode<synchronous>, transform_indices = @transform_14, window_bounds = array<i64: 32, 32>}, {pipeline_mode = #tpu.pipeline_mode<synchronous>, transform_indices = @transform_15, window_bounds = array<i64: 1, 32>}, {pipeline_mode = #tpu.pipeline_mode<synchronous>, transform_indices = @transform_16, window_bounds = array<i64: 32, 32>}, {pipeline_mode = #tpu.pipeline_mode<synchronous>, transform_indices = @transform_17, window_bounds = array<i64: 1, 32>}, {pipeline_mode = #tpu.pipeline_mode<synchronous>, transform_indices = @transform_18, window_bounds = array<i64: 32, 32>}, {pipeline_mode = #tpu.pipeline_mode<synchronous>, transform_indices = @transform_19, window_bounds = array<i64: 1, 32>}, {transform_indices = @transform_20, window_bounds = array<i64: 1, 18, 32>}]} {
    %c0 = arith.constant 0 : index
    %c0_0 = arith.constant 0 : index
    %c0_1 = arith.constant 0 : index
    %0 = vector.load %arg1[%c0, %c0_0, %c0_1] : memref<1x1x34xf32, #tpu.memory_space<vmem>>, vector<1x1x34xf32>
    %1 = vector.shape_cast %0 : vector<1x1x34xf32> to vector<1x34xf32>
    %2 = vector.extract_strided_slice %1 {offsets = [0, 0], sizes = [1, 32], strides = [1, 1]} : vector<1x34xf32> to vector<1x32xf32>
    %3 = vector.extract_strided_slice %1 {offsets = [0, 1], sizes = [1, 32], strides = [1, 1]} : vector<1x34xf32> to vector<1x32xf32>
    %4 = vector.extract_strided_slice %1 {offsets = [0, 2], sizes = [1, 32], strides = [1, 1]} : vector<1x34xf32> to vector<1x32xf32>
    %5 = tpu.concatenate %2, %3, %4 in 0 : vector<1x32xf32>, vector<1x32xf32>, vector<1x32xf32> -> vector<3x32xf32>
    %c0_2 = arith.constant 0 : index
    %c0_3 = arith.constant 0 : index
    %6 = vector.load %arg2[%c0_2, %c0_3] : memref<32x3xf32, #tpu.memory_space<vmem>>, vector<32x3xf32>
    %cst = arith.constant dense<0.000000e+00> : vector<32x32xf32>
    %7 = tpu.matmul %6, %5, %cst {dimension_numbers = #tpu.dot_dimension_numbers<[1], [0], [0], [1], [0, 0, 1, 1], [], []>} : vector<32x3xf32>, vector<3x32xf32>, vector<32x32xf32> -> vector<32x32xf32>
    %c0_4 = arith.constant 0 : index
    %c0_5 = arith.constant 0 : index
    %8 = vector.load %arg3[%c0_4, %c0_5] : memref<32x1xf32, #tpu.memory_space<vmem>>, vector<32x1xf32>
    %9 = vector.broadcast %8 : vector<32x1xf32> to vector<32x32xf32>
    %10 = arith.addf %7, %9 : vector<32x32xf32>
    %cst_6 = arith.constant 0.000000e+00 : f32
    %11 = vector.broadcast %cst_6 : f32 to vector<32x32xf32>
    %12 = arith.maximumf %10, %11 : vector<32x32xf32>
    %c0_7 = arith.constant 0 : index
    %c0_8 = arith.constant 0 : index
    %13 = vector.load %arg4[%c0_7, %c0_8] : memref<32x16xf32, #tpu.memory_space<vmem>>, vector<32x16xf32>
    %cst_9 = arith.constant dense<0.000000e+00> : vector<32x16xf32>
    %14 = tpu.matmul %12, %13, %cst_9 {dimension_numbers = #tpu.dot_dimension_numbers<[1], [0], [0], [1], [0, 0, 1, 1], [], []>} : vector<32x32xf32>, vector<32x16xf32>, vector<32x16xf32> -> vector<32x16xf32>
    %15 = tpu.transpose %14, [1, 0] : vector<32x16xf32> -> vector<16x32xf32>
    %c0_10 = arith.constant 0 : index
    %c0_11 = arith.constant 0 : index
    %16 = vector.load %arg5[%c0_10, %c0_11] : memref<8x32xf32, #tpu.memory_space<vmem>>, vector<8x32xf32>
    %c0_12 = arith.constant 0 : index
    %c0_13 = arith.constant 0 : index
    %17 = vector.load %arg6[%c0_12, %c0_13] : memref<32x96xbf16, #tpu.memory_space<vmem>>, vector<32x96xbf16>
    %c0_14 = arith.constant 0 : index
    %c0_15 = arith.constant 0 : index
    %18 = vector.load %arg7[%c0_14, %c0_15] : memref<256x16xbf16, #tpu.memory_space<vmem>>, vector<256x16xbf16>
    %c0_16 = arith.constant 0 : index
    %c0_17 = arith.constant 0 : index
    %19 = vector.load %arg8[%c0_16, %c0_17] : memref<256x16xbf16, #tpu.memory_space<vmem>>, vector<256x16xbf16>
    %c0_18 = arith.constant 0 : index
    %c0_19 = arith.constant 0 : index
    %20 = vector.load %arg9[%c0_18, %c0_19] : memref<32x32xbf16, #tpu.memory_space<vmem>>, vector<32x32xbf16>
    %c0_20 = arith.constant 0 : index
    %c0_21 = arith.constant 0 : index
    %21 = vector.load %arg10[%c0_20, %c0_21] : memref<1x32xf32, #tpu.memory_space<vmem>>, vector<1x32xf32>
    %c0_22 = arith.constant 0 : index
    %c0_23 = arith.constant 0 : index
    %22 = vector.load %arg11[%c0_22, %c0_23] : memref<32x128xbf16, #tpu.memory_space<vmem>>, vector<32x128xbf16>
    %c0_24 = arith.constant 0 : index
    %c0_25 = arith.constant 0 : index
    %23 = vector.load %arg12[%c0_24, %c0_25] : memref<1x128xf32, #tpu.memory_space<vmem>>, vector<1x128xf32>
    %c0_26 = arith.constant 0 : index
    %c0_27 = arith.constant 0 : index
    %24 = vector.load %arg13[%c0_26, %c0_27] : memref<128x32xbf16, #tpu.memory_space<vmem>>, vector<128x32xbf16>
    %c0_28 = arith.constant 0 : index
    %c0_29 = arith.constant 0 : index
    %25 = vector.load %arg14[%c0_28, %c0_29] : memref<1x32xf32, #tpu.memory_space<vmem>>, vector<1x32xf32>
    %c0_30 = arith.constant 0 : index
    %c0_31 = arith.constant 0 : index
    %26 = vector.load %arg15[%c0_30, %c0_31] : memref<32x32xbf16, #tpu.memory_space<vmem>>, vector<32x32xbf16>
    %c0_32 = arith.constant 0 : index
    %c0_33 = arith.constant 0 : index
    %27 = vector.load %arg16[%c0_32, %c0_33] : memref<1x32xf32, #tpu.memory_space<vmem>>, vector<1x32xf32>
    %c0_34 = arith.constant 0 : index
    %c0_35 = arith.constant 0 : index
    %28 = vector.load %arg17[%c0_34, %c0_35] : memref<32x32xbf16, #tpu.memory_space<vmem>>, vector<32x32xbf16>
    %c0_36 = arith.constant 0 : index
    %c0_37 = arith.constant 0 : index
    %29 = vector.load %arg18[%c0_36, %c0_37] : memref<1x32xf32, #tpu.memory_space<vmem>>, vector<1x32xf32>
    %c0_38 = arith.constant 0 : index
    %c0_39 = arith.constant 0 : index
    %30 = vector.load %arg19[%c0_38, %c0_39] : memref<32x32xbf16, #tpu.memory_space<vmem>>, vector<32x32xbf16>
    %c0_40 = arith.constant 0 : index
    %c0_41 = arith.constant 0 : index
    %31 = vector.load %arg20[%c0_40, %c0_41] : memref<1x32xf32, #tpu.memory_space<vmem>>, vector<1x32xf32>
    %32 = vector.extract_strided_slice %16 {offsets = [0, 0], sizes = [1, 32], strides = [1, 1]} : vector<8x32xf32> to vector<1x32xf32>
    %33 = vector.shape_cast %32 : vector<1x32xf32> to vector<32xf32>
    %34 = vector.extract_strided_slice %16 {offsets = [1, 0], sizes = [1, 32], strides = [1, 1]} : vector<8x32xf32> to vector<1x32xf32>
    %35 = vector.shape_cast %34 : vector<1x32xf32> to vector<32xf32>
    %cst_42 = arith.constant dense<0.000000e+00> : vector<16xf32>
    %36 = vector.multi_reduction <add>, %15, %cst_42 [1] : vector<16x32xf32> to vector<16xf32>
    %37 = vector.shape_cast %36 : vector<16xf32> to vector<16x1xf32>
    %cst_43 = arith.constant 3.200000e+01 : f32
    %38 = vector.broadcast %cst_43 : f32 to vector<16x1xf32>
    %39 = arith.divf %37, %38 : vector<16x1xf32>
    %40 = vector.broadcast %39 : vector<16x1xf32> to vector<16x32xf32>
    %41 = arith.subf %15, %40 : vector<16x32xf32>
    %42 = arith.mulf %41, %41 : vector<16x32xf32>
    %cst_44 = arith.constant dense<0.000000e+00> : vector<16xf32>
    %43 = vector.multi_reduction <add>, %42, %cst_44 [1] : vector<16x32xf32> to vector<16xf32>
    %44 = vector.shape_cast %43 : vector<16xf32> to vector<16x1xf32>
    %cst_45 = arith.constant 3.200000e+01 : f32
    %45 = vector.broadcast %cst_45 : f32 to vector<16x1xf32>
    %46 = arith.divf %44, %45 : vector<16x1xf32>
    %cst_46 = arith.constant 9.99999974E-6 : f32
    %47 = vector.broadcast %cst_46 : f32 to vector<16x1xf32>
    %48 = arith.addf %46, %47 : vector<16x1xf32>
    %49 = math.rsqrt %48 : vector<16x1xf32>
    %50 = vector.broadcast %49 : vector<16x1xf32> to vector<16x32xf32>
    %51 = arith.mulf %41, %50 : vector<16x32xf32>
    %52 = vector.shape_cast %33 : vector<32xf32> to vector<1x32xf32>
    %53 = vector.broadcast %52 : vector<1x32xf32> to vector<16x32xf32>
    %54 = arith.mulf %51, %53 : vector<16x32xf32>
    %55 = vector.shape_cast %35 : vector<32xf32> to vector<1x32xf32>
    %56 = vector.broadcast %55 : vector<1x32xf32> to vector<16x32xf32>
    %57 = arith.addf %54, %56 : vector<16x32xf32>
    %58 = vector.extract_strided_slice %16 {offsets = [2, 0], sizes = [1, 32], strides = [1, 1]} : vector<8x32xf32> to vector<1x32xf32>
    %59 = vector.shape_cast %58 : vector<1x32xf32> to vector<32xf32>
    %60 = vector.extract_strided_slice %16 {offsets = [3, 0], sizes = [1, 32], strides = [1, 1]} : vector<8x32xf32> to vector<1x32xf32>
    %61 = vector.shape_cast %60 : vector<1x32xf32> to vector<32xf32>
    %cst_47 = arith.constant dense<0.000000e+00> : vector<16xf32>
    %62 = vector.multi_reduction <add>, %57, %cst_47 [1] : vector<16x32xf32> to vector<16xf32>
    %63 = vector.shape_cast %62 : vector<16xf32> to vector<16x1xf32>
    %cst_48 = arith.constant 3.200000e+01 : f32
    %64 = vector.broadcast %cst_48 : f32 to vector<16x1xf32>
    %65 = arith.divf %63, %64 : vector<16x1xf32>
    %66 = vector.broadcast %65 : vector<16x1xf32> to vector<16x32xf32>
    %67 = arith.subf %57, %66 : vector<16x32xf32>
    %68 = arith.mulf %67, %67 : vector<16x32xf32>
    %cst_49 = arith.constant dense<0.000000e+00> : vector<16xf32>
    %69 = vector.multi_reduction <add>, %68, %cst_49 [1] : vector<16x32xf32> to vector<16xf32>
    %70 = vector.shape_cast %69 : vector<16xf32> to vector<16x1xf32>
    %cst_50 = arith.constant 3.200000e+01 : f32
    %71 = vector.broadcast %cst_50 : f32 to vector<16x1xf32>
    %72 = arith.divf %70, %71 : vector<16x1xf32>
    %cst_51 = arith.constant 9.99999974E-6 : f32
    %73 = vector.broadcast %cst_51 : f32 to vector<16x1xf32>
    %74 = arith.addf %72, %73 : vector<16x1xf32>
    %75 = math.rsqrt %74 : vector<16x1xf32>
    %76 = vector.broadcast %75 : vector<16x1xf32> to vector<16x32xf32>
    %77 = arith.mulf %67, %76 : vector<16x32xf32>
    %78 = vector.shape_cast %59 : vector<32xf32> to vector<1x32xf32>
    %79 = vector.broadcast %78 : vector<1x32xf32> to vector<16x32xf32>
    %80 = arith.mulf %77, %79 : vector<16x32xf32>
    %81 = vector.shape_cast %61 : vector<32xf32> to vector<1x32xf32>
    %82 = vector.broadcast %81 : vector<1x32xf32> to vector<16x32xf32>
    %83 = arith.addf %80, %82 : vector<16x32xf32>
    %84 = arith.truncf %83 : vector<16x32xf32> to vector<16x32xbf16>
    %cst_52 = arith.constant dense<0.000000e+00> : vector<16x96xf32>
    %85 = tpu.matmul %84, %17, %cst_52 {dimension_numbers = #tpu.dot_dimension_numbers<[1], [0], [0], [1], [0, 0, 1, 1], [], []>} : vector<16x32xbf16>, vector<32x96xbf16>, vector<16x96xf32> -> vector<16x96xf32>
    %86 = vector.extract_strided_slice %85 {offsets = [0, 0], sizes = [16, 32], strides = [1, 1]} : vector<16x96xf32> to vector<16x32xf32>
    %87 = arith.truncf %86 : vector<16x32xf32> to vector<16x32xbf16>
    %88 = vector.extract_strided_slice %85 {offsets = [0, 32], sizes = [16, 32], strides = [1, 1]} : vector<16x96xf32> to vector<16x32xf32>
    %89 = arith.truncf %88 : vector<16x32xf32> to vector<16x32xbf16>
    %90 = vector.extract_strided_slice %85 {offsets = [0, 64], sizes = [16, 32], strides = [1, 1]} : vector<16x96xf32> to vector<16x32xf32>
    %91 = arith.truncf %90 : vector<16x32xf32> to vector<16x32xbf16>
    %cst_53 = arith.constant dense<0.000000e+00> : vector<256x32xf32>
    %92 = tpu.matmul %18, %89, %cst_53 {dimension_numbers = #tpu.dot_dimension_numbers<[1], [0], [0], [1], [0, 0, 1, 1], [], []>} : vector<256x16xbf16>, vector<16x32xbf16>, vector<256x32xf32> -> vector<256x32xf32>
    %93 = arith.truncf %92 : vector<256x32xf32> to vector<256x32xbf16>
    %cst_54 = arith.constant dense<0.000000e+00> : vector<256x32xf32>
    %94 = tpu.matmul %19, %91, %cst_54 {dimension_numbers = #tpu.dot_dimension_numbers<[1], [0], [0], [1], [0, 0, 1, 1], [], []>} : vector<256x16xbf16>, vector<16x32xbf16>, vector<256x32xf32> -> vector<256x32xf32>
    %95 = arith.truncf %94 : vector<256x32xf32> to vector<256x32xbf16>
    %96 = vector.extract_strided_slice %87 {offsets = [0, 0], sizes = [16, 8], strides = [1, 1]} : vector<16x32xbf16> to vector<16x8xbf16>
    %97 = vector.extract_strided_slice %93 {offsets = [0, 0], sizes = [256, 8], strides = [1, 1]} : vector<256x32xbf16> to vector<256x8xbf16>
    %98 = vector.extract_strided_slice %95 {offsets = [0, 0], sizes = [256, 8], strides = [1, 1]} : vector<256x32xbf16> to vector<256x8xbf16>
    "tpu.trace_start"() <{level = 10 : i32, message = "td,kd->tk"}> : () -> ()
    %cst_55 = arith.constant dense<0.000000e+00> : vector<16x256xf32>
    %99 = tpu.matmul %96, %97, %cst_55 {dimension_numbers = #tpu.dot_dimension_numbers<[1], [1], [0], [0], [0, 0, 1, 0], [], []>} : vector<16x8xbf16>, vector<256x8xbf16>, vector<16x256xf32> -> vector<16x256xf32>
    "tpu.trace_stop"() : () -> ()
    %cst_56 = arith.constant dense<0xFF800000> : vector<16xf32>
    %100 = vector.multi_reduction <maximumf>, %99, %cst_56 [1] : vector<16x256xf32> to vector<16xf32>
    %101 = vector.shape_cast %100 : vector<16xf32> to vector<16x1xf32>
    %102 = vector.broadcast %101 : vector<16x1xf32> to vector<16x256xf32>
    %103 = arith.subf %99, %102 : vector<16x256xf32>
    %104 = math.exp %103 : vector<16x256xf32>
    %cst_57 = arith.constant dense<0.000000e+00> : vector<16xf32>
    %105 = vector.multi_reduction <add>, %104, %cst_57 [1] : vector<16x256xf32> to vector<16xf32>
    %106 = vector.shape_cast %105 : vector<16xf32> to vector<16x1xf32>
    %107 = tpu.reciprocal %106 {approx = true} : vector<16x1xf32> -> vector<16x1xf32>
    %108 = vector.broadcast %107 : vector<16x1xf32> to vector<16x256xf32>
    %109 = arith.mulf %104, %108 : vector<16x256xf32>
    %110 = arith.truncf %109 : vector<16x256xf32> to vector<16x256xbf16>
    %cst_58 = arith.constant dense<0.000000e+00> : vector<16x8xf32>
    %111 = tpu.matmul %110, %98, %cst_58 {dimension_numbers = #tpu.dot_dimension_numbers<[1], [0], [0], [1], [0, 0, 1, 1], [], []>} : vector<16x256xbf16>, vector<256x8xbf16>, vector<16x8xf32> -> vector<16x8xf32>
    %112 = vector.extract_strided_slice %87 {offsets = [0, 8], sizes = [16, 8], strides = [1, 1]} : vector<16x32xbf16> to vector<16x8xbf16>
    %113 = vector.extract_strided_slice %93 {offsets = [0, 8], sizes = [256, 8], strides = [1, 1]} : vector<256x32xbf16> to vector<256x8xbf16>
    %114 = vector.extract_strided_slice %95 {offsets = [0, 8], sizes = [256, 8], strides = [1, 1]} : vector<256x32xbf16> to vector<256x8xbf16>
    "tpu.trace_start"() <{level = 10 : i32, message = "td,kd->tk"}> : () -> ()
    %cst_59 = arith.constant dense<0.000000e+00> : vector<16x256xf32>
    %115 = tpu.matmul %112, %113, %cst_59 {dimension_numbers = #tpu.dot_dimension_numbers<[1], [1], [0], [0], [0, 0, 1, 0], [], []>} : vector<16x8xbf16>, vector<256x8xbf16>, vector<16x256xf32> -> vector<16x256xf32>
    "tpu.trace_stop"() : () -> ()
    %cst_60 = arith.constant dense<0xFF800000> : vector<16xf32>
    %116 = vector.multi_reduction <maximumf>, %115, %cst_60 [1] : vector<16x256xf32> to vector<16xf32>
    %117 = vector.shape_cast %116 : vector<16xf32> to vector<16x1xf32>
    %118 = vector.broadcast %117 : vector<16x1xf32> to vector<16x256xf32>
    %119 = arith.subf %115, %118 : vector<16x256xf32>
    %120 = math.exp %119 : vector<16x256xf32>
    %cst_61 = arith.constant dense<0.000000e+00> : vector<16xf32>
    %121 = vector.multi_reduction <add>, %120, %cst_61 [1] : vector<16x256xf32> to vector<16xf32>
    %122 = vector.shape_cast %121 : vector<16xf32> to vector<16x1xf32>
    %123 = tpu.reciprocal %122 {approx = true} : vector<16x1xf32> -> vector<16x1xf32>
    %124 = vector.broadcast %123 : vector<16x1xf32> to vector<16x256xf32>
    %125 = arith.mulf %120, %124 : vector<16x256xf32>
    %126 = arith.truncf %125 : vector<16x256xf32> to vector<16x256xbf16>
    %cst_62 = arith.constant dense<0.000000e+00> : vector<16x8xf32>
    %127 = tpu.matmul %126, %114, %cst_62 {dimension_numbers = #tpu.dot_dimension_numbers<[1], [0], [0], [1], [0, 0, 1, 1], [], []>} : vector<16x256xbf16>, vector<256x8xbf16>, vector<16x8xf32> -> vector<16x8xf32>
    %128 = vector.extract_strided_slice %87 {offsets = [0, 16], sizes = [16, 8], strides = [1, 1]} : vector<16x32xbf16> to vector<16x8xbf16>
    %129 = vector.extract_strided_slice %93 {offsets = [0, 16], sizes = [256, 8], strides = [1, 1]} : vector<256x32xbf16> to vector<256x8xbf16>
    %130 = vector.extract_strided_slice %95 {offsets = [0, 16], sizes = [256, 8], strides = [1, 1]} : vector<256x32xbf16> to vector<256x8xbf16>
    "tpu.trace_start"() <{level = 10 : i32, message = "td,kd->tk"}> : () -> ()
    %cst_63 = arith.constant dense<0.000000e+00> : vector<16x256xf32>
    %131 = tpu.matmul %128, %129, %cst_63 {dimension_numbers = #tpu.dot_dimension_numbers<[1], [1], [0], [0], [0, 0, 1, 0], [], []>} : vector<16x8xbf16>, vector<256x8xbf16>, vector<16x256xf32> -> vector<16x256xf32>
    "tpu.trace_stop"() : () -> ()
    %cst_64 = arith.constant dense<0xFF800000> : vector<16xf32>
    %132 = vector.multi_reduction <maximumf>, %131, %cst_64 [1] : vector<16x256xf32> to vector<16xf32>
    %133 = vector.shape_cast %132 : vector<16xf32> to vector<16x1xf32>
    %134 = vector.broadcast %133 : vector<16x1xf32> to vector<16x256xf32>
    %135 = arith.subf %131, %134 : vector<16x256xf32>
    %136 = math.exp %135 : vector<16x256xf32>
    %cst_65 = arith.constant dense<0.000000e+00> : vector<16xf32>
    %137 = vector.multi_reduction <add>, %136, %cst_65 [1] : vector<16x256xf32> to vector<16xf32>
    %138 = vector.shape_cast %137 : vector<16xf32> to vector<16x1xf32>
    %139 = tpu.reciprocal %138 {approx = true} : vector<16x1xf32> -> vector<16x1xf32>
    %140 = vector.broadcast %139 : vector<16x1xf32> to vector<16x256xf32>
    %141 = arith.mulf %136, %140 : vector<16x256xf32>
    %142 = arith.truncf %141 : vector<16x256xf32> to vector<16x256xbf16>
    %cst_66 = arith.constant dense<0.000000e+00> : vector<16x8xf32>
    %143 = tpu.matmul %142, %130, %cst_66 {dimension_numbers = #tpu.dot_dimension_numbers<[1], [0], [0], [1], [0, 0, 1, 1], [], []>} : vector<16x256xbf16>, vector<256x8xbf16>, vector<16x8xf32> -> vector<16x8xf32>
    %144 = vector.extract_strided_slice %87 {offsets = [0, 24], sizes = [16, 8], strides = [1, 1]} : vector<16x32xbf16> to vector<16x8xbf16>
    %145 = vector.extract_strided_slice %93 {offsets = [0, 24], sizes = [256, 8], strides = [1, 1]} : vector<256x32xbf16> to vector<256x8xbf16>
    %146 = vector.extract_strided_slice %95 {offsets = [0, 24], sizes = [256, 8], strides = [1, 1]} : vector<256x32xbf16> to vector<256x8xbf16>
    "tpu.trace_start"() <{level = 10 : i32, message = "td,kd->tk"}> : () -> ()
    %cst_67 = arith.constant dense<0.000000e+00> : vector<16x256xf32>
    %147 = tpu.matmul %144, %145, %cst_67 {dimension_numbers = #tpu.dot_dimension_numbers<[1], [1], [0], [0], [0, 0, 1, 0], [], []>} : vector<16x8xbf16>, vector<256x8xbf16>, vector<16x256xf32> -> vector<16x256xf32>
    "tpu.trace_stop"() : () -> ()
    %cst_68 = arith.constant dense<0xFF800000> : vector<16xf32>
    %148 = vector.multi_reduction <maximumf>, %147, %cst_68 [1] : vector<16x256xf32> to vector<16xf32>
    %149 = vector.shape_cast %148 : vector<16xf32> to vector<16x1xf32>
    %150 = vector.broadcast %149 : vector<16x1xf32> to vector<16x256xf32>
    %151 = arith.subf %147, %150 : vector<16x256xf32>
    %152 = math.exp %151 : vector<16x256xf32>
    %cst_69 = arith.constant dense<0.000000e+00> : vector<16xf32>
    %153 = vector.multi_reduction <add>, %152, %cst_69 [1] : vector<16x256xf32> to vector<16xf32>
    %154 = vector.shape_cast %153 : vector<16xf32> to vector<16x1xf32>
    %155 = tpu.reciprocal %154 {approx = true} : vector<16x1xf32> -> vector<16x1xf32>
    %156 = vector.broadcast %155 : vector<16x1xf32> to vector<16x256xf32>
    %157 = arith.mulf %152, %156 : vector<16x256xf32>
    %158 = arith.truncf %157 : vector<16x256xf32> to vector<16x256xbf16>
    %cst_70 = arith.constant dense<0.000000e+00> : vector<16x8xf32>
    %159 = tpu.matmul %158, %146, %cst_70 {dimension_numbers = #tpu.dot_dimension_numbers<[1], [0], [0], [1], [0, 0, 1, 1], [], []>} : vector<16x256xbf16>, vector<256x8xbf16>, vector<16x8xf32> -> vector<16x8xf32>
    %160 = tpu.concatenate %111, %127, %143, %159 in 1 : vector<16x8xf32>, vector<16x8xf32>, vector<16x8xf32>, vector<16x8xf32> -> vector<16x32xf32>
    %161 = arith.truncf %160 : vector<16x32xf32> to vector<16x32xbf16>
    %cst_71 = arith.constant dense<0.000000e+00> : vector<16x32xf32>
    %162 = tpu.matmul %161, %20, %cst_71 {dimension_numbers = #tpu.dot_dimension_numbers<[1], [0], [0], [1], [0, 0, 1, 1], [], []>} : vector<16x32xbf16>, vector<32x32xbf16>, vector<16x32xf32> -> vector<16x32xf32>
    %163 = vector.broadcast %21 : vector<1x32xf32> to vector<16x32xf32>
    %164 = arith.addf %162, %163 : vector<16x32xf32>
    %165 = arith.addf %57, %164 : vector<16x32xf32>
    %166 = vector.extract_strided_slice %16 {offsets = [4, 0], sizes = [1, 32], strides = [1, 1]} : vector<8x32xf32> to vector<1x32xf32>
    %167 = vector.shape_cast %166 : vector<1x32xf32> to vector<32xf32>
    %168 = vector.extract_strided_slice %16 {offsets = [5, 0], sizes = [1, 32], strides = [1, 1]} : vector<8x32xf32> to vector<1x32xf32>
    %169 = vector.shape_cast %168 : vector<1x32xf32> to vector<32xf32>
    %cst_72 = arith.constant dense<0.000000e+00> : vector<16xf32>
    %170 = vector.multi_reduction <add>, %165, %cst_72 [1] : vector<16x32xf32> to vector<16xf32>
    %171 = vector.shape_cast %170 : vector<16xf32> to vector<16x1xf32>
    %cst_73 = arith.constant 3.200000e+01 : f32
    %172 = vector.broadcast %cst_73 : f32 to vector<16x1xf32>
    %173 = arith.divf %171, %172 : vector<16x1xf32>
    %174 = vector.broadcast %173 : vector<16x1xf32> to vector<16x32xf32>
    %175 = arith.subf %165, %174 : vector<16x32xf32>
    %176 = arith.mulf %175, %175 : vector<16x32xf32>
    %cst_74 = arith.constant dense<0.000000e+00> : vector<16xf32>
    %177 = vector.multi_reduction <add>, %176, %cst_74 [1] : vector<16x32xf32> to vector<16xf32>
    %178 = vector.shape_cast %177 : vector<16xf32> to vector<16x1xf32>
    %cst_75 = arith.constant 3.200000e+01 : f32
    %179 = vector.broadcast %cst_75 : f32 to vector<16x1xf32>
    %180 = arith.divf %178, %179 : vector<16x1xf32>
    %cst_76 = arith.constant 9.99999974E-6 : f32
    %181 = vector.broadcast %cst_76 : f32 to vector<16x1xf32>
    %182 = arith.addf %180, %181 : vector<16x1xf32>
    %183 = math.rsqrt %182 : vector<16x1xf32>
    %184 = vector.broadcast %183 : vector<16x1xf32> to vector<16x32xf32>
    %185 = arith.mulf %175, %184 : vector<16x32xf32>
    %186 = vector.shape_cast %167 : vector<32xf32> to vector<1x32xf32>
    %187 = vector.broadcast %186 : vector<1x32xf32> to vector<16x32xf32>
    %188 = arith.mulf %185, %187 : vector<16x32xf32>
    %189 = vector.shape_cast %169 : vector<32xf32> to vector<1x32xf32>
    %190 = vector.broadcast %189 : vector<1x32xf32> to vector<16x32xf32>
    %191 = arith.addf %188, %190 : vector<16x32xf32>
    %192 = arith.truncf %191 : vector<16x32xf32> to vector<16x32xbf16>
    %cst_77 = arith.constant dense<0.000000e+00> : vector<16x128xf32>
    %193 = tpu.matmul %192, %22, %cst_77 {dimension_numbers = #tpu.dot_dimension_numbers<[1], [0], [0], [1], [0, 0, 1, 1], [], []>} : vector<16x32xbf16>, vector<32x128xbf16>, vector<16x128xf32> -> vector<16x128xf32>
    %194 = vector.broadcast %23 : vector<1x128xf32> to vector<16x128xf32>
    %195 = arith.addf %193, %194 : vector<16x128xf32>
    %196 = arith.mulf %195, %195 : vector<16x128xf32>
    %197 = arith.mulf %195, %196 : vector<16x128xf32>
    %cst_78 = arith.constant 4.471500e-02 : f32
    %198 = vector.broadcast %cst_78 : f32 to vector<16x128xf32>
    %199 = arith.mulf %198, %197 : vector<16x128xf32>
    %200 = arith.addf %195, %199 : vector<16x128xf32>
    %cst_79 = arith.constant 0.797884583 : f32
    %201 = vector.broadcast %cst_79 : f32 to vector<16x128xf32>
    %202 = arith.mulf %201, %200 : vector<16x128xf32>
    %203 = math.tanh %202 : vector<16x128xf32>
    %cst_80 = arith.constant 1.000000e+00 : f32
    %204 = vector.broadcast %cst_80 : f32 to vector<16x128xf32>
    %205 = arith.addf %204, %203 : vector<16x128xf32>
    %cst_81 = arith.constant 5.000000e-01 : f32
    %206 = vector.broadcast %cst_81 : f32 to vector<16x128xf32>
    %207 = arith.mulf %206, %205 : vector<16x128xf32>
    %208 = arith.mulf %195, %207 : vector<16x128xf32>
    %209 = arith.truncf %208 : vector<16x128xf32> to vector<16x128xbf16>
    %cst_82 = arith.constant dense<0.000000e+00> : vector<16x32xf32>
    %210 = tpu.matmul %209, %24, %cst_82 {dimension_numbers = #tpu.dot_dimension_numbers<[1], [0], [0], [1], [0, 0, 1, 1], [], []>} : vector<16x128xbf16>, vector<128x32xbf16>, vector<16x32xf32> -> vector<16x32xf32>
    %211 = vector.broadcast %25 : vector<1x32xf32> to vector<16x32xf32>
    %212 = arith.addf %210, %211 : vector<16x32xf32>
    %213 = arith.addf %165, %212 : vector<16x32xf32>
    %214 = arith.truncf %213 : vector<16x32xf32> to vector<16x32xbf16>
    %cst_83 = arith.constant dense<0.000000e+00> : vector<16x32xf32>
    %215 = tpu.matmul %214, %26, %cst_83 {dimension_numbers = #tpu.dot_dimension_numbers<[1], [0], [0], [1], [0, 0, 1, 1], [], []>} : vector<16x32xbf16>, vector<32x32xbf16>, vector<16x32xf32> -> vector<16x32xf32>
    %216 = vector.broadcast %27 : vector<1x32xf32> to vector<16x32xf32>
    %217 = arith.addf %215, %216 : vector<16x32xf32>
    %218 = arith.addf %15, %217 : vector<16x32xf32>
    %219 = vector.extract_strided_slice %16 {offsets = [6, 0], sizes = [1, 32], strides = [1, 1]} : vector<8x32xf32> to vector<1x32xf32>
    %220 = vector.shape_cast %219 : vector<1x32xf32> to vector<32xf32>
    %221 = vector.extract_strided_slice %16 {offsets = [7, 0], sizes = [1, 32], strides = [1, 1]} : vector<8x32xf32> to vector<1x32xf32>
    %222 = vector.shape_cast %221 : vector<1x32xf32> to vector<32xf32>
    %cst_84 = arith.constant dense<0.000000e+00> : vector<16xf32>
    %223 = vector.multi_reduction <add>, %218, %cst_84 [1] : vector<16x32xf32> to vector<16xf32>
    %224 = vector.shape_cast %223 : vector<16xf32> to vector<16x1xf32>
    %cst_85 = arith.constant 3.200000e+01 : f32
    %225 = vector.broadcast %cst_85 : f32 to vector<16x1xf32>
    %226 = arith.divf %224, %225 : vector<16x1xf32>
    %227 = vector.broadcast %226 : vector<16x1xf32> to vector<16x32xf32>
    %228 = arith.subf %218, %227 : vector<16x32xf32>
    %229 = arith.mulf %228, %228 : vector<16x32xf32>
    %cst_86 = arith.constant dense<0.000000e+00> : vector<16xf32>
    %230 = vector.multi_reduction <add>, %229, %cst_86 [1] : vector<16x32xf32> to vector<16xf32>
    %231 = vector.shape_cast %230 : vector<16xf32> to vector<16x1xf32>
    %cst_87 = arith.constant 3.200000e+01 : f32
    %232 = vector.broadcast %cst_87 : f32 to vector<16x1xf32>
    %233 = arith.divf %231, %232 : vector<16x1xf32>
    %cst_88 = arith.constant 9.99999974E-6 : f32
    %234 = vector.broadcast %cst_88 : f32 to vector<16x1xf32>
    %235 = arith.addf %233, %234 : vector<16x1xf32>
    %236 = math.rsqrt %235 : vector<16x1xf32>
    %237 = vector.broadcast %236 : vector<16x1xf32> to vector<16x32xf32>
    %238 = arith.mulf %228, %237 : vector<16x32xf32>
    %239 = vector.shape_cast %220 : vector<32xf32> to vector<1x32xf32>
    %240 = vector.broadcast %239 : vector<1x32xf32> to vector<16x32xf32>
    %241 = arith.mulf %238, %240 : vector<16x32xf32>
    %242 = vector.shape_cast %222 : vector<32xf32> to vector<1x32xf32>
    %243 = vector.broadcast %242 : vector<1x32xf32> to vector<16x32xf32>
    %244 = arith.addf %241, %243 : vector<16x32xf32>
    %245 = arith.truncf %244 : vector<16x32xf32> to vector<16x32xbf16>
    %cst_89 = arith.constant dense<0.000000e+00> : vector<16x32xf32>
    %246 = tpu.matmul %245, %28, %cst_89 {dimension_numbers = #tpu.dot_dimension_numbers<[1], [0], [0], [1], [0, 0, 1, 1], [], []>} : vector<16x32xbf16>, vector<32x32xbf16>, vector<16x32xf32> -> vector<16x32xf32>
    %247 = vector.broadcast %29 : vector<1x32xf32> to vector<16x32xf32>
    %248 = arith.addf %246, %247 : vector<16x32xf32>
    %249 = arith.negf %248 : vector<16x32xf32>
    %250 = math.exp %249 : vector<16x32xf32>
    %cst_90 = arith.constant 1.000000e+00 : f32
    %251 = vector.broadcast %cst_90 : f32 to vector<16x32xf32>
    %252 = arith.addf %251, %250 : vector<16x32xf32>
    %253 = arith.divf %251, %252 : vector<16x32xf32>
    %254 = arith.mulf %248, %253 : vector<16x32xf32>
    %255 = arith.truncf %254 : vector<16x32xf32> to vector<16x32xbf16>
    %cst_91 = arith.constant dense<0.000000e+00> : vector<16x32xf32>
    %256 = tpu.matmul %255, %30, %cst_91 {dimension_numbers = #tpu.dot_dimension_numbers<[1], [0], [0], [1], [0, 0, 1, 1], [], []>} : vector<16x32xbf16>, vector<32x32xbf16>, vector<16x32xf32> -> vector<16x32xf32>
    %257 = vector.broadcast %31 : vector<1x32xf32> to vector<16x32xf32>
    %258 = arith.addf %256, %257 : vector<16x32xf32>
    %259 = arith.addf %218, %258 : vector<16x32xf32>
    %cst_92 = arith.constant 0.000000e+00 : f32
    %260 = vector.broadcast %cst_92 : f32 to vector<1x32xf32>
    %261 = tpu.concatenate %260, %259, %260 in 0 : vector<1x32xf32>, vector<16x32xf32>, vector<1x32xf32> -> vector<18x32xf32>
    %c0_93 = arith.constant 0 : index
    %c0_94 = arith.constant 0 : index
    %c0_95 = arith.constant 0 : index
    %262 = vector.load %arg21[%c0_93, %c0_94, %c0_95] : memref<1x18x32xf32, #tpu.memory_space<vmem>>, vector<1x18x32xf32>
    %263 = vector.shape_cast %262 : vector<1x18x32xf32> to vector<18x32xf32>
    %264 = vector.shape_cast %261 : vector<18x32xf32> to vector<1x18x32xf32>
    tpu.vector_store %arg21[%c0_93, %c0_94, %c0_95], %264 {strides = array<i32>} : memref<1x18x32xf32, #tpu.memory_space<vmem>>, vector<1x18x32xf32>,
    return
  }
  func.func @transform_0(%arg0: i32) -> (i32, i32, i32) {
    %c0_i32 = arith.constant 0 : i32
    %c0_i32_0 = arith.constant 0 : i32
    %c0_i32_1 = arith.constant 0 : i32
    return %arg0, %c0_i32, %c0_i32_0 : i32, i32, i32
  }
  func.func @transform_1(%arg0: i32) -> (i32, i32) {
    %c0_i32 = arith.constant 0 : i32
    %c0_i32_0 = arith.constant 0 : i32
    %c0_i32_1 = arith.constant 0 : i32
    return %c0_i32, %c0_i32_0 : i32, i32
  }
  func.func @transform_2(%arg0: i32) -> (i32, i32) {
    %c0_i32 = arith.constant 0 : i32
    %c0_i32_0 = arith.constant 0 : i32
    %c0_i32_1 = arith.constant 0 : i32
    return %c0_i32, %c0_i32_0 : i32, i32
  }
  func.func @transform_3(%arg0: i32) -> (i32, i32) {
    %c0_i32 = arith.constant 0 : i32
    %c0_i32_0 = arith.constant 0 : i32
    %c0_i32_1 = arith.constant 0 : i32
    return %c0_i32, %c0_i32_0 : i32, i32
  }
  func.func @transform_4(%arg0: i32) -> (i32, i32) {
    %c0_i32 = arith.constant 0 : i32
    %c0_i32_0 = arith.constant 0 : i32
    %c0_i32_1 = arith.constant 0 : i32
    return %c0_i32, %c0_i32_0 : i32, i32
  }
  func.func @transform_5(%arg0: i32) -> (i32, i32) {
    %c0_i32 = arith.constant 0 : i32
    %c0_i32_0 = arith.constant 0 : i32
    %c0_i32_1 = arith.constant 0 : i32
    return %c0_i32, %c0_i32_0 : i32, i32
  }
  func.func @transform_6(%arg0: i32) -> (i32, i32) {
    %c0_i32 = arith.constant 0 : i32
    %c0_i32_0 = arith.constant 0 : i32
    %c0_i32_1 = arith.constant 0 : i32
    return %c0_i32, %c0_i32_0 : i32, i32
  }
  func.func @transform_7(%arg0: i32) -> (i32, i32) {
    %c0_i32 = arith.constant 0 : i32
    %c0_i32_0 = arith.constant 0 : i32
    %c0_i32_1 = arith.constant 0 : i32
    return %c0_i32, %c0_i32_0 : i32, i32
  }
  func.func @transform_8(%arg0: i32) -> (i32, i32) {
    %c0_i32 = arith.constant 0 : i32
    %c0_i32_0 = arith.constant 0 : i32
    %c0_i32_1 = arith.constant 0 : i32
    return %c0_i32, %c0_i32_0 : i32, i32
  }
  func.func @transform_9(%arg0: i32) -> (i32, i32) {
    %c0_i32 = arith.constant 0 : i32
    %c0_i32_0 = arith.constant 0 : i32
    %c0_i32_1 = arith.constant 0 : i32
    return %c0_i32, %c0_i32_0 : i32, i32
  }
  func.func @transform_10(%arg0: i32) -> (i32, i32) {
    %c0_i32 = arith.constant 0 : i32
    %c0_i32_0 = arith.constant 0 : i32
    %c0_i32_1 = arith.constant 0 : i32
    return %c0_i32, %c0_i32_0 : i32, i32
  }
  func.func @transform_11(%arg0: i32) -> (i32, i32) {
    %c0_i32 = arith.constant 0 : i32
    %c0_i32_0 = arith.constant 0 : i32
    %c0_i32_1 = arith.constant 0 : i32
    return %c0_i32, %c0_i32_0 : i32, i32
  }
  func.func @transform_12(%arg0: i32) -> (i32, i32) {
    %c0_i32 = arith.constant 0 : i32
    %c0_i32_0 = arith.constant 0 : i32
    %c0_i32_1 = arith.constant 0 : i32
    return %c0_i32, %c0_i32_0 : i32, i32
  }
  func.func @transform_13(%arg0: i32) -> (i32, i32) {
    %c0_i32 = arith.constant 0 : i32
    %c0_i32_0 = arith.constant 0 : i32
    %c0_i32_1 = arith.constant 0 : i32
    return %c0_i32, %c0_i32_0 : i32, i32
  }
  func.func @transform_14(%arg0: i32) -> (i32, i32) {
    %c0_i32 = arith.constant 0 : i32
    %c0_i32_0 = arith.constant 0 : i32
    %c0_i32_1 = arith.constant 0 : i32
    return %c0_i32, %c0_i32_0 : i32, i32
  }
  func.func @transform_15(%arg0: i32) -> (i32, i32) {
    %c0_i32 = arith.constant 0 : i32
    %c0_i32_0 = arith.constant 0 : i32
    %c0_i32_1 = arith.constant 0 : i32
    return %c0_i32, %c0_i32_0 : i32, i32
  }
  func.func @transform_16(%arg0: i32) -> (i32, i32) {
    %c0_i32 = arith.constant 0 : i32
    %c0_i32_0 = arith.constant 0 : i32
    %c0_i32_1 = arith.constant 0 : i32
    return %c0_i32, %c0_i32_0 : i32, i32
  }
  func.func @transform_17(%arg0: i32) -> (i32, i32) {
    %c0_i32 = arith.constant 0 : i32
    %c0_i32_0 = arith.constant 0 : i32
    %c0_i32_1 = arith.constant 0 : i32
    return %c0_i32, %c0_i32_0 : i32, i32
  }
  func.func @transform_18(%arg0: i32) -> (i32, i32) {
    %c0_i32 = arith.constant 0 : i32
    %c0_i32_0 = arith.constant 0 : i32
    %c0_i32_1 = arith.constant 0 : i32
    return %c0_i32, %c0_i32_0 : i32, i32
  }
  func.func @transform_19(%arg0: i32) -> (i32, i32) {
    %c0_i32 = arith.constant 0 : i32
    %c0_i32_0 = arith.constant 0 : i32
    %c0_i32_1 = arith.constant 0 : i32
    return %c0_i32, %c0_i32_0 : i32, i32
  }
  func.func @transform_20(%arg0: i32) -> (i32, i32, i32) {
    %c0_i32 = arith.constant 0 : i32
    %c0_i32_0 = arith.constant 0 : i32
    %c0_i32_1 = arith.constant 0 : i32
    return %arg0, %c0_i32, %c0_i32_0 : i32, i32, i32
  }
}

module attributes {stable_mosaic.version = 11 : i64} {
  func.func @_conv_att_kernel(%arg0: i32, %arg1: memref<1x18x32xf32, #tpu.memory_space<vmem>>, %arg2: memref<96x64xbf16, #tpu.memory_space<vmem>>, %arg3: memref<1x64xf32, #tpu.memory_space<vmem>>, %arg4: memref<8x16xf32, #tpu.memory_space<vmem>>, %arg5: memref<8x64xf32, #tpu.memory_space<vmem>>, %arg6: memref<64x192xbf16, #tpu.memory_space<vmem>>, %arg7: memref<256x8xbf16, #tpu.memory_space<vmem>>, %arg8: memref<256x8xbf16, #tpu.memory_space<vmem>>, %arg9: memref<64x64xbf16, #tpu.memory_space<vmem>>, %arg10: memref<1x64xf32, #tpu.memory_space<vmem>>, %arg11: memref<64x256xbf16, #tpu.memory_space<vmem>>, %arg12: memref<1x256xf32, #tpu.memory_space<vmem>>, %arg13: memref<256x64xbf16, #tpu.memory_space<vmem>>, %arg14: memref<1x64xf32, #tpu.memory_space<vmem>>, %arg15: memref<64x64xbf16, #tpu.memory_space<vmem>>, %arg16: memref<1x64xf32, #tpu.memory_space<vmem>>, %arg17: memref<64x64xbf16, #tpu.memory_space<vmem>>, %arg18: memref<1x64xf32, #tpu.memory_space<vmem>>, %arg19: memref<64x64xbf16, #tpu.memory_space<vmem>>, %arg20: memref<1x64xf32, #tpu.memory_space<vmem>>, %arg21: memref<1x10x64xf32, #tpu.memory_space<vmem>>) attributes {dimension_semantics = [#tpu.dimension_semantics<parallel>], iteration_bounds = array<i64: 8>, scalar_prefetch = 0 : i64, scratch_operands = 0 : i64, tpu.core_type = #tpu.core_type<tc>, window_params = [{transform_indices = @transform_0, window_bounds = array<i64: 1, 18, 32>}, {pipeline_mode = #tpu.pipeline_mode<synchronous>, transform_indices = @transform_1, window_bounds = array<i64: 96, 64>}, {pipeline_mode = #tpu.pipeline_mode<synchronous>, transform_indices = @transform_2, window_bounds = array<i64: 1, 64>}, {pipeline_mode = #tpu.pipeline_mode<synchronous>, transform_indices = @transform_3, window_bounds = array<i64: 8, 16>}, {pipeline_mode = #tpu.pipeline_mode<synchronous>, transform_indices = @transform_4, window_bounds = array<i64: 8, 64>}, {pipeline_mode = #tpu.pipeline_mode<synchronous>, transform_indices = @transform_5, window_bounds = array<i64: 64, 192>}, {pipeline_mode = #tpu.pipeline_mode<synchronous>, transform_indices = @transform_6, window_bounds = array<i64: 256, 8>}, {pipeline_mode = #tpu.pipeline_mode<synchronous>, transform_indices = @transform_7, window_bounds = array<i64: 256, 8>}, {pipeline_mode = #tpu.pipeline_mode<synchronous>, transform_indices = @transform_8, window_bounds = array<i64: 64, 64>}, {pipeline_mode = #tpu.pipeline_mode<synchronous>, transform_indices = @transform_9, window_bounds = array<i64: 1, 64>}, {pipeline_mode = #tpu.pipeline_mode<synchronous>, transform_indices = @transform_10, window_bounds = array<i64: 64, 256>}, {pipeline_mode = #tpu.pipeline_mode<synchronous>, transform_indices = @transform_11, window_bounds = array<i64: 1, 256>}, {pipeline_mode = #tpu.pipeline_mode<synchronous>, transform_indices = @transform_12, window_bounds = array<i64: 256, 64>}, {pipeline_mode = #tpu.pipeline_mode<synchronous>, transform_indices = @transform_13, window_bounds = array<i64: 1, 64>}, {pipeline_mode = #tpu.pipeline_mode<synchronous>, transform_indices = @transform_14, window_bounds = array<i64: 64, 64>}, {pipeline_mode = #tpu.pipeline_mode<synchronous>, transform_indices = @transform_15, window_bounds = array<i64: 1, 64>}, {pipeline_mode = #tpu.pipeline_mode<synchronous>, transform_indices = @transform_16, window_bounds = array<i64: 64, 64>}, {pipeline_mode = #tpu.pipeline_mode<synchronous>, transform_indices = @transform_17, window_bounds = array<i64: 1, 64>}, {pipeline_mode = #tpu.pipeline_mode<synchronous>, transform_indices = @transform_18, window_bounds = array<i64: 64, 64>}, {pipeline_mode = #tpu.pipeline_mode<synchronous>, transform_indices = @transform_19, window_bounds = array<i64: 1, 64>}, {transform_indices = @transform_20, window_bounds = array<i64: 1, 10, 64>}]} {
    %c0 = arith.constant 0 : index
    %c0_0 = arith.constant 0 : index
    %c0_1 = arith.constant 0 : index
    %0 = vector.load %arg1[%c0, %c0_0, %c0_1] : memref<1x18x32xf32, #tpu.memory_space<vmem>>, vector<1x18x32xf32>
    %1 = vector.shape_cast %0 : vector<1x18x32xf32> to vector<18x32xf32>
    %2 = vector.extract_strided_slice %1 {offsets = [0, 0], sizes = [16, 32], strides = [1, 1]} : vector<18x32xf32> to vector<16x32xf32>
    %3 = vector.extract_strided_slice %1 {offsets = [1, 0], sizes = [16, 32], strides = [1, 1]} : vector<18x32xf32> to vector<16x32xf32>
    %4 = vector.extract_strided_slice %1 {offsets = [2, 0], sizes = [16, 32], strides = [1, 1]} : vector<18x32xf32> to vector<16x32xf32>
    %5 = tpu.concatenate %2, %3, %4 in 1 : vector<16x32xf32>, vector<16x32xf32>, vector<16x32xf32> -> vector<16x96xf32>
    %6 = arith.truncf %5 : vector<16x96xf32> to vector<16x96xbf16>
    %c0_2 = arith.constant 0 : index
    %c0_3 = arith.constant 0 : index
    %7 = vector.load %arg2[%c0_2, %c0_3] : memref<96x64xbf16, #tpu.memory_space<vmem>>, vector<96x64xbf16>
    %cst = arith.constant dense<0.000000e+00> : vector<16x64xf32>
    %8 = tpu.matmul %6, %7, %cst {dimension_numbers = #tpu.dot_dimension_numbers<[1], [0], [0], [1], [0, 0, 1, 1], [], []>} : vector<16x96xbf16>, vector<96x64xbf16>, vector<16x64xf32> -> vector<16x64xf32>
    %c0_4 = arith.constant 0 : index
    %c0_5 = arith.constant 0 : index
    %9 = vector.load %arg3[%c0_4, %c0_5] : memref<1x64xf32, #tpu.memory_space<vmem>>, vector<1x64xf32>
    %10 = vector.broadcast %9 : vector<1x64xf32> to vector<16x64xf32>
    %11 = arith.addf %8, %10 : vector<16x64xf32>
    %cst_6 = arith.constant 0.000000e+00 : f32
    %12 = vector.broadcast %cst_6 : f32 to vector<16x64xf32>
    %13 = arith.maximumf %11, %12 : vector<16x64xf32>
    %c0_7 = arith.constant 0 : index
    %c0_8 = arith.constant 0 : index
    %14 = vector.load %arg4[%c0_7, %c0_8] : memref<8x16xf32, #tpu.memory_space<vmem>>, vector<8x16xf32>
    %cst_9 = arith.constant dense<0.000000e+00> : vector<8x64xf32>
    %15 = tpu.matmul %14, %13, %cst_9 {dimension_numbers = #tpu.dot_dimension_numbers<[1], [0], [0], [1], [0, 0, 1, 1], [], []>} : vector<8x16xf32>, vector<16x64xf32>, vector<8x64xf32> -> vector<8x64xf32>
    %c0_10 = arith.constant 0 : index
    %c0_11 = arith.constant 0 : index
    %16 = vector.load %arg5[%c0_10, %c0_11] : memref<8x64xf32, #tpu.memory_space<vmem>>, vector<8x64xf32>
    %c0_12 = arith.constant 0 : index
    %c0_13 = arith.constant 0 : index
    %17 = vector.load %arg6[%c0_12, %c0_13] : memref<64x192xbf16, #tpu.memory_space<vmem>>, vector<64x192xbf16>
    %c0_14 = arith.constant 0 : index
    %c0_15 = arith.constant 0 : index
    %18 = vector.load %arg7[%c0_14, %c0_15] : memref<256x8xbf16, #tpu.memory_space<vmem>>, vector<256x8xbf16>
    %c0_16 = arith.constant 0 : index
    %c0_17 = arith.constant 0 : index
    %19 = vector.load %arg8[%c0_16, %c0_17] : memref<256x8xbf16, #tpu.memory_space<vmem>>, vector<256x8xbf16>
    %c0_18 = arith.constant 0 : index
    %c0_19 = arith.constant 0 : index
    %20 = vector.load %arg9[%c0_18, %c0_19] : memref<64x64xbf16, #tpu.memory_space<vmem>>, vector<64x64xbf16>
    %c0_20 = arith.constant 0 : index
    %c0_21 = arith.constant 0 : index
    %21 = vector.load %arg10[%c0_20, %c0_21] : memref<1x64xf32, #tpu.memory_space<vmem>>, vector<1x64xf32>
    %c0_22 = arith.constant 0 : index
    %c0_23 = arith.constant 0 : index
    %22 = vector.load %arg11[%c0_22, %c0_23] : memref<64x256xbf16, #tpu.memory_space<vmem>>, vector<64x256xbf16>
    %c0_24 = arith.constant 0 : index
    %c0_25 = arith.constant 0 : index
    %23 = vector.load %arg12[%c0_24, %c0_25] : memref<1x256xf32, #tpu.memory_space<vmem>>, vector<1x256xf32>
    %c0_26 = arith.constant 0 : index
    %c0_27 = arith.constant 0 : index
    %24 = vector.load %arg13[%c0_26, %c0_27] : memref<256x64xbf16, #tpu.memory_space<vmem>>, vector<256x64xbf16>
    %c0_28 = arith.constant 0 : index
    %c0_29 = arith.constant 0 : index
    %25 = vector.load %arg14[%c0_28, %c0_29] : memref<1x64xf32, #tpu.memory_space<vmem>>, vector<1x64xf32>
    %c0_30 = arith.constant 0 : index
    %c0_31 = arith.constant 0 : index
    %26 = vector.load %arg15[%c0_30, %c0_31] : memref<64x64xbf16, #tpu.memory_space<vmem>>, vector<64x64xbf16>
    %c0_32 = arith.constant 0 : index
    %c0_33 = arith.constant 0 : index
    %27 = vector.load %arg16[%c0_32, %c0_33] : memref<1x64xf32, #tpu.memory_space<vmem>>, vector<1x64xf32>
    %c0_34 = arith.constant 0 : index
    %c0_35 = arith.constant 0 : index
    %28 = vector.load %arg17[%c0_34, %c0_35] : memref<64x64xbf16, #tpu.memory_space<vmem>>, vector<64x64xbf16>
    %c0_36 = arith.constant 0 : index
    %c0_37 = arith.constant 0 : index
    %29 = vector.load %arg18[%c0_36, %c0_37] : memref<1x64xf32, #tpu.memory_space<vmem>>, vector<1x64xf32>
    %c0_38 = arith.constant 0 : index
    %c0_39 = arith.constant 0 : index
    %30 = vector.load %arg19[%c0_38, %c0_39] : memref<64x64xbf16, #tpu.memory_space<vmem>>, vector<64x64xbf16>
    %c0_40 = arith.constant 0 : index
    %c0_41 = arith.constant 0 : index
    %31 = vector.load %arg20[%c0_40, %c0_41] : memref<1x64xf32, #tpu.memory_space<vmem>>, vector<1x64xf32>
    %32 = vector.extract_strided_slice %16 {offsets = [0, 0], sizes = [1, 64], strides = [1, 1]} : vector<8x64xf32> to vector<1x64xf32>
    %33 = vector.shape_cast %32 : vector<1x64xf32> to vector<64xf32>
    %34 = vector.extract_strided_slice %16 {offsets = [1, 0], sizes = [1, 64], strides = [1, 1]} : vector<8x64xf32> to vector<1x64xf32>
    %35 = vector.shape_cast %34 : vector<1x64xf32> to vector<64xf32>
    %cst_42 = arith.constant dense<0.000000e+00> : vector<8xf32>
    %36 = vector.multi_reduction <add>, %15, %cst_42 [1] : vector<8x64xf32> to vector<8xf32>
    %37 = vector.shape_cast %36 : vector<8xf32> to vector<8x1xf32>
    %cst_43 = arith.constant 6.400000e+01 : f32
    %38 = vector.broadcast %cst_43 : f32 to vector<8x1xf32>
    %39 = arith.divf %37, %38 : vector<8x1xf32>
    %40 = vector.broadcast %39 : vector<8x1xf32> to vector<8x64xf32>
    %41 = arith.subf %15, %40 : vector<8x64xf32>
    %42 = arith.mulf %41, %41 : vector<8x64xf32>
    %cst_44 = arith.constant dense<0.000000e+00> : vector<8xf32>
    %43 = vector.multi_reduction <add>, %42, %cst_44 [1] : vector<8x64xf32> to vector<8xf32>
    %44 = vector.shape_cast %43 : vector<8xf32> to vector<8x1xf32>
    %cst_45 = arith.constant 6.400000e+01 : f32
    %45 = vector.broadcast %cst_45 : f32 to vector<8x1xf32>
    %46 = arith.divf %44, %45 : vector<8x1xf32>
    %cst_46 = arith.constant 9.99999974E-6 : f32
    %47 = vector.broadcast %cst_46 : f32 to vector<8x1xf32>
    %48 = arith.addf %46, %47 : vector<8x1xf32>
    %49 = math.rsqrt %48 : vector<8x1xf32>
    %50 = vector.broadcast %49 : vector<8x1xf32> to vector<8x64xf32>
    %51 = arith.mulf %41, %50 : vector<8x64xf32>
    %52 = vector.shape_cast %33 : vector<64xf32> to vector<1x64xf32>
    %53 = vector.broadcast %52 : vector<1x64xf32> to vector<8x64xf32>
    %54 = arith.mulf %51, %53 : vector<8x64xf32>
    %55 = vector.shape_cast %35 : vector<64xf32> to vector<1x64xf32>
    %56 = vector.broadcast %55 : vector<1x64xf32> to vector<8x64xf32>
    %57 = arith.addf %54, %56 : vector<8x64xf32>
    %58 = vector.extract_strided_slice %16 {offsets = [2, 0], sizes = [1, 64], strides = [1, 1]} : vector<8x64xf32> to vector<1x64xf32>
    %59 = vector.shape_cast %58 : vector<1x64xf32> to vector<64xf32>
    %60 = vector.extract_strided_slice %16 {offsets = [3, 0], sizes = [1, 64], strides = [1, 1]} : vector<8x64xf32> to vector<1x64xf32>
    %61 = vector.shape_cast %60 : vector<1x64xf32> to vector<64xf32>
    %cst_47 = arith.constant dense<0.000000e+00> : vector<8xf32>
    %62 = vector.multi_reduction <add>, %57, %cst_47 [1] : vector<8x64xf32> to vector<8xf32>
    %63 = vector.shape_cast %62 : vector<8xf32> to vector<8x1xf32>
    %cst_48 = arith.constant 6.400000e+01 : f32
    %64 = vector.broadcast %cst_48 : f32 to vector<8x1xf32>
    %65 = arith.divf %63, %64 : vector<8x1xf32>
    %66 = vector.broadcast %65 : vector<8x1xf32> to vector<8x64xf32>
    %67 = arith.subf %57, %66 : vector<8x64xf32>
    %68 = arith.mulf %67, %67 : vector<8x64xf32>
    %cst_49 = arith.constant dense<0.000000e+00> : vector<8xf32>
    %69 = vector.multi_reduction <add>, %68, %cst_49 [1] : vector<8x64xf32> to vector<8xf32>
    %70 = vector.shape_cast %69 : vector<8xf32> to vector<8x1xf32>
    %cst_50 = arith.constant 6.400000e+01 : f32
    %71 = vector.broadcast %cst_50 : f32 to vector<8x1xf32>
    %72 = arith.divf %70, %71 : vector<8x1xf32>
    %cst_51 = arith.constant 9.99999974E-6 : f32
    %73 = vector.broadcast %cst_51 : f32 to vector<8x1xf32>
    %74 = arith.addf %72, %73 : vector<8x1xf32>
    %75 = math.rsqrt %74 : vector<8x1xf32>
    %76 = vector.broadcast %75 : vector<8x1xf32> to vector<8x64xf32>
    %77 = arith.mulf %67, %76 : vector<8x64xf32>
    %78 = vector.shape_cast %59 : vector<64xf32> to vector<1x64xf32>
    %79 = vector.broadcast %78 : vector<1x64xf32> to vector<8x64xf32>
    %80 = arith.mulf %77, %79 : vector<8x64xf32>
    %81 = vector.shape_cast %61 : vector<64xf32> to vector<1x64xf32>
    %82 = vector.broadcast %81 : vector<1x64xf32> to vector<8x64xf32>
    %83 = arith.addf %80, %82 : vector<8x64xf32>
    %84 = arith.truncf %83 : vector<8x64xf32> to vector<8x64xbf16>
    %cst_52 = arith.constant dense<0.000000e+00> : vector<8x192xf32>
    %85 = tpu.matmul %84, %17, %cst_52 {dimension_numbers = #tpu.dot_dimension_numbers<[1], [0], [0], [1], [0, 0, 1, 1], [], []>} : vector<8x64xbf16>, vector<64x192xbf16>, vector<8x192xf32> -> vector<8x192xf32>
    %86 = vector.extract_strided_slice %85 {offsets = [0, 0], sizes = [8, 64], strides = [1, 1]} : vector<8x192xf32> to vector<8x64xf32>
    %87 = arith.truncf %86 : vector<8x64xf32> to vector<8x64xbf16>
    %88 = vector.extract_strided_slice %85 {offsets = [0, 64], sizes = [8, 64], strides = [1, 1]} : vector<8x192xf32> to vector<8x64xf32>
    %89 = arith.truncf %88 : vector<8x64xf32> to vector<8x64xbf16>
    %90 = vector.extract_strided_slice %85 {offsets = [0, 128], sizes = [8, 64], strides = [1, 1]} : vector<8x192xf32> to vector<8x64xf32>
    %91 = arith.truncf %90 : vector<8x64xf32> to vector<8x64xbf16>
    %cst_53 = arith.constant dense<0.000000e+00> : vector<256x64xf32>
    %92 = tpu.matmul %18, %89, %cst_53 {dimension_numbers = #tpu.dot_dimension_numbers<[1], [0], [0], [1], [0, 0, 1, 1], [], []>} : vector<256x8xbf16>, vector<8x64xbf16>, vector<256x64xf32> -> vector<256x64xf32>
    %93 = arith.truncf %92 : vector<256x64xf32> to vector<256x64xbf16>
    %cst_54 = arith.constant dense<0.000000e+00> : vector<256x64xf32>
    %94 = tpu.matmul %19, %91, %cst_54 {dimension_numbers = #tpu.dot_dimension_numbers<[1], [0], [0], [1], [0, 0, 1, 1], [], []>} : vector<256x8xbf16>, vector<8x64xbf16>, vector<256x64xf32> -> vector<256x64xf32>
    %95 = arith.truncf %94 : vector<256x64xf32> to vector<256x64xbf16>
    %96 = vector.extract_strided_slice %87 {offsets = [0, 0], sizes = [8, 16], strides = [1, 1]} : vector<8x64xbf16> to vector<8x16xbf16>
    %97 = vector.extract_strided_slice %93 {offsets = [0, 0], sizes = [256, 16], strides = [1, 1]} : vector<256x64xbf16> to vector<256x16xbf16>
    %98 = vector.extract_strided_slice %95 {offsets = [0, 0], sizes = [256, 16], strides = [1, 1]} : vector<256x64xbf16> to vector<256x16xbf16>
    "tpu.trace_start"() <{level = 10 : i32, message = "td,kd->tk"}> : () -> ()
    %cst_55 = arith.constant dense<0.000000e+00> : vector<8x256xf32>
    %99 = tpu.matmul %96, %97, %cst_55 {dimension_numbers = #tpu.dot_dimension_numbers<[1], [1], [0], [0], [0, 0, 1, 0], [], []>} : vector<8x16xbf16>, vector<256x16xbf16>, vector<8x256xf32> -> vector<8x256xf32>
    "tpu.trace_stop"() : () -> ()
    %cst_56 = arith.constant dense<0xFF800000> : vector<8xf32>
    %100 = vector.multi_reduction <maximumf>, %99, %cst_56 [1] : vector<8x256xf32> to vector<8xf32>
    %101 = vector.shape_cast %100 : vector<8xf32> to vector<8x1xf32>
    %102 = vector.broadcast %101 : vector<8x1xf32> to vector<8x256xf32>
    %103 = arith.subf %99, %102 : vector<8x256xf32>
    %104 = math.exp %103 : vector<8x256xf32>
    %cst_57 = arith.constant dense<0.000000e+00> : vector<8xf32>
    %105 = vector.multi_reduction <add>, %104, %cst_57 [1] : vector<8x256xf32> to vector<8xf32>
    %106 = vector.shape_cast %105 : vector<8xf32> to vector<8x1xf32>
    %107 = tpu.reciprocal %106 {approx = true} : vector<8x1xf32> -> vector<8x1xf32>
    %108 = vector.broadcast %107 : vector<8x1xf32> to vector<8x256xf32>
    %109 = arith.mulf %104, %108 : vector<8x256xf32>
    %110 = arith.truncf %109 : vector<8x256xf32> to vector<8x256xbf16>
    %cst_58 = arith.constant dense<0.000000e+00> : vector<8x16xf32>
    %111 = tpu.matmul %110, %98, %cst_58 {dimension_numbers = #tpu.dot_dimension_numbers<[1], [0], [0], [1], [0, 0, 1, 1], [], []>} : vector<8x256xbf16>, vector<256x16xbf16>, vector<8x16xf32> -> vector<8x16xf32>
    %112 = vector.extract_strided_slice %87 {offsets = [0, 16], sizes = [8, 16], strides = [1, 1]} : vector<8x64xbf16> to vector<8x16xbf16>
    %113 = vector.extract_strided_slice %93 {offsets = [0, 16], sizes = [256, 16], strides = [1, 1]} : vector<256x64xbf16> to vector<256x16xbf16>
    %114 = vector.extract_strided_slice %95 {offsets = [0, 16], sizes = [256, 16], strides = [1, 1]} : vector<256x64xbf16> to vector<256x16xbf16>
    "tpu.trace_start"() <{level = 10 : i32, message = "td,kd->tk"}> : () -> ()
    %cst_59 = arith.constant dense<0.000000e+00> : vector<8x256xf32>
    %115 = tpu.matmul %112, %113, %cst_59 {dimension_numbers = #tpu.dot_dimension_numbers<[1], [1], [0], [0], [0, 0, 1, 0], [], []>} : vector<8x16xbf16>, vector<256x16xbf16>, vector<8x256xf32> -> vector<8x256xf32>
    "tpu.trace_stop"() : () -> ()
    %cst_60 = arith.constant dense<0xFF800000> : vector<8xf32>
    %116 = vector.multi_reduction <maximumf>, %115, %cst_60 [1] : vector<8x256xf32> to vector<8xf32>
    %117 = vector.shape_cast %116 : vector<8xf32> to vector<8x1xf32>
    %118 = vector.broadcast %117 : vector<8x1xf32> to vector<8x256xf32>
    %119 = arith.subf %115, %118 : vector<8x256xf32>
    %120 = math.exp %119 : vector<8x256xf32>
    %cst_61 = arith.constant dense<0.000000e+00> : vector<8xf32>
    %121 = vector.multi_reduction <add>, %120, %cst_61 [1] : vector<8x256xf32> to vector<8xf32>
    %122 = vector.shape_cast %121 : vector<8xf32> to vector<8x1xf32>
    %123 = tpu.reciprocal %122 {approx = true} : vector<8x1xf32> -> vector<8x1xf32>
    %124 = vector.broadcast %123 : vector<8x1xf32> to vector<8x256xf32>
    %125 = arith.mulf %120, %124 : vector<8x256xf32>
    %126 = arith.truncf %125 : vector<8x256xf32> to vector<8x256xbf16>
    %cst_62 = arith.constant dense<0.000000e+00> : vector<8x16xf32>
    %127 = tpu.matmul %126, %114, %cst_62 {dimension_numbers = #tpu.dot_dimension_numbers<[1], [0], [0], [1], [0, 0, 1, 1], [], []>} : vector<8x256xbf16>, vector<256x16xbf16>, vector<8x16xf32> -> vector<8x16xf32>
    %128 = vector.extract_strided_slice %87 {offsets = [0, 32], sizes = [8, 16], strides = [1, 1]} : vector<8x64xbf16> to vector<8x16xbf16>
    %129 = vector.extract_strided_slice %93 {offsets = [0, 32], sizes = [256, 16], strides = [1, 1]} : vector<256x64xbf16> to vector<256x16xbf16>
    %130 = vector.extract_strided_slice %95 {offsets = [0, 32], sizes = [256, 16], strides = [1, 1]} : vector<256x64xbf16> to vector<256x16xbf16>
    "tpu.trace_start"() <{level = 10 : i32, message = "td,kd->tk"}> : () -> ()
    %cst_63 = arith.constant dense<0.000000e+00> : vector<8x256xf32>
    %131 = tpu.matmul %128, %129, %cst_63 {dimension_numbers = #tpu.dot_dimension_numbers<[1], [1], [0], [0], [0, 0, 1, 0], [], []>} : vector<8x16xbf16>, vector<256x16xbf16>, vector<8x256xf32> -> vector<8x256xf32>
    "tpu.trace_stop"() : () -> ()
    %cst_64 = arith.constant dense<0xFF800000> : vector<8xf32>
    %132 = vector.multi_reduction <maximumf>, %131, %cst_64 [1] : vector<8x256xf32> to vector<8xf32>
    %133 = vector.shape_cast %132 : vector<8xf32> to vector<8x1xf32>
    %134 = vector.broadcast %133 : vector<8x1xf32> to vector<8x256xf32>
    %135 = arith.subf %131, %134 : vector<8x256xf32>
    %136 = math.exp %135 : vector<8x256xf32>
    %cst_65 = arith.constant dense<0.000000e+00> : vector<8xf32>
    %137 = vector.multi_reduction <add>, %136, %cst_65 [1] : vector<8x256xf32> to vector<8xf32>
    %138 = vector.shape_cast %137 : vector<8xf32> to vector<8x1xf32>
    %139 = tpu.reciprocal %138 {approx = true} : vector<8x1xf32> -> vector<8x1xf32>
    %140 = vector.broadcast %139 : vector<8x1xf32> to vector<8x256xf32>
    %141 = arith.mulf %136, %140 : vector<8x256xf32>
    %142 = arith.truncf %141 : vector<8x256xf32> to vector<8x256xbf16>
    %cst_66 = arith.constant dense<0.000000e+00> : vector<8x16xf32>
    %143 = tpu.matmul %142, %130, %cst_66 {dimension_numbers = #tpu.dot_dimension_numbers<[1], [0], [0], [1], [0, 0, 1, 1], [], []>} : vector<8x256xbf16>, vector<256x16xbf16>, vector<8x16xf32> -> vector<8x16xf32>
    %144 = vector.extract_strided_slice %87 {offsets = [0, 48], sizes = [8, 16], strides = [1, 1]} : vector<8x64xbf16> to vector<8x16xbf16>
    %145 = vector.extract_strided_slice %93 {offsets = [0, 48], sizes = [256, 16], strides = [1, 1]} : vector<256x64xbf16> to vector<256x16xbf16>
    %146 = vector.extract_strided_slice %95 {offsets = [0, 48], sizes = [256, 16], strides = [1, 1]} : vector<256x64xbf16> to vector<256x16xbf16>
    "tpu.trace_start"() <{level = 10 : i32, message = "td,kd->tk"}> : () -> ()
    %cst_67 = arith.constant dense<0.000000e+00> : vector<8x256xf32>
    %147 = tpu.matmul %144, %145, %cst_67 {dimension_numbers = #tpu.dot_dimension_numbers<[1], [1], [0], [0], [0, 0, 1, 0], [], []>} : vector<8x16xbf16>, vector<256x16xbf16>, vector<8x256xf32> -> vector<8x256xf32>
    "tpu.trace_stop"() : () -> ()
    %cst_68 = arith.constant dense<0xFF800000> : vector<8xf32>
    %148 = vector.multi_reduction <maximumf>, %147, %cst_68 [1] : vector<8x256xf32> to vector<8xf32>
    %149 = vector.shape_cast %148 : vector<8xf32> to vector<8x1xf32>
    %150 = vector.broadcast %149 : vector<8x1xf32> to vector<8x256xf32>
    %151 = arith.subf %147, %150 : vector<8x256xf32>
    %152 = math.exp %151 : vector<8x256xf32>
    %cst_69 = arith.constant dense<0.000000e+00> : vector<8xf32>
    %153 = vector.multi_reduction <add>, %152, %cst_69 [1] : vector<8x256xf32> to vector<8xf32>
    %154 = vector.shape_cast %153 : vector<8xf32> to vector<8x1xf32>
    %155 = tpu.reciprocal %154 {approx = true} : vector<8x1xf32> -> vector<8x1xf32>
    %156 = vector.broadcast %155 : vector<8x1xf32> to vector<8x256xf32>
    %157 = arith.mulf %152, %156 : vector<8x256xf32>
    %158 = arith.truncf %157 : vector<8x256xf32> to vector<8x256xbf16>
    %cst_70 = arith.constant dense<0.000000e+00> : vector<8x16xf32>
    %159 = tpu.matmul %158, %146, %cst_70 {dimension_numbers = #tpu.dot_dimension_numbers<[1], [0], [0], [1], [0, 0, 1, 1], [], []>} : vector<8x256xbf16>, vector<256x16xbf16>, vector<8x16xf32> -> vector<8x16xf32>
    %160 = tpu.concatenate %111, %127, %143, %159 in 1 : vector<8x16xf32>, vector<8x16xf32>, vector<8x16xf32>, vector<8x16xf32> -> vector<8x64xf32>
    %161 = arith.truncf %160 : vector<8x64xf32> to vector<8x64xbf16>
    %cst_71 = arith.constant dense<0.000000e+00> : vector<8x64xf32>
    %162 = tpu.matmul %161, %20, %cst_71 {dimension_numbers = #tpu.dot_dimension_numbers<[1], [0], [0], [1], [0, 0, 1, 1], [], []>} : vector<8x64xbf16>, vector<64x64xbf16>, vector<8x64xf32> -> vector<8x64xf32>
    %163 = vector.broadcast %21 : vector<1x64xf32> to vector<8x64xf32>
    %164 = arith.addf %162, %163 : vector<8x64xf32>
    %165 = arith.addf %57, %164 : vector<8x64xf32>
    %166 = vector.extract_strided_slice %16 {offsets = [4, 0], sizes = [1, 64], strides = [1, 1]} : vector<8x64xf32> to vector<1x64xf32>
    %167 = vector.shape_cast %166 : vector<1x64xf32> to vector<64xf32>
    %168 = vector.extract_strided_slice %16 {offsets = [5, 0], sizes = [1, 64], strides = [1, 1]} : vector<8x64xf32> to vector<1x64xf32>
    %169 = vector.shape_cast %168 : vector<1x64xf32> to vector<64xf32>
    %cst_72 = arith.constant dense<0.000000e+00> : vector<8xf32>
    %170 = vector.multi_reduction <add>, %165, %cst_72 [1] : vector<8x64xf32> to vector<8xf32>
    %171 = vector.shape_cast %170 : vector<8xf32> to vector<8x1xf32>
    %cst_73 = arith.constant 6.400000e+01 : f32
    %172 = vector.broadcast %cst_73 : f32 to vector<8x1xf32>
    %173 = arith.divf %171, %172 : vector<8x1xf32>
    %174 = vector.broadcast %173 : vector<8x1xf32> to vector<8x64xf32>
    %175 = arith.subf %165, %174 : vector<8x64xf32>
    %176 = arith.mulf %175, %175 : vector<8x64xf32>
    %cst_74 = arith.constant dense<0.000000e+00> : vector<8xf32>
    %177 = vector.multi_reduction <add>, %176, %cst_74 [1] : vector<8x64xf32> to vector<8xf32>
    %178 = vector.shape_cast %177 : vector<8xf32> to vector<8x1xf32>
    %cst_75 = arith.constant 6.400000e+01 : f32
    %179 = vector.broadcast %cst_75 : f32 to vector<8x1xf32>
    %180 = arith.divf %178, %179 : vector<8x1xf32>
    %cst_76 = arith.constant 9.99999974E-6 : f32
    %181 = vector.broadcast %cst_76 : f32 to vector<8x1xf32>
    %182 = arith.addf %180, %181 : vector<8x1xf32>
    %183 = math.rsqrt %182 : vector<8x1xf32>
    %184 = vector.broadcast %183 : vector<8x1xf32> to vector<8x64xf32>
    %185 = arith.mulf %175, %184 : vector<8x64xf32>
    %186 = vector.shape_cast %167 : vector<64xf32> to vector<1x64xf32>
    %187 = vector.broadcast %186 : vector<1x64xf32> to vector<8x64xf32>
    %188 = arith.mulf %185, %187 : vector<8x64xf32>
    %189 = vector.shape_cast %169 : vector<64xf32> to vector<1x64xf32>
    %190 = vector.broadcast %189 : vector<1x64xf32> to vector<8x64xf32>
    %191 = arith.addf %188, %190 : vector<8x64xf32>
    %192 = arith.truncf %191 : vector<8x64xf32> to vector<8x64xbf16>
    %cst_77 = arith.constant dense<0.000000e+00> : vector<8x256xf32>
    %193 = tpu.matmul %192, %22, %cst_77 {dimension_numbers = #tpu.dot_dimension_numbers<[1], [0], [0], [1], [0, 0, 1, 1], [], []>} : vector<8x64xbf16>, vector<64x256xbf16>, vector<8x256xf32> -> vector<8x256xf32>
    %194 = vector.broadcast %23 : vector<1x256xf32> to vector<8x256xf32>
    %195 = arith.addf %193, %194 : vector<8x256xf32>
    %196 = arith.mulf %195, %195 : vector<8x256xf32>
    %197 = arith.mulf %195, %196 : vector<8x256xf32>
    %cst_78 = arith.constant 4.471500e-02 : f32
    %198 = vector.broadcast %cst_78 : f32 to vector<8x256xf32>
    %199 = arith.mulf %198, %197 : vector<8x256xf32>
    %200 = arith.addf %195, %199 : vector<8x256xf32>
    %cst_79 = arith.constant 0.797884583 : f32
    %201 = vector.broadcast %cst_79 : f32 to vector<8x256xf32>
    %202 = arith.mulf %201, %200 : vector<8x256xf32>
    %203 = math.tanh %202 : vector<8x256xf32>
    %cst_80 = arith.constant 1.000000e+00 : f32
    %204 = vector.broadcast %cst_80 : f32 to vector<8x256xf32>
    %205 = arith.addf %204, %203 : vector<8x256xf32>
    %cst_81 = arith.constant 5.000000e-01 : f32
    %206 = vector.broadcast %cst_81 : f32 to vector<8x256xf32>
    %207 = arith.mulf %206, %205 : vector<8x256xf32>
    %208 = arith.mulf %195, %207 : vector<8x256xf32>
    %209 = arith.truncf %208 : vector<8x256xf32> to vector<8x256xbf16>
    %cst_82 = arith.constant dense<0.000000e+00> : vector<8x64xf32>
    %210 = tpu.matmul %209, %24, %cst_82 {dimension_numbers = #tpu.dot_dimension_numbers<[1], [0], [0], [1], [0, 0, 1, 1], [], []>} : vector<8x256xbf16>, vector<256x64xbf16>, vector<8x64xf32> -> vector<8x64xf32>
    %211 = vector.broadcast %25 : vector<1x64xf32> to vector<8x64xf32>
    %212 = arith.addf %210, %211 : vector<8x64xf32>
    %213 = arith.addf %165, %212 : vector<8x64xf32>
    %214 = arith.truncf %213 : vector<8x64xf32> to vector<8x64xbf16>
    %cst_83 = arith.constant dense<0.000000e+00> : vector<8x64xf32>
    %215 = tpu.matmul %214, %26, %cst_83 {dimension_numbers = #tpu.dot_dimension_numbers<[1], [0], [0], [1], [0, 0, 1, 1], [], []>} : vector<8x64xbf16>, vector<64x64xbf16>, vector<8x64xf32> -> vector<8x64xf32>
    %216 = vector.broadcast %27 : vector<1x64xf32> to vector<8x64xf32>
    %217 = arith.addf %215, %216 : vector<8x64xf32>
    %218 = arith.addf %15, %217 : vector<8x64xf32>
    %219 = vector.extract_strided_slice %16 {offsets = [6, 0], sizes = [1, 64], strides = [1, 1]} : vector<8x64xf32> to vector<1x64xf32>
    %220 = vector.shape_cast %219 : vector<1x64xf32> to vector<64xf32>
    %221 = vector.extract_strided_slice %16 {offsets = [7, 0], sizes = [1, 64], strides = [1, 1]} : vector<8x64xf32> to vector<1x64xf32>
    %222 = vector.shape_cast %221 : vector<1x64xf32> to vector<64xf32>
    %cst_84 = arith.constant dense<0.000000e+00> : vector<8xf32>
    %223 = vector.multi_reduction <add>, %218, %cst_84 [1] : vector<8x64xf32> to vector<8xf32>
    %224 = vector.shape_cast %223 : vector<8xf32> to vector<8x1xf32>
    %cst_85 = arith.constant 6.400000e+01 : f32
    %225 = vector.broadcast %cst_85 : f32 to vector<8x1xf32>
    %226 = arith.divf %224, %225 : vector<8x1xf32>
    %227 = vector.broadcast %226 : vector<8x1xf32> to vector<8x64xf32>
    %228 = arith.subf %218, %227 : vector<8x64xf32>
    %229 = arith.mulf %228, %228 : vector<8x64xf32>
    %cst_86 = arith.constant dense<0.000000e+00> : vector<8xf32>
    %230 = vector.multi_reduction <add>, %229, %cst_86 [1] : vector<8x64xf32> to vector<8xf32>
    %231 = vector.shape_cast %230 : vector<8xf32> to vector<8x1xf32>
    %cst_87 = arith.constant 6.400000e+01 : f32
    %232 = vector.broadcast %cst_87 : f32 to vector<8x1xf32>
    %233 = arith.divf %231, %232 : vector<8x1xf32>
    %cst_88 = arith.constant 9.99999974E-6 : f32
    %234 = vector.broadcast %cst_88 : f32 to vector<8x1xf32>
    %235 = arith.addf %233, %234 : vector<8x1xf32>
    %236 = math.rsqrt %235 : vector<8x1xf32>
    %237 = vector.broadcast %236 : vector<8x1xf32> to vector<8x64xf32>
    %238 = arith.mulf %228, %237 : vector<8x64xf32>
    %239 = vector.shape_cast %220 : vector<64xf32> to vector<1x64xf32>
    %240 = vector.broadcast %239 : vector<1x64xf32> to vector<8x64xf32>
    %241 = arith.mulf %238, %240 : vector<8x64xf32>
    %242 = vector.shape_cast %222 : vector<64xf32> to vector<1x64xf32>
    %243 = vector.broadcast %242 : vector<1x64xf32> to vector<8x64xf32>
    %244 = arith.addf %241, %243 : vector<8x64xf32>
    %245 = arith.truncf %244 : vector<8x64xf32> to vector<8x64xbf16>
    %cst_89 = arith.constant dense<0.000000e+00> : vector<8x64xf32>
    %246 = tpu.matmul %245, %28, %cst_89 {dimension_numbers = #tpu.dot_dimension_numbers<[1], [0], [0], [1], [0, 0, 1, 1], [], []>} : vector<8x64xbf16>, vector<64x64xbf16>, vector<8x64xf32> -> vector<8x64xf32>
    %247 = vector.broadcast %29 : vector<1x64xf32> to vector<8x64xf32>
    %248 = arith.addf %246, %247 : vector<8x64xf32>
    %249 = arith.negf %248 : vector<8x64xf32>
    %250 = math.exp %249 : vector<8x64xf32>
    %cst_90 = arith.constant 1.000000e+00 : f32
    %251 = vector.broadcast %cst_90 : f32 to vector<8x64xf32>
    %252 = arith.addf %251, %250 : vector<8x64xf32>
    %253 = arith.divf %251, %252 : vector<8x64xf32>
    %254 = arith.mulf %248, %253 : vector<8x64xf32>
    %255 = arith.truncf %254 : vector<8x64xf32> to vector<8x64xbf16>
    %cst_91 = arith.constant dense<0.000000e+00> : vector<8x64xf32>
    %256 = tpu.matmul %255, %30, %cst_91 {dimension_numbers = #tpu.dot_dimension_numbers<[1], [0], [0], [1], [0, 0, 1, 1], [], []>} : vector<8x64xbf16>, vector<64x64xbf16>, vector<8x64xf32> -> vector<8x64xf32>
    %257 = vector.broadcast %31 : vector<1x64xf32> to vector<8x64xf32>
    %258 = arith.addf %256, %257 : vector<8x64xf32>
    %259 = arith.addf %218, %258 : vector<8x64xf32>
    %cst_92 = arith.constant 0.000000e+00 : f32
    %260 = vector.broadcast %cst_92 : f32 to vector<1x64xf32>
    %261 = tpu.concatenate %260, %259, %260 in 0 : vector<1x64xf32>, vector<8x64xf32>, vector<1x64xf32> -> vector<10x64xf32>
    %c0_93 = arith.constant 0 : index
    %c0_94 = arith.constant 0 : index
    %c0_95 = arith.constant 0 : index
    %262 = vector.load %arg21[%c0_93, %c0_94, %c0_95] : memref<1x10x64xf32, #tpu.memory_space<vmem>>, vector<1x10x64xf32>
    %263 = vector.shape_cast %262 : vector<1x10x64xf32> to vector<10x64xf32>
    %264 = vector.shape_cast %261 : vector<10x64xf32> to vector<1x10x64xf32>
    tpu.vector_store %arg21[%c0_93, %c0_94, %c0_95], %264 {strides = array<i32>} : memref<1x10x64xf32, #tpu.memory_space<vmem>>, vector<1x10x64xf32>,
    return
  }
  func.func @transform_0(%arg0: i32) -> (i32, i32, i32) {
    %c0_i32 = arith.constant 0 : i32
    %c0_i32_0 = arith.constant 0 : i32
    %c0_i32_1 = arith.constant 0 : i32
    return %arg0, %c0_i32, %c0_i32_0 : i32, i32, i32
  }
  func.func @transform_1(%arg0: i32) -> (i32, i32) {
    %c0_i32 = arith.constant 0 : i32
    %c0_i32_0 = arith.constant 0 : i32
    %c0_i32_1 = arith.constant 0 : i32
    return %c0_i32, %c0_i32_0 : i32, i32
  }
  func.func @transform_2(%arg0: i32) -> (i32, i32) {
    %c0_i32 = arith.constant 0 : i32
    %c0_i32_0 = arith.constant 0 : i32
    %c0_i32_1 = arith.constant 0 : i32
    return %c0_i32, %c0_i32_0 : i32, i32
  }
  func.func @transform_3(%arg0: i32) -> (i32, i32) {
    %c0_i32 = arith.constant 0 : i32
    %c0_i32_0 = arith.constant 0 : i32
    %c0_i32_1 = arith.constant 0 : i32
    return %c0_i32, %c0_i32_0 : i32, i32
  }
  func.func @transform_4(%arg0: i32) -> (i32, i32) {
    %c0_i32 = arith.constant 0 : i32
    %c0_i32_0 = arith.constant 0 : i32
    %c0_i32_1 = arith.constant 0 : i32
    return %c0_i32, %c0_i32_0 : i32, i32
  }
  func.func @transform_5(%arg0: i32) -> (i32, i32) {
    %c0_i32 = arith.constant 0 : i32
    %c0_i32_0 = arith.constant 0 : i32
    %c0_i32_1 = arith.constant 0 : i32
    return %c0_i32, %c0_i32_0 : i32, i32
  }
  func.func @transform_6(%arg0: i32) -> (i32, i32) {
    %c0_i32 = arith.constant 0 : i32
    %c0_i32_0 = arith.constant 0 : i32
    %c0_i32_1 = arith.constant 0 : i32
    return %c0_i32, %c0_i32_0 : i32, i32
  }
  func.func @transform_7(%arg0: i32) -> (i32, i32) {
    %c0_i32 = arith.constant 0 : i32
    %c0_i32_0 = arith.constant 0 : i32
    %c0_i32_1 = arith.constant 0 : i32
    return %c0_i32, %c0_i32_0 : i32, i32
  }
  func.func @transform_8(%arg0: i32) -> (i32, i32) {
    %c0_i32 = arith.constant 0 : i32
    %c0_i32_0 = arith.constant 0 : i32
    %c0_i32_1 = arith.constant 0 : i32
    return %c0_i32, %c0_i32_0 : i32, i32
  }
  func.func @transform_9(%arg0: i32) -> (i32, i32) {
    %c0_i32 = arith.constant 0 : i32
    %c0_i32_0 = arith.constant 0 : i32
    %c0_i32_1 = arith.constant 0 : i32
    return %c0_i32, %c0_i32_0 : i32, i32
  }
  func.func @transform_10(%arg0: i32) -> (i32, i32) {
    %c0_i32 = arith.constant 0 : i32
    %c0_i32_0 = arith.constant 0 : i32
    %c0_i32_1 = arith.constant 0 : i32
    return %c0_i32, %c0_i32_0 : i32, i32
  }
  func.func @transform_11(%arg0: i32) -> (i32, i32) {
    %c0_i32 = arith.constant 0 : i32
    %c0_i32_0 = arith.constant 0 : i32
    %c0_i32_1 = arith.constant 0 : i32
    return %c0_i32, %c0_i32_0 : i32, i32
  }
  func.func @transform_12(%arg0: i32) -> (i32, i32) {
    %c0_i32 = arith.constant 0 : i32
    %c0_i32_0 = arith.constant 0 : i32
    %c0_i32_1 = arith.constant 0 : i32
    return %c0_i32, %c0_i32_0 : i32, i32
  }
  func.func @transform_13(%arg0: i32) -> (i32, i32) {
    %c0_i32 = arith.constant 0 : i32
    %c0_i32_0 = arith.constant 0 : i32
    %c0_i32_1 = arith.constant 0 : i32
    return %c0_i32, %c0_i32_0 : i32, i32
  }
  func.func @transform_14(%arg0: i32) -> (i32, i32) {
    %c0_i32 = arith.constant 0 : i32
    %c0_i32_0 = arith.constant 0 : i32
    %c0_i32_1 = arith.constant 0 : i32
    return %c0_i32, %c0_i32_0 : i32, i32
  }
  func.func @transform_15(%arg0: i32) -> (i32, i32) {
    %c0_i32 = arith.constant 0 : i32
    %c0_i32_0 = arith.constant 0 : i32
    %c0_i32_1 = arith.constant 0 : i32
    return %c0_i32, %c0_i32_0 : i32, i32
  }
  func.func @transform_16(%arg0: i32) -> (i32, i32) {
    %c0_i32 = arith.constant 0 : i32
    %c0_i32_0 = arith.constant 0 : i32
    %c0_i32_1 = arith.constant 0 : i32
    return %c0_i32, %c0_i32_0 : i32, i32
  }
  func.func @transform_17(%arg0: i32) -> (i32, i32) {
    %c0_i32 = arith.constant 0 : i32
    %c0_i32_0 = arith.constant 0 : i32
    %c0_i32_1 = arith.constant 0 : i32
    return %c0_i32, %c0_i32_0 : i32, i32
  }
  func.func @transform_18(%arg0: i32) -> (i32, i32) {
    %c0_i32 = arith.constant 0 : i32
    %c0_i32_0 = arith.constant 0 : i32
    %c0_i32_1 = arith.constant 0 : i32
    return %c0_i32, %c0_i32_0 : i32, i32
  }
  func.func @transform_19(%arg0: i32) -> (i32, i32) {
    %c0_i32 = arith.constant 0 : i32
    %c0_i32_0 = arith.constant 0 : i32
    %c0_i32_1 = arith.constant 0 : i32
    return %c0_i32, %c0_i32_0 : i32, i32
  }
  func.func @transform_20(%arg0: i32) -> (i32, i32, i32) {
    %c0_i32 = arith.constant 0 : i32
    %c0_i32_0 = arith.constant 0 : i32
    %c0_i32_1 = arith.constant 0 : i32
    return %arg0, %c0_i32, %c0_i32_0 : i32, i32, i32
  }
}

module attributes {stable_mosaic.version = 11 : i64} {
  func.func @_conv_up_kernel(%arg0: i32, %arg1: memref<1x10x64xf32, #tpu.memory_space<vmem>>, %arg2: memref<192x32xbf16, #tpu.memory_space<vmem>>, %arg3: memref<1x32xf32, #tpu.memory_space<vmem>>, %arg4: memref<32x128xbf16, #tpu.memory_space<vmem>>, %arg5: memref<1x128xf32, #tpu.memory_space<vmem>>, %arg6: memref<1x8x128xf32, #tpu.memory_space<vmem>>) attributes {dimension_semantics = [#tpu.dimension_semantics<parallel>], iteration_bounds = array<i64: 8>, scalar_prefetch = 0 : i64, scratch_operands = 0 : i64, tpu.core_type = #tpu.core_type<tc>, window_params = [{transform_indices = @transform_0, window_bounds = array<i64: 1, 10, 64>}, {pipeline_mode = #tpu.pipeline_mode<synchronous>, transform_indices = @transform_1, window_bounds = array<i64: 192, 32>}, {pipeline_mode = #tpu.pipeline_mode<synchronous>, transform_indices = @transform_2, window_bounds = array<i64: 1, 32>}, {pipeline_mode = #tpu.pipeline_mode<synchronous>, transform_indices = @transform_3, window_bounds = array<i64: 32, 128>}, {pipeline_mode = #tpu.pipeline_mode<synchronous>, transform_indices = @transform_4, window_bounds = array<i64: 1, 128>}, {transform_indices = @transform_5, window_bounds = array<i64: 1, 8, 128>}]} {
    %c0 = arith.constant 0 : index
    %c0_0 = arith.constant 0 : index
    %c0_1 = arith.constant 0 : index
    %0 = vector.load %arg1[%c0, %c0_0, %c0_1] : memref<1x10x64xf32, #tpu.memory_space<vmem>>, vector<1x10x64xf32>
    %1 = vector.shape_cast %0 : vector<1x10x64xf32> to vector<10x64xf32>
    %2 = vector.extract_strided_slice %1 {offsets = [0, 0], sizes = [8, 64], strides = [1, 1]} : vector<10x64xf32> to vector<8x64xf32>
    %3 = vector.extract_strided_slice %1 {offsets = [1, 0], sizes = [8, 64], strides = [1, 1]} : vector<10x64xf32> to vector<8x64xf32>
    %4 = vector.extract_strided_slice %1 {offsets = [2, 0], sizes = [8, 64], strides = [1, 1]} : vector<10x64xf32> to vector<8x64xf32>
    %5 = tpu.concatenate %2, %3, %4 in 1 : vector<8x64xf32>, vector<8x64xf32>, vector<8x64xf32> -> vector<8x192xf32>
    %6 = arith.truncf %5 : vector<8x192xf32> to vector<8x192xbf16>
    %c0_2 = arith.constant 0 : index
    %c0_3 = arith.constant 0 : index
    %7 = vector.load %arg2[%c0_2, %c0_3] : memref<192x32xbf16, #tpu.memory_space<vmem>>, vector<192x32xbf16>
    %cst = arith.constant dense<0.000000e+00> : vector<8x32xf32>
    %8 = tpu.matmul %6, %7, %cst {dimension_numbers = #tpu.dot_dimension_numbers<[1], [0], [0], [1], [0, 0, 1, 1], [], []>} : vector<8x192xbf16>, vector<192x32xbf16>, vector<8x32xf32> -> vector<8x32xf32>
    %c0_4 = arith.constant 0 : index
    %c0_5 = arith.constant 0 : index
    %9 = vector.load %arg3[%c0_4, %c0_5] : memref<1x32xf32, #tpu.memory_space<vmem>>, vector<1x32xf32>
    %10 = vector.broadcast %9 : vector<1x32xf32> to vector<8x32xf32>
    %11 = arith.addf %8, %10 : vector<8x32xf32>
    %cst_6 = arith.constant 0.000000e+00 : f32
    %12 = vector.broadcast %cst_6 : f32 to vector<8x32xf32>
    %13 = arith.maximumf %11, %12 : vector<8x32xf32>
    %14 = arith.truncf %13 : vector<8x32xf32> to vector<8x32xbf16>
    %c0_7 = arith.constant 0 : index
    %c0_8 = arith.constant 0 : index
    %15 = vector.load %arg4[%c0_7, %c0_8] : memref<32x128xbf16, #tpu.memory_space<vmem>>, vector<32x128xbf16>
    %cst_9 = arith.constant dense<0.000000e+00> : vector<8x128xf32>
    %16 = tpu.matmul %14, %15, %cst_9 {dimension_numbers = #tpu.dot_dimension_numbers<[1], [0], [0], [1], [0, 0, 1, 1], [], []>} : vector<8x32xbf16>, vector<32x128xbf16>, vector<8x128xf32> -> vector<8x128xf32>
    %c0_10 = arith.constant 0 : index
    %c0_11 = arith.constant 0 : index
    %17 = vector.load %arg5[%c0_10, %c0_11] : memref<1x128xf32, #tpu.memory_space<vmem>>, vector<1x128xf32>
    %18 = vector.broadcast %17 : vector<1x128xf32> to vector<8x128xf32>
    %19 = arith.addf %16, %18 : vector<8x128xf32>
    %c0_12 = arith.constant 0 : index
    %c0_13 = arith.constant 0 : index
    %c0_14 = arith.constant 0 : index
    %20 = vector.load %arg6[%c0_12, %c0_13, %c0_14] : memref<1x8x128xf32, #tpu.memory_space<vmem>>, vector<1x8x128xf32>
    %21 = vector.shape_cast %20 : vector<1x8x128xf32> to vector<8x128xf32>
    %22 = vector.shape_cast %19 : vector<8x128xf32> to vector<1x8x128xf32>
    tpu.vector_store %arg6[%c0_12, %c0_13, %c0_14], %22 {strides = array<i32>} : memref<1x8x128xf32, #tpu.memory_space<vmem>>, vector<1x8x128xf32>,
    return
  }
  func.func @transform_0(%arg0: i32) -> (i32, i32, i32) {
    %c0_i32 = arith.constant 0 : i32
    %c0_i32_0 = arith.constant 0 : i32
    %c0_i32_1 = arith.constant 0 : i32
    return %arg0, %c0_i32, %c0_i32_0 : i32, i32, i32
  }
  func.func @transform_1(%arg0: i32) -> (i32, i32) {
    %c0_i32 = arith.constant 0 : i32
    %c0_i32_0 = arith.constant 0 : i32
    %c0_i32_1 = arith.constant 0 : i32
    return %c0_i32, %c0_i32_0 : i32, i32
  }
  func.func @transform_2(%arg0: i32) -> (i32, i32) {
    %c0_i32 = arith.constant 0 : i32
    %c0_i32_0 = arith.constant 0 : i32
    %c0_i32_1 = arith.constant 0 : i32
    return %c0_i32, %c0_i32_0 : i32, i32
  }
  func.func @transform_3(%arg0: i32) -> (i32, i32) {
    %c0_i32 = arith.constant 0 : i32
    %c0_i32_0 = arith.constant 0 : i32
    %c0_i32_1 = arith.constant 0 : i32
    return %c0_i32, %c0_i32_0 : i32, i32
  }
  func.func @transform_4(%arg0: i32) -> (i32, i32) {
    %c0_i32 = arith.constant 0 : i32
    %c0_i32_0 = arith.constant 0 : i32
    %c0_i32_1 = arith.constant 0 : i32
    return %c0_i32, %c0_i32_0 : i32, i32
  }
  func.func @transform_5(%arg0: i32) -> (i32, i32, i32) {
    %c0_i32 = arith.constant 0 : i32
    %c0_i32_0 = arith.constant 0 : i32
    %c0_i32_1 = arith.constant 0 : i32
    return %arg0, %c0_i32, %c0_i32_0 : i32, i32, i32
  }
}

</mosaic_0001>

<bundles_post_ra>
// kernel: scfe_block_linformer.5
= control target key start
LH: loop header
LB: loop body
LE: loop exit
PB: predicated region body
PF: predicated region fallthrough
CT: control target
= control target key end

     0   :  { %s621_s18 = smov 0   ;;  %s692_s0 = inlined_call_operand.vmem [shape: f32[8,10,64], index: 0, kind: input, shape index: {}]   ;;  %s693_s1 = inlined_call_operand.vmem [shape: bf16[192,32], index: 1, kind: input, shape index: {}]   ;;  %s694_s2 = inlined_call_operand.vmem [shape: f32[1,32], index: 2, kind: input, shape index: {}]   ;;  %s695_s3 = inlined_call_operand.vmem [shape: bf16[32,128], index: 3, kind: input, shape index: {}]   ;;  %s696_s4 = inlined_call_operand.vmem [shape: f32[1,128], index: 4, kind: input, shape index: {}]   ;;  %s697_s5 = inlined_call_operand.vmem [shape: f32[8,8,128], index: 5, kind: output, shape index: {}]  }
   0x1 LB: > { %s513_s19 = sadd.s32 4294967295, %s585_s18   ;;  %p517_p0 = scmp.ge.s32.totalorder %s585_s18, 1  ;;  %s585_s18 = sphi %s621_s18, %s15_s18  }
   0x2   : > { %p187_p1 = scmp.lt.s32.totalorder %s585_s18, 9 }
   0x4   : > { %p188_p2 = pnand %p517_p0, %p187_p1 }
   0x5   : > { %p214_p3 = scmp.lt.s32.totalorder (!%p188_p2), %s513_s19, 7  ;;  %v587_v0 = vmov (!%p188_p2), 0   ;;  %v565_v1 = vld [vmem:[%s693_s1] sm:$0xff] (!%p188_p2)   ;;  %v566_v2 = vld [vmem:[%s693_s1 + $0x8] sm:$0xff] (!%p188_p2)   ;;  %vm228_vm0 = vcmask (!%p188_p2), 1046528   ;;  %v588_v5 = vmov (!%p188_p2), 0.0  }
   0x6   : > { %191 = sbr.rel (%p188_p2) target bundleno = 571 (0x23b), region = 40  ;;  %350 = vmatprep.subr.bf16.mxu0 (!%p188_p2), %v587_v0  ;;  %545 = vmatprep.subr.bf16.mxu1 (!%p188_p2), %v588_v5  ;;  %v567_v8 = vld [vmem:[%s693_s1 + $0x10] sm:$0xff] (!%p188_p2)   ;;  %vm235_vm1 = vcmask (!%p188_p2), 1045504   ;;  %s589_s30 = smov (!%p188_p2), 64   ;;  %v568_v12 = vld [vmem:[%s693_s1 + $0x18] sm:$0xff] (!%p188_p2)   ;;  %vm240_vm2 = vcmask (!%p188_p2), 523264  }
   0x7   : > { %351 = vmatpush1.bf16.msra.mxu0 (!%p188_p2), %v565_v1  ;;  %v569_v15 = vld [vmem:[%s693_s1 + $0x20] sm:$0xff] (!%p188_p2)   ;;  %v570_v16 = vld [vmem:[%s693_s1 + $0x28] sm:$0xff] (!%p188_p2)   ;;  %v571_v17 = vld [vmem:[%s693_s1 + $0x30] sm:$0xff] (!%p188_p2)   ;;  %vm590_vm3 = vmmov (!%p188_p2), 0   ;;  %vm415_vm4 = vcmask (!%p188_p2), 261120  }
   0x8   : > { %352 = vmatprep.subr.bf16.mxu0 (!%p188_p2), %v587_v0  ;;  %v572_v18 = vld [vmem:[%s693_s1 + $0x38] sm:$0xff] (!%p188_p2)   ;;  %v573_v19 = vld [vmem:[%s693_s1 + $0x40] sm:$0xff] (!%p188_p2)   ;;  %v574_v20 = vld [vmem:[%s693_s1 + $0x48] sm:$0xff] (!%p188_p2)   ;;  %549 = vmatprep.mubr.msk.bf16.mxu1 (!%p188_p2), %vm590_vm3, %v588_v5 }
   0x9   : > { %v575_v21 = vld [vmem:[%s693_s1 + $0x50] sm:$0xff] (!%p188_p2)   ;;  %v576_v22 = vld [vmem:[%s693_s1 + $0x58] sm:$0xff] (!%p188_p2)   ;;  %v577_v26 = vld [vmem:[%s695_s3] sm:$0xff] (!%p188_p2)  }
   0xa   : > { %546 = vmatpush3.bf16.msra.mxu1 (!%p188_p2), %v577_v26  ;;  %v578_v27 = vld [vmem:[%s695_s3 + $0x8] sm:$0xff] (!%p188_p2)   ;;  %v521_v28 = vld [vmem:[%s694_s2] ss:$0 sm:$0xff] (!%p188_p2) }
   0xb   : > { %353 = vmatpush1.bf16.msra.mxu0 (!%p188_p2), %v566_v2  ;;  %547 = vmatprep.subr.bf16.mxu1 (!%p188_p2), %v588_v5  ;;  %v535_v36 = vld [vmem:[%s696_s4] ss:$0 sm:$0xff] (!%p188_p2) }
   0xc   : > { %354 = vmatprep.subr.bf16.mxu0 (!%p188_p2), %v587_v0 }
   0xd   : > { %s699_s19 = smov (!%p214_p3, %s513_s19), 7 }
   0xe   : > { %s541_s24 = sshll.u32 %s699_s19, 4  ;;  %548 = vmatpush3.bf16.msra.mxu1 %v578_v27  ;;  %s520_s7 = sshll.u32 %s699_s19, 3 }
   0xf   : > { %s218_s27 = scalar_lea.vmem %s692_s0, %s541_s24  ;;  %355 = vmatpush1.bf16.msra.mxu0 %v567_v8  ;;  %s222_s12 = scalar_lea.vmem %s697_s5, %s520_s7 }
  0x10   : > { %v224_v3 = vld [vmem:[%s218_s27] sm:$0xff]  ;;  %v225_v4 = vld [vmem:[%s218_s27 + $0x8] sm:$0x3]  ;;  %356 = vmatprep.subr.bf16.mxu0 %v587_v0 }
  0x11   : > { %v229_v6 = vrot.slane %v224_v3, 1  ;;  %v230_v7 = vrot.slane %v225_v4, 1  ;;  %v236_v10 = vrot.slane %v224_v3, 2  ;;  %v237_v11 = vrot.slane %v225_v4, 2 }
  0x13   : > { %v231_v9 = vsel %vm228_vm0, %v229_v6, %v230_v7  ;;  %v238_v13 = vsel %vm235_vm1, %v236_v10, %v237_v11  ;;  %357 = vmatpush1.bf16.msra.mxu0 %v568_v12 }
  0x14   : > { %232 = vrot.lane.b32.xlu0 %v231_v9, %s589_s30  ;;  %v243_v14 = vpack.c.bf16 %v238_v13, %v238_v13  ;;  %358 = vmatprep.subr.bf16.mxu0 %v587_v0 }
  0x16   : > { %534 = vmatprep.mubr.msk.bf16.mxu0 %vm240_vm2, %v243_v14 }
  0x17   : > { %359 = vmatpush1.bf16.msra.mxu0 %v569_v15 }
  0x18   : > { %360 = vmatprep.subr.bf16.mxu0 %v587_v0 }
  0x1b   : > { %361 = vmatpush1.bf16.msra.mxu0 %v570_v16 }
  0x1c   : > { %362 = vmatprep.subr.bf16.mxu0 %v587_v0 }
  0x1f   : > { %363 = vmatpush1.bf16.msra.mxu0 %v571_v17 }
  0x20   : > { %364 = vmatprep.subr.bf16.mxu0 %v587_v0 }
  0x23   : > { %365 = vmatpush1.bf16.msra.mxu0 %v572_v18 }
  0x24   : > { %366 = vmatprep.subr.bf16.mxu0 %v587_v0 }
  0x27   : > { %367 = vmatpush1.bf16.msra.mxu0 %v573_v19 }
  0x28   : > { %368 = vmatprep.subr.bf16.mxu0 %v587_v0 }
  0x2b   : > { %369 = vmatpush1.bf16.msra.mxu0 %v574_v20 }
  0x2c   : > { %370 = vmatprep.subr.bf16.mxu0 %v587_v0 }
  0x2f   : > { %371 = vmatpush1.bf16.msra.mxu0 %v575_v21 }
  0x30   : > { %372 = vmatprep.subr.bf16.mxu0 %v587_v0 }
  0x33   : > { %373 = vmatpush1.bf16.msra.mxu0 %v576_v22 }
  0x86   : > { %v233_v23 = vpop.permute.xlu0 %232 }
  0x87   : > { %v241_v24 = vsel %vm240_vm2, %v224_v3, %v233_v23 }
  0x88   : > { %v242_v25 = vpack.c.bf16 %v241_v24, %v241_v24 }
  0x8a   : > { %383 = vmatmul.mubr.bf16.vlgmr.msra.gmra.mrb[0].mxu0 %v242_v25 }
 0x15d   : > { %v384_v29 = vpop.f32.mrb[0].mxu0 }
 0x15e   : > { %v385_v30 = vadd.f32 %v521_v28, %v384_v29  ;;  %v386_v31 = vpop.f32.mrb[1].mxu0 }
 0x15f   : > { %v387_v32 = vpop.f32.mrb[2].mxu0 }
 0x160   : > { %v390_v33 = vmax.f32 %v385_v30, 0.0  ;;  %v388_v34 = vpop.f32.mrb[3].mxu0 }
 0x162   : > { %v391_v35 = vpack.c.bf16 %v390_v33, %v390_v33 }
 0x164   : > { %550 = vmatmul.mubr.msk.bf16.vlgmr.msra.gmra.mrb[0].mxu1 %vm415_vm4, %v391_v35 }
 0x237   : > { %v453_v37 = vpop.f32.mrb[0].mxu1 }
 0x238   : > { %v454_v38 = vadd.f32 %v535_v36, %v453_v37  ;;  %v551_v39 = vpop.f32.mrb[1].mxu1 }
 0x239   : > { %v456_v40 = vpop.f32.mrb[2].mxu1 }
 0x23a   : > { %459 = vst [vmem:[%s222_s12] sm:$0xff] %v454_v38  ;;  %v552_v41 = vpop.f32.mrb[3].mxu1 }
 0x23b PF: > { %s15_s18 = sadd.s32 1, %s585_s18  }
 0x23c   : > { %p12_p4 = scmp.ge.s32.totalorder %s15_s18, 10  }
 0x23e   :  { %14 = sbr.rel (!%p12_p4) target bundleno = 1 (0x1), region = 70 }

// kernel: scfe_block_linformer.3
= control target key start
LH: loop header
LB: loop body
LE: loop exit
PB: predicated region body
PF: predicated region fallthrough
CT: control target
= control target key end

     0   :  { %s5075_s0 = inlined_call_operand.vmem [shape: f32[8,1,34], index: 0, kind: input, shape index: {}]   ;;  %s5076_s1 = inlined_call_operand.vmem [shape: f32[32,3], index: 1, kind: input, shape index: {}]   ;;  %s5077_s2 = inlined_call_operand.vmem [shape: f32[32,1], index: 2, kind: input, shape index: {}]   ;;  %s5078_s3 = inlined_call_operand.vmem [shape: f32[32,16], index: 3, kind: input, shape index: {}]   ;;  %s5079_s4 = inlined_call_operand.vmem [shape: f32[8,32], index: 4, kind: input, shape index: {}]   ;;  %s5080_s5 = inlined_call_operand.vmem [shape: bf16[32,96], index: 5, kind: input, shape index: {}]   ;;  %s5081_s6 = inlined_call_operand.vmem [shape: bf16[256,16], index: 6, kind: input, shape index: {}]   ;;  %s5082_s7 = inlined_call_operand.vmem [shape: bf16[256,16], index: 7, kind: input, shape index: {}]   ;;  %s5083_s8 = inlined_call_operand.vmem [shape: bf16[32,32], index: 8, kind: input, shape index: {}]   ;;  %s5084_s9 = inlined_call_operand.vmem [shape: f32[1,32], index: 9, kind: input, shape index: {}]   ;;  %s5085_s10 = inlined_call_operand.vmem [shape: bf16[32,128], index: 10, kind: input, shape index: {}]   ;;  %s5086_s11 = inlined_call_operand.vmem [shape: f32[1,128], index: 11, kind: input, shape index: {}]   ;;  %s5087_s12 = inlined_call_operand.vmem [shape: bf16[128,32], index: 12, kind: input, shape index: {}]   ;;  %s5088_s13 = inlined_call_operand.vmem [shape: f32[1,32], index: 13, kind: input, shape index: {}]   ;;  %s5089_s14 = inlined_call_operand.vmem [shape: bf16[32,32], index: 14, kind: input, shape index: {}]   ;;  %s5090_s15 = inlined_call_operand.vmem [shape: f32[1,32], index: 15, kind: input, shape index: {}]   ;;  %s5091_s16 = inlined_call_operand.vmem [shape: bf16[32,32], index: 16, kind: input, shape index: {}]   ;;  %s5092_s17 = inlined_call_operand.vmem [shape: f32[1,32], index: 17, kind: input, shape index: {}]   ;;  %s5093_s18 = inlined_call_operand.vmem [shape: bf16[32,32], index: 18, kind: input, shape index: {}]   ;;  %s5094_s19 = inlined_call_operand.vmem [shape: f32[1,32], index: 19, kind: input, shape index: {}]   ;;  %s5095_s20 = inlined_call_operand.vmem [shape: f32[8,18,32], index: 20, kind: output, shape index: {}]  }
   0x1   :  { %5108 = sst [smem:[#allocation7_spill]] %s5075_s0 }
   0x2   :  { %5109 = sst [smem:[#allocation8_spill]] %s5076_s1  ;;  %s4189_s1 = smov 0  }
   0x3   :  { %5110 = sst [smem:[#allocation9_spill]] %s5077_s2 }
   0x4   :  { %5111 = sst [smem:[#allocation10_spill]] %s5078_s3 }
   0x5   :  { %5112 = sst [smem:[#allocation11_spill]] %s5079_s4 }
   0x6 LB: > { %s3344_s22 = sadd.s32 4294967295, %s4069_s1   ;;  %p3348_p0 = scmp.ge.s32.totalorder %s4069_s1, 1  ;;  %s4069_s1 = sphi %s4189_s1, %s30_s1  }
   0x7   : > { %p560_p1 = scmp.lt.s32.totalorder %s4069_s1, 9 }
   0x9   : > { %p561_p2 = pnand %p3348_p0, %p560_p1 }
   0xb   : > { %564 = sbr.rel (%p561_p2) target bundleno = 6286 (0x188e), region = 100 }
  0x12   : > { %p616_p3 = scmp.lt.s32.totalorder %s3344_s22, 7  ;;  %v627_v0 = vlaneseq  ;;  %s5113_s2 = sld [smem:[#allocation8_spill]]  ;;  %vm669_vm0 = vcmask 23552   ;;  %v4071_v7 = vmov 0   ;;  %vm637_vm1 = vcmask 1040384  }
  0x13   : > { %s5115_s26 = sld [smem:[#allocation7_spill]]  ;;  %s5116_s29 = sld [smem:[#allocation9_spill]]  ;;  %3917 = vset.pattern.permute.xlu1 %v4071_v7  ;;  %3918 = vset.pattern.permute.xlu0 %v4071_v7  ;;  %vm639_vm2 = vcmask 1041408   ;;  %vm682_vm3 = vcmask 1042432   ;;  %vm779_vm4 = vcmask 261120   ;;  %vm4075_vm5 = vmmov 0  }
  0x14   : > { %s5130_s22 = smov (!%p616_p3, %s3344_s22), 7  ;;  %v4202_v2 = vshrl.u32 %v627_v0, 7  ;;  %s4072_s21 = smov 127   ;;  %vm1239_vm6 = vcmask 130048   ;;  %vm1773_vm7 = vcmask 64512   ;;  %vm2748_vm8 = vcmask 195584  }
  0x15   : > { %s5117_s4 = sld [smem:[#allocation10_spill]]  ;;  %s5120_s24 = sld [smem:[#allocation11_spill]]  ;;  %vm3290_vm9 = vcmask 254976  }
  0x16   : > { %5114 = vst [vmem:[#allocation2_spill] sm:$0xff] %v4202_v2  ;;  %v629_v3 = vsub.s32 0, %v4202_v2  ;;  %s4076_s0 = smov 96   ;;  %s4077_s3 = smov 120  }
  0x17   : > { %s4078_s28 = smov 64   ;;  %s4082_s30 = smov 8  }
  0x18   : > { %v641_v1 = vld [vmem:[%s5113_s2] sm:$0xff]  ;;  %v642_v18 = vld [vmem:[%s5113_s2 + $0x8] sm:$0xff]  ;;  %v643_v19 = vld [vmem:[%s5113_s2 + $0x10] sm:$0xff] }
  0x19   : > { %3699 = vmatprep.mubr.msk.f32.mxu0 %vm669_vm0, %v641_v1  ;;  %s618_s27 = scalar_lea.vmem %s5115_s26, %s5130_s22  ;;  %v645_v6 = vld [vmem:[%s5116_s29] sm:$0xff]  ;;  %v646_v8 = vld [vmem:[%s5116_s29 + $0x8] sm:$0xff]  ;;  %v648_v9 = vld [vmem:[%s5116_s29 + $0x18] sm:$0xff]  ;;  %s4073_s26 = smov 126   ;;  %v1055_v1 = vsub.s32 1, %v4202_v2 }
  0x1a   : > { %v625_v4 = vld [vmem:[%s618_s27] sm:$0x1]  ;;  %651 = vperm.xlu1 %3917, %v645_v6   ;;  %v647_v10 = vld [vmem:[%s5116_s29 + $0x10] sm:$0xff]  ;;  %v644_v20 = vld [vmem:[%s5113_s2 + $0x18] sm:$0xff]  ;;  %s4080_s27 = smov 104  }
  0x1b   : > { %v630_v5 = vrot.slane %v625_v4, %v629_v3  ;;  %v775_v11 = vld [vmem:[%s5117_s4] sm:$0xff]  ;;  %v776_v12 = vld [vmem:[%s5117_s4 + $0x8] sm:$0xff]  ;;  %v777_v21 = vld [vmem:[%s5117_s4 + $0x10] sm:$0xff] }
  0x1c   : > { %v3855_v13 = vpack.c.bf16 %v776_v12, %v775_v11  ;;  %v778_v22 = vld [vmem:[%s5117_s4 + $0x18] sm:$0xff]  ;;  %v909_v0 = vld [vmem:[%s5120_s24] sm:$0xff] }
  0x1d   : > { %631 = vrot.lane.b32.xlu0 %v630_v5, %s4072_s21  ;;  %v3859_v23 = vpack.c.bf16 %v778_v22, %v777_v21  ;;  %v1056_v7 = vrot.slane %v909_v0, %v1055_v1  ;;  %v3946_v1 = vld [vmem:[%s5081_s6 + $0x50] sm:$0xff]  }
  0x1e   : > { %656 = vperm.xlu1 %3917, %v646_v8   ;;  %3856 = vmatprep.subr.bf16.mxu1 %v3855_v13 }
  0x1f   : > { %3858 = vmatpush3.bf16.msra.mxu1 %v3855_v13 }
  0x20   : > { %3860 = vmatprep.subr.bf16.mxu1 %v3859_v23 }
  0x21   : > { %634 = vrot.lane.b32.xlu0 %v630_v5, %s4073_s26  ;;  %s4083_s26 = smov 24  }
  0x22   : > { %666 = vperm.xlu1 %3917, %v648_v9  }
  0x23   : > { %3862 = vmatpush3.bf16.msra.mxu1 %v3859_v23 }
  0x25   : > { %661 = vperm.xlu0 %3918, %v647_v10  }
  0x8f   : > { %v632_v14 = vpop.permute.xlu0 %631 }
  0x90   : > { %v638_v15 = vsel %vm637_vm1, %v625_v4, %v632_v14  ;;  %v1050_v4 = vrot.slane %v909_v0, %v629_v3 }
  0x93   : > { %v635_v16 = vpop.permute.xlu0 %634 }
  0x94   : > { %v640_v17 = vsel %vm639_vm2, %v638_v15, %v635_v16 }
  0x95   : > { %3697 = vmatprep.subr.msk.mxu0 %vm682_vm3, %v640_v17 }
  0x96   : > { %3698 = vmatpush3.msk.msra.mxu0 %vm682_vm3, %v640_v17 }
  0x97   : > { %3700 = vmatmul.mubr.msk.f32.vlgmr.msra.gmra.mrb[0].mxu0 %vm669_vm0, %v642_v18 }
  0x98   : > { %3702 = vmatprep.mubr.msk.f32.mxu0 %vm669_vm0, %v643_v19 }
  0x99   : > { %v652_v24 = vpop.permute.xlu1 %651 }
  0x9b   : > { %3703 = vmatmul.mubr.msk.f32.gmra.mrb[2].mxu0 %vm669_vm0, %v644_v20 }
  0x9d   : > { %v657_v25 = vpop.permute.xlu1 %656 }
  0xa1   : > { %v667_v31 = vpop.permute.xlu1 %666 }
  0xa4   : > { %v662_v30 = vpop.permute.xlu0 %661 }
 0x16a   : > { %v3701_v26 = vpop.f32.mrb[0].mxu0 }
 0x16b   : > { %v758_v27 = vadd.f32 %v3701_v26, %v657_v25  ;;  %v752_v28 = vpop.f32.mrb[1].mxu0  ;;  %v3934_v25 = vld [vmem:[%s5080_s5] sm:$0xff]   ;;  %v5100_v26 = vmov 0.0  }
 0x16c   : > { %v753_v29 = vadd.f32 %v752_v28, %v652_v24  ;;  %3719 = vmatprep.subr.bf16.mxu0 %v5100_v26  ;;  %3723 = vmatprep.mubr.msk.bf16.mxu0 %vm4075_vm5, %v5100_v26 }
 0x16d   : > { %v772_v34 = vmax.f32 %v758_v27, 0.0  ;;  %3720 = vmatpush3.bf16.msra.mxu0 %v3934_v25  ;;  %v3935_v27 = vld [vmem:[%s5080_s5 + $0x8] sm:$0xff]  }
 0x16e   : > { %v771_v32 = vmax.f32 %v753_v29, 0.0  ;;  %v3704_v33 = vpop.f32.mrb[2].mxu0  ;;  %3721 = vmatprep.subr.bf16.mxu0 %v5100_v26 }
 0x16f   : > { %v768_v35 = vadd.f32 %v3704_v33, %v667_v31  ;;  %v762_v36 = vpop.f32.mrb[3].mxu0 }
 0x170   : > { %v763_v37 = vadd.f32 %v762_v36, %v662_v30  ;;  %3713 = vmatprep.mubr.msk.f32.mxu1 %vm779_vm4, %v771_v32 }
 0x171   : > { %3714 = vmatmul.mubr.msk.f32.vlgmr.msra.gmra.mrb[0].mxu1 %vm779_vm4, %v772_v34  ;;  %v774_v39 = vmax.f32 %v768_v35, 0.0  ;;  %3722 = vmatpush3.bf16.msra.mxu0 %v3935_v27  ;;  %v1087_v34 = vsub.s32 2, %v4202_v2 }
 0x172   : > { %v773_v38 = vmax.f32 %v763_v37, 0.0  ;;  %v1093_v37 = vsub.s32 3, %v4202_v2 }
 0x173   : > { %v1088_v36 = vrot.slane %v909_v0, %v1087_v34 }
 0x174   : > { %3716 = vmatprep.mubr.msk.f32.mxu1 %vm779_vm4, %v773_v38 }
 0x175   : > { %3717 = vmatmul.mubr.msk.f32.gmra.mrb[2].mxu1 %vm779_vm4, %v774_v39 }
 0x244   : > { %v3715_v40 = vpop.f32.mrb[0].mxu1 }
 0x245   : > { %v858_v41 = vpop.f32.mrb[1].mxu1 }
 0x246   : > { %877 = vxpose.xlu1.b32.start [1/4] (short) (narrow) %v858_v41, 16 }
 0x248   : > { %v3718_v42 = vpop.f32.mrb[2].mxu1 }
 0x249   : > { %v868_v43 = vpop.f32.mrb[3].mxu1 }
 0x24a   : > { %878 = vxpose.xlu1.b32.cont [2/4] (short) (narrow) %v3715_v40, 16  ;;  %v1094_v40 = vrot.slane %v909_v0, %v1093_v37  ;;  %v3945_v0 = vld [vmem:[%s5081_s6 + $0x48] sm:$0xff]  }
 0x24e   : > { %879 = vxpose.xlu1.b32.cont [3/4] (short) (narrow) %v868_v43, 16 }
 0x252   : > { %880 = vxpose.xlu1.b32.end [4/4] (short) (narrow) %v3718_v42, 16 }
 0x2c6   : > { %v4253_v44 = vpop.trf.xlu1 }
 0x2c7   : > { %5118 = vst [vmem:[#allocation3_spill] sm:$0xff] %v4253_v44  ;;  %v1020_v45 = vsel %vm779_vm4, %v4253_v44, 0.0 }
 0x2c8   : > { %1021 = vadd.xlane.f32.xlu0 %v1020_v45 }
 0x2ca   : > { %v4257_v46 = vpop.trf.xlu1 }
 0x2cb   : > { %5119 = vst [vmem:[#allocation4_spill] sm:$0xff] %v4257_v46  ;;  %v1023_v47 = vsel %vm779_vm4, %v4257_v46, 0.0 }
 0x2cc   : > { %1024 = vadd.xlane.f32.xlu0 %v1023_v47 }
 0x355   : > { %v1022_v48 = vpop.xlane.xlu0 %1021 }
 0x356   : > { %v1027_v49 = vmul.f32 0.03125, %v1022_v48 }
 0x358   : > { %v1029_v50 = vsub.f32 %v4253_v44, %v1027_v49  ;;  %v3936_v49 = vld [vmem:[%s5081_s6] sm:$0xff]  }
 0x359   : > { %v1025_v51 = vpop.xlane.xlu0 %1024  ;;  %3729 = vmatprep.mubr.msk.bf16.mxu1 %vm1239_vm6, %v3936_v49 }
 0x35a   : > { %v1028_v52 = vmul.f32 0.03125, %v1025_v51  ;;  %v1031_v53 = vmul.f32 %v1029_v50, %v1029_v50 }
 0x35c   : > { %v1030_v54 = vsub.f32 %v4257_v46, %v1028_v52  ;;  %v1033_v55 = vsel %vm779_vm4, %v1031_v53, 0.0 }
 0x35d   : > { %1034 = vadd.xlane.f32.xlu0 %v1033_v55 }
 0x35e   : > { %v1032_v56 = vmul.f32 %v1030_v54, %v1030_v54 }
 0x360   : > { %v1036_v57 = vsel %vm779_vm4, %v1032_v56, 0.0  ;;  %v3937_v56 = vld [vmem:[%s5081_s6 + $0x8] sm:$0xff]  }
 0x361   : > { %1037 = vadd.xlane.f32.xlu0 %v1036_v57  ;;  %v3938_v57 = vld [vmem:[%s5081_s6 + $0x10] sm:$0xff]  }
 0x3ea   : > { %v1035_v58 = vpop.xlane.xlu0 %1034 }
 0x3eb   : > { %v1039_v59 = vmul.f32 0.03125, %v1035_v58  ;;  %v3939_v58 = vld [vmem:[%s5081_s6 + $0x18] sm:$0xff]  }
 0x3ed   : > { %v1041_v60 = vadd.f32 1e-05, %v1039_v59  ;;  %v3940_v59 = vld [vmem:[%s5081_s6 + $0x20] sm:$0xff]  }
 0x3ee   : > { %v1038_v61 = vpop.xlane.xlu0 %1037 }
 0x3ef   : > { %3986 = vrsqrt.f32 %v1041_v60  ;;  %v1040_v62 = vmul.f32 0.03125, %v1038_v61  ;;  %v3941_v60 = vld [vmem:[%s5081_s6 + $0x28] sm:$0xff]   ;;  %v3942_v61 = vld [vmem:[%s5081_s6 + $0x30] sm:$0xff]  }
 0x3f1   : > { %v1042_v63 = vadd.f32 1e-05, %v1040_v62  ;;  %v3943_v62 = vld [vmem:[%s5081_s6 + $0x38] sm:$0xff]  }
 0x3f3   : > { %3988 = vrsqrt.f32 %v1042_v63  ;;  %v3944_v63 = vld [vmem:[%s5081_s6 + $0x40] sm:$0xff]  }
 0x3f9   : > { %v3987_v5 = vpop.eup %3986 }
 0x3fa   : > { %v1045_v6 = vmul.f32 %v3987_v5, %v1029_v50  ;;  %v3948_v5 = vld [vmem:[%s5081_s6 + $0x60] sm:$0xff]  }
 0x3fc   : > { %v1051_v8 = vmul.f32 %v1050_v4, %v1045_v6  ;;  %v3949_v6 = vld [vmem:[%s5081_s6 + $0x68] sm:$0xff]  }
 0x3fd   : > { %v3989_v9 = vpop.eup %3988 }
 0x3fe   : > { %v4271_v10 = vadd.f32 %v1056_v7, %v1051_v8  ;;  %v1046_v11 = vmul.f32 %v3989_v9, %v1030_v54  ;;  %v3951_v8 = vld [vmem:[%s5081_s6 + $0x78] sm:$0xff]  }
 0x400   : > { %5121 = vst [vmem:[#allocation5_spill] sm:$0xff] %v4271_v10  ;;  %v1059_v12 = vsel %vm779_vm4, %v4271_v10, 0.0  ;;  %v1052_v13 = vmul.f32 %v1050_v4, %v1046_v11  ;;  %v3947_v4 = vld [vmem:[%s5081_s6 + $0x58] sm:$0xff]  }
 0x401   : > { %1060 = vadd.xlane.f32.xlu0 %v1059_v12 }
 0x402   : > { %v4275_v14 = vadd.f32 %v1056_v7, %v1052_v13  ;;  %v3950_v7 = vld [vmem:[%s5081_s6 + $0x70] sm:$0xff]  }
 0x404   : > { %5122 = vst [vmem:[#allocation6_spill] sm:$0xff] %v4275_v14  ;;  %v1062_v15 = vsel %vm779_vm4, %v4275_v14, 0.0 }
 0x405   : > { %1063 = vadd.xlane.f32.xlu0 %v1062_v15 }
 0x48e   : > { %v1061_v3 = vpop.xlane.xlu0 %1060 }
 0x48f   : > { %v1065_v16 = vmul.f32 0.03125, %v1061_v3 }
 0x491   : > { %v1067_v17 = vsub.f32 %v4271_v10, %v1065_v16 }
 0x492   : > { %v1064_v18 = vpop.xlane.xlu0 %1063 }
 0x493   : > { %v1066_v19 = vmul.f32 0.03125, %v1064_v18  ;;  %v1069_v20 = vmul.f32 %v1067_v17, %v1067_v17 }
 0x495   : > { %v1068_v21 = vsub.f32 %v4275_v14, %v1066_v19  ;;  %v1071_v22 = vsel %vm779_vm4, %v1069_v20, 0.0 }
 0x496   : > { %1072 = vadd.xlane.f32.xlu1 %v1071_v22 }
 0x497   : > { %v1070_v23 = vmul.f32 %v1068_v21, %v1068_v21 }
 0x499   : > { %v1074_v24 = vsel %vm779_vm4, %v1070_v23, 0.0 }
 0x49a   : > { %1075 = vadd.xlane.f32.xlu0 %v1074_v24 }
 0x523   : > { %v1073_v28 = vpop.xlane.xlu1 %1072 }
 0x524   : > { %v1077_v29 = vmul.f32 0.03125, %v1073_v28 }
 0x526   : > { %v1079_v30 = vadd.f32 1e-05, %v1077_v29 }
 0x527   : > { %v1076_v31 = vpop.xlane.xlu0 %1075 }
 0x528   : > { %3990 = vrsqrt.f32 %v1079_v30  ;;  %v1078_v32 = vmul.f32 0.03125, %v1076_v31 }
 0x52a   : > { %v1080_v33 = vadd.f32 1e-05, %v1078_v32 }
 0x52c   : > { %3992 = vrsqrt.f32 %v1080_v33 }
 0x532   : > { %v3991_v35 = vpop.eup %3990 }
 0x533   : > { %v1083_v38 = vmul.f32 %v3991_v35, %v1067_v17 }
 0x535   : > { %v1089_v41 = vmul.f32 %v1088_v36, %v1083_v38 }
 0x536   : > { %v3993_v39 = vpop.eup %3992 }
 0x537   : > { %v1084_v42 = vmul.f32 %v3993_v39, %v1068_v21  ;;  %v1095_v45 = vadd.f32 %v1094_v40, %v1089_v41 }
 0x539   : > { %v1090_v43 = vmul.f32 %v1088_v36, %v1084_v42 }
 0x53b   : > { %v1096_v47 = vadd.f32 %v1094_v40, %v1090_v43 }
 0x53d   : > { %v1097_v48 = vpack.c.bf16 %v1096_v47, %v1095_v45 }
 0x53f   : > { %3724 = vmatmul.mubr.msk.bf16.vlgmr.msra.gmra.mrb[4].mxu0 %vm779_vm4, %v1097_v48 }
 0x612   : > { %v1147_v50 = vpop.f32.mrb[4].mxu0 }
 0x613   : > { %v3725_v51 = vpop.f32.mrb[5].mxu0 }
 0x614   : > { %v1150_v52 = vpop.f32.mrb[6].mxu0 }
 0x615   : > { %v4300_v53 = vpack.c.bf16 %v1150_v52, %v1147_v50  ;;  %v3726_v54 = vpop.f32.mrb[7].mxu0 }
 0x617   : > { %1236 = vrot.lane.b32.xlu0 %v4300_v53, %s4076_s0 }
 0x689   : > { %v1237_v55 = vpop.permute.xlu0 %1236 }
 0x68a   : > { %3727 = vmatprep.subr.bf16.mxu1 %v1237_v55 }
 0x68b   : > { %3728 = vmatpush3.bf16.msra.mxu1 %v1237_v55 }
 0x68e   : > { %3730 = vmatmul.mubr.msk.bf16.vlgmr.msra.gmra.mrb[4].mxu1 %vm1239_vm6, %v3937_v56 }
 0x68f   : > { %3733 = vmatprep.mubr.msk.bf16.mxu1 %vm1239_vm6, %v3938_v57 }
 0x696   : > { %3734 = vmatmul.mubr.msk.bf16.gmra.mrb[8].mxu1 %vm1239_vm6, %v3939_v58 }
 0x697   : > { %3737 = vmatprep.mubr.msk.bf16.mxu1 %vm1239_vm6, %v3940_v59 }
 0x69e   : > { %3738 = vmatmul.mubr.msk.bf16.gmra.mrb[12].mxu1 %vm1239_vm6, %v3941_v60 }
 0x69f   : > { %3741 = vmatprep.mubr.msk.bf16.mxu1 %vm1239_vm6, %v3942_v61 }
 0x6a6   : > { %3742 = vmatmul.mubr.msk.bf16.gmra.mrb[16].mxu1 %vm1239_vm6, %v3943_v62  ;;  %v3952_v62 = vld [vmem:[%s5082_s7] sm:$0xff]  }
 0x6a7   : > { %3745 = vmatprep.mubr.msk.bf16.mxu1 %vm1239_vm6, %v3944_v63  ;;  %3763 = vmatprep.mubr.msk.bf16.mxu0 %vm1239_vm6, %v3952_v62  ;;  %v3961_v62 = vld [vmem:[%s5082_s7 + $0x48] sm:$0xff]  }
 0x6ae   : > { %3746 = vmatmul.mubr.msk.bf16.gmra.mrb[20].mxu1 %vm1239_vm6, %v3945_v0 }
 0x6af   : > { %3749 = vmatprep.mubr.msk.bf16.mxu1 %vm1239_vm6, %v3946_v1 }
 0x6b6   : > { %3750 = vmatmul.mubr.msk.bf16.gmra.mrb[24].mxu1 %vm1239_vm6, %v3947_v4 }
 0x6b7   : > { %3753 = vmatprep.mubr.msk.bf16.mxu1 %vm1239_vm6, %v3948_v5 }
 0x6be   : > { %3754 = vmatmul.mubr.msk.bf16.gmra.mrb[28].mxu1 %vm1239_vm6, %v3949_v6 }
 0x6bf   : > { %3757 = vmatprep.mubr.msk.bf16.mxu1 %vm1239_vm6, %v3950_v7 }
 0x6c6   : > { %3758 = vmatmul.mubr.msk.bf16.gmra.mrb[32].mxu1 %vm1239_vm6, %v3951_v8 }
 0x6c7   : > { %3529 = vmatprep.mubr.msk.bf16.mxu1 %vm1773_vm7, %v4300_v53 }
 0x761   : > { %v3731_v9 = vpop.f32.mrb[4].mxu1 }
 0x762   : > { %v1322_v11 = vpop.f32.mrb[5].mxu1 }
 0x763   : > { %v3732_v12 = vpop.f32.mrb[6].mxu1 }
 0x764   : > { %v4365_v13 = vpack.c.bf16 %v3732_v12, %v3731_v9  ;;  %v1325_v15 = vpop.f32.mrb[7].mxu1 }
 0x765   : > { %v4367_v3 = vpack.c.bf16 %v1325_v15, %v1322_v11 }
 0x766   : > { %v1781_v50 = vsel %vm1773_vm7, %v4365_v13, 0 }
 0x767   : > { %1959 = vrot.lane.b32.xlu0 %v4367_v3, %s4077_s3  ;;  %v1778_v41 = vsel %vm1773_vm7, %v4367_v3, 0 }
 0x769   : > { %v3735_v16 = vpop.f32.mrb[8].mxu1 }
 0x76a   : > { %v1338_v17 = vpop.f32.mrb[9].mxu1 }
 0x76b   : > { %v3736_v18 = vpop.f32.mrb[10].mxu1 }
 0x76c   : > { %v4371_v19 = vpack.c.bf16 %v3736_v18, %v3735_v16  ;;  %v1341_v20 = vpop.f32.mrb[11].mxu1 }
 0x76d   : > { %v4373_v21 = vpack.c.bf16 %v1341_v20, %v1338_v17 }
 0x76e   : > { %v1787_v4 = vsel %vm1773_vm7, %v4371_v19, 0 }
 0x76f   : > { %v1784_v58 = vsel %vm1773_vm7, %v4373_v21, 0 }
 0x771   : > { %v3739_v22 = vpop.f32.mrb[12].mxu1 }
 0x772   : > { %v1354_v23 = vpop.f32.mrb[13].mxu1 }
 0x773   : > { %v3740_v24 = vpop.f32.mrb[14].mxu1 }
 0x774   : > { %v4375_v25 = vpack.c.bf16 %v3740_v24, %v3739_v22  ;;  %v1357_v27 = vpop.f32.mrb[15].mxu1 }
 0x775   : > { %v4377_v28 = vpack.c.bf16 %v1357_v27, %v1354_v23 }
 0x776   : > { %v1793_v6 = vsel %vm1773_vm7, %v4375_v25, 0 }
 0x777   : > { %v1790_v5 = vsel %vm1773_vm7, %v4377_v28, 0 }
 0x779   : > { %v3743_v29 = vpop.f32.mrb[16].mxu1 }
 0x77a   : > { %v1370_v30 = vpop.f32.mrb[17].mxu1 }
 0x77b   : > { %v3744_v31 = vpop.f32.mrb[18].mxu1 }
 0x77c   : > { %v4379_v32 = vpack.c.bf16 %v3744_v31, %v3743_v29  ;;  %v1373_v33 = vpop.f32.mrb[19].mxu1 }
 0x77d   : > { %v4381_v34 = vpack.c.bf16 %v1373_v33, %v1370_v30 }
 0x77e   : > { %v1799_v8 = vsel %vm1773_vm7, %v4379_v32, 0 }
 0x77f   : > { %v1796_v7 = vsel %vm1773_vm7, %v4381_v34, 0 }
 0x781   : > { %v3747_v35 = vpop.f32.mrb[20].mxu1 }
 0x782   : > { %v1386_v36 = vpop.f32.mrb[21].mxu1 }
 0x783   : > { %v3748_v37 = vpop.f32.mrb[22].mxu1 }
 0x784   : > { %v4383_v38 = vpack.c.bf16 %v3748_v37, %v3747_v35  ;;  %v1389_v39 = vpop.f32.mrb[23].mxu1 }
 0x785   : > { %v4385_v40 = vpack.c.bf16 %v1389_v39, %v1386_v36 }
 0x786   : > { %1977 = vrot.lane.b32.xlu1 %v4383_v38, %s4077_s3 }
 0x787   : > { %1975 = vrot.lane.b32.xlu0 %v4385_v40, %s4077_s3  ;;  %3863 = vmatprep.subr.msk.bf16.mxu1 %vm1773_vm7, %v4385_v40 }
 0x788   : > { %3514 = vmatpush3.bf16.xpose.msra.mxu1 %v1778_v41 }
 0x789   : > { %v3751_v42 = vpop.f32.mrb[24].mxu1  ;;  %3864 = vmatprep.subr.msk.bf16.mxu1 %vm1773_vm7, %v4383_v38 }
 0x78a   : > { %v1402_v43 = vpop.f32.mrb[25].mxu1 }
 0x78b   : > { %1961 = vrot.lane.b32.xlu0 %v4365_v13, %s4077_s3  ;;  %v3752_v45 = vpop.f32.mrb[26].mxu1 }
 0x78c   : > { %v4399_v47 = vpack.c.bf16 %v3752_v45, %v3751_v42  ;;  %v1405_v48 = vpop.f32.mrb[27].mxu1  ;;  %v3953_v42 = vld [vmem:[%s5082_s7 + $0x8] sm:$0xff]  }
 0x78d   : > { %v4401_v49 = vpack.c.bf16 %v1405_v48, %v1402_v43  ;;  %v3954_v43 = vld [vmem:[%s5082_s7 + $0x10] sm:$0xff]  }
 0x78f   : > { %1963 = vrot.lane.b32.xlu0 %v4373_v21, %s4077_s3 }
 0x790   : > { %3516 = vmatpush3.bf16.xpose.msra.mxu1 %v1781_v50 }
 0x791   : > { %v3755_v51 = vpop.f32.mrb[28].mxu1  ;;  %3865 = vmatprep.subr.msk.bf16.mxu1 %vm1773_vm7, %v4401_v49 }
 0x792   : > { %v1418_v52 = vpop.f32.mrb[29].mxu1 }
 0x793   : > { %1979 = vrot.lane.b32.xlu0 %v4401_v49, %s4077_s3  ;;  %v3756_v54 = vpop.f32.mrb[30].mxu1 }
 0x794   : > { %v4411_v55 = vpack.c.bf16 %v3756_v54, %v3755_v51  ;;  %v1421_v56 = vpop.f32.mrb[31].mxu1  ;;  %v3955_v51 = vld [vmem:[%s5082_s7 + $0x18] sm:$0xff]  }
 0x795   : > { %v4413_v57 = vpack.c.bf16 %v1421_v56, %v1418_v52  ;;  %v3956_v52 = vld [vmem:[%s5082_s7 + $0x20] sm:$0xff]   ;;  %v3957_v56 = vld [vmem:[%s5082_s7 + $0x28] sm:$0xff]  }
 0x797   : > { %1965 = vrot.lane.b32.xlu0 %v4371_v19, %s4077_s3  ;;  %1983 = vrot.lane.b32.xlu1 %v4413_v57, %s4077_s3 }
 0x798   : > { %3518 = vmatpush3.bf16.xpose.msra.mxu1 %v1784_v58  ;;  %v3958_v58 = vld [vmem:[%s5082_s7 + $0x30] sm:$0xff]  }
 0x799   : > { %v3759_v59 = vpop.f32.mrb[32].mxu1  ;;  %3866 = vmatprep.subr.msk.bf16.mxu1 %vm1773_vm7, %v4399_v47 }
 0x79a   : > { %v1434_v60 = vpop.f32.mrb[33].mxu1 }
 0x79b   : > { %1981 = vrot.lane.b32.xlu0 %v4399_v47, %s4077_s3  ;;  %1985 = vrot.lane.b32.xlu1 %v4411_v55, %s4077_s3  ;;  %v3760_v61 = vpop.f32.mrb[34].mxu1 }
 0x79c   : > { %v4430_v63 = vpack.c.bf16 %v3760_v61, %v3759_v59  ;;  %v1437_v0 = vpop.f32.mrb[35].mxu1  ;;  %v3960_v61 = vld [vmem:[%s5082_s7 + $0x40] sm:$0xff]  }
 0x79d   : > { %v4432_v1 = vpack.c.bf16 %v1437_v0, %v1434_v60  ;;  %v3959_v60 = vld [vmem:[%s5082_s7 + $0x38] sm:$0xff]   ;;  %v3962_v0 = vld [vmem:[%s5082_s7 + $0x50] sm:$0xff]  }
 0x79f   : > { %1967 = vrot.lane.b32.xlu0 %v4377_v28, %s4077_s3  ;;  %1987 = vrot.lane.b32.xlu1 %v4432_v1, %s4077_s3 }
 0x7a0   : > { %3520 = vmatpush3.bf16.xpose.msra.mxu1 %v1787_v4  ;;  %v3963_v4 = vld [vmem:[%s5082_s7 + $0x58] sm:$0xff]  }
 0x7a1   : > { %3867 = vmatprep.subr.msk.bf16.mxu1 %vm1773_vm7, %v4413_v57 }
 0x7a3   : > { %1969 = vrot.lane.b32.xlu0 %v4375_v25, %s4077_s3  ;;  %1989 = vrot.lane.b32.xlu1 %v4430_v63, %s4077_s3 }
 0x7a7   : > { %1971 = vrot.lane.b32.xlu0 %v4381_v34, %s4077_s3  ;;  %1545 = vrot.lane.b32.xlu1 %v4300_v53, %s4078_s28  ;;  %s4081_s28 = smov 16  }
 0x7a8   : > { %3522 = vmatpush3.bf16.xpose.msra.mxu1 %v1790_v5  ;;  %v3964_v5 = vld [vmem:[%s5082_s7 + $0x60] sm:$0xff]  }
 0x7a9   : > { %3868 = vmatprep.subr.msk.bf16.mxu1 %vm1773_vm7, %v4411_v55 }
 0x7ab   : > { %1973 = vrot.lane.b32.xlu0 %v4379_v32, %s4077_s3 }
 0x7af   : > { %1941 = vrot.lane.b32.xlu0 %v4300_v53, %s4077_s3 }
 0x7b0   : > { %3524 = vmatpush3.bf16.xpose.msra.mxu1 %v1793_v6  ;;  %v3965_v6 = vld [vmem:[%s5082_s7 + $0x68] sm:$0xff]  }
 0x7b1   : > { %3869 = vmatprep.subr.msk.bf16.mxu1 %vm1773_vm7, %v4432_v1 }
 0x7b8   : > { %3526 = vmatpush3.bf16.xpose.msra.mxu1 %v1796_v7  ;;  %v3966_v7 = vld [vmem:[%s5082_s7 + $0x70] sm:$0xff]  }
 0x7b9   : > { %3870 = vmatprep.subr.msk.bf16.mxu1 %vm1773_vm7, %v4430_v63 }
 0x7c0   : > { %3528 = vmatpush3.bf16.xpose.msra.mxu1 %v1799_v8  ;;  %v3967_v8 = vld [vmem:[%s5082_s7 + $0x78] sm:$0xff]  }
 0x7c7   : > { %3530 = vmatmul.mubr.msk.bf16.vlgmr.msra.gmra.mrb[36].mxu1 %vm1773_vm7, %v4300_v53 }
 0x7d9   : > { %v1960_v9 = vpop.permute.xlu0 %1959 }
 0x7da   : > { %v1995_v12 = vsel %vm1773_vm7, %v1960_v9, 0 }
 0x7f8   : > { %v1978_v15 = vpop.permute.xlu1 %1977 }
 0x7f9   : > { %v1976_v11 = vpop.permute.xlu0 %1975 }
 0x7fa   : > { %3871 = vmatprep.subr.msk.bf16.mxu1 %vm1773_vm7, %v1976_v11 }
 0x7fb   : > { %3554 = vmatpush3.bf16.xpose.msra.mxu1 %v1995_v12 }
 0x7fc   : > { %3872 = vmatprep.subr.msk.bf16.mxu1 %vm1773_vm7, %v1978_v15 }
 0x7fd   : > { %v1962_v16 = vpop.permute.xlu0 %1961 }
 0x7fe   : > { %v1998_v18 = vsel %vm1773_vm7, %v1962_v16, 0 }
 0x801   : > { %v1964_v17 = vpop.permute.xlu0 %1963 }
 0x802   : > { %v2001_v24 = vsel %vm1773_vm7, %v1964_v17, 0 }
 0x803   : > { %3556 = vmatpush3.bf16.xpose.msra.mxu1 %v1998_v18 }
 0x805   : > { %v1980_v20 = vpop.permute.xlu0 %1979 }
 0x806   : > { %3873 = vmatprep.subr.msk.bf16.mxu1 %vm1773_vm7, %v1980_v20 }
 0x809   : > { %v1966_v22 = vpop.permute.xlu0 %1965  ;;  %v1984_v23 = vpop.permute.xlu1 %1983 }
 0x80a   : > { %v2004_v33 = vsel %vm1773_vm7, %v1966_v22, 0 }
 0x80b   : > { %3558 = vmatpush3.bf16.xpose.msra.mxu1 %v2001_v24 }
 0x80d   : > { %v1982_v27 = vpop.permute.xlu0 %1981  ;;  %v1986_v29 = vpop.permute.xlu1 %1985 }
 0x80e   : > { %3874 = vmatprep.subr.msk.bf16.mxu1 %vm1773_vm7, %v1982_v27 }
 0x811   : > { %v1968_v30 = vpop.permute.xlu0 %1967  ;;  %v1988_v31 = vpop.permute.xlu1 %1987 }
 0x812   : > { %v2007_v41 = vsel %vm1773_vm7, %v1968_v30, 0 }
 0x813   : > { %3560 = vmatpush3.bf16.xpose.msra.mxu1 %v2004_v33 }
 0x814   : > { %3875 = vmatprep.subr.msk.bf16.mxu1 %vm1773_vm7, %v1984_v23 }
 0x815   : > { %v1970_v35 = vpop.permute.xlu0 %1969  ;;  %v1990_v36 = vpop.permute.xlu1 %1989 }
 0x816   : > { %v2010_v50 = vsel %vm1773_vm7, %v1970_v35, 0 }
 0x819   : > { %v1972_v37 = vpop.permute.xlu0 %1971  ;;  %v1546_v39 = vpop.permute.xlu1 %1545 }
 0x81a   : > { %3761 = vmatprep.subr.bf16.mxu0 %v1546_v39  ;;  %v2013_v54 = vsel %vm1773_vm7, %v1972_v37, 0 }
 0x81b   : > { %3762 = vmatpush3.bf16.msra.mxu0 %v1546_v39  ;;  %3562 = vmatpush3.bf16.xpose.msra.mxu1 %v2007_v41 }
 0x81c   : > { %3876 = vmatprep.subr.msk.bf16.mxu1 %vm1773_vm7, %v1986_v29 }
 0x81d   : > { %v1974_v45 = vpop.permute.xlu0 %1973 }
 0x81e   : > { %3764 = vmatmul.mubr.msk.bf16.vlgmr.msra.gmra.mrb[8].mxu0 %vm1239_vm6, %v3953_v42  ;;  %v2016_v59 = vsel %vm1773_vm7, %v1974_v45, 0 }
 0x81f   : > { %3767 = vmatprep.mubr.msk.bf16.mxu0 %vm1239_vm6, %v3954_v43 }
 0x821   : > { %v1942_v48 = vpop.permute.xlu0 %1941 }
 0x822   : > { %3569 = vmatprep.mubr.msk.bf16.mxu1 %vm1773_vm7, %v1942_v48 }
 0x823   : > { %3564 = vmatpush3.bf16.xpose.msra.mxu1 %v2010_v50 }
 0x824   : > { %3877 = vmatprep.subr.msk.bf16.mxu1 %vm1773_vm7, %v1988_v31 }
 0x826   : > { %3768 = vmatmul.mubr.msk.bf16.gmra.mrb[12].mxu0 %vm1239_vm6, %v3955_v51 }
 0x827   : > { %3771 = vmatprep.mubr.msk.bf16.mxu0 %vm1239_vm6, %v3956_v52 }
 0x82b   : > { %3566 = vmatpush3.bf16.xpose.msra.mxu1 %v2013_v54 }
 0x82c   : > { %3878 = vmatprep.subr.msk.bf16.mxu1 %vm1773_vm7, %v1990_v36 }
 0x82e   : > { %3772 = vmatmul.mubr.msk.bf16.gmra.mrb[16].mxu0 %vm1239_vm6, %v3957_v56 }
 0x82f   : > { %3775 = vmatprep.mubr.msk.bf16.mxu0 %vm1239_vm6, %v3958_v58 }
 0x833   : > { %3568 = vmatpush3.bf16.xpose.msra.mxu1 %v2016_v59 }
 0x836   : > { %3776 = vmatmul.mubr.msk.bf16.gmra.mrb[20].mxu0 %vm1239_vm6, %v3959_v60 }
 0x837   : > { %3779 = vmatprep.mubr.msk.bf16.mxu0 %vm1239_vm6, %v3960_v61 }
 0x83a   : > { %3570 = vmatmul.mubr.msk.bf16.vlgmr.msra.gmra.mrb[40].mxu1 %vm1773_vm7, %v1942_v48 }
 0x83e   : > { %3780 = vmatmul.mubr.msk.bf16.gmra.mrb[24].mxu0 %vm1239_vm6, %v3961_v62 }
 0x83f   : > { %3783 = vmatprep.mubr.msk.bf16.mxu0 %vm1239_vm6, %v3962_v0 }
 0x846   : > { %3784 = vmatmul.mubr.msk.bf16.gmra.mrb[28].mxu0 %vm1239_vm6, %v3963_v4 }
 0x847   : > { %3787 = vmatprep.mubr.msk.bf16.mxu0 %vm1239_vm6, %v3964_v5 }
 0x84e   : > { %3788 = vmatmul.mubr.msk.bf16.gmra.mrb[32].mxu0 %vm1239_vm6, %v3965_v6 }
 0x84f   : > { %3791 = vmatprep.mubr.msk.bf16.mxu0 %vm1239_vm6, %v3966_v7 }
 0x856   : > { %3792 = vmatmul.mubr.msk.bf16.gmra.mrb[36].mxu0 %vm1239_vm6, %v3967_v8 }
 0x89a   : > { %v4548_v9 = vpop.f32.mrb[36].mxu1 }
 0x89b   : > { %v4550_v11 = vpop.f32.mrb[37].mxu1 }
 0x89c   : > { %v4552_v12 = vpop.f32.mrb[38].mxu1  ;;  %v1868_v15 = vmax.f32 %v4548_v9, %v4550_v11 }
 0x89d   : > { %v4556_v16 = vpop.f32.mrb[39].mxu1 }
 0x89e   : > { %v1871_v17 = vmax.f32 %v4552_v12, %v4556_v16 }
 0x8f1   : > { %v3765_v18 = vpop.f32.mrb[8].mxu0 }
 0x8f2   : > { %v1630_v20 = vpop.f32.mrb[9].mxu0 }
 0x8f3   : > { %v3766_v22 = vpop.f32.mrb[10].mxu0 }
 0x8f4   : > { %v4560_v23 = vpack.c.bf16 %v3766_v22, %v3765_v18  ;;  %v1633_v24 = vpop.f32.mrb[11].mxu0 }
 0x8f5   : > { %v4562_v27 = vpack.c.bf16 %v1633_v24, %v1630_v20 }
 0x8f7   : > { %2133 = vrot.lane.b32.xlu0 %v4562_v27, %s4077_s3 }
 0x8f9   : > { %v3769_v29 = vpop.f32.mrb[12].mxu0 }
 0x8fa   : > { %v1646_v30 = vpop.f32.mrb[13].mxu0 }
 0x8fb   : > { %v3770_v31 = vpop.f32.mrb[14].mxu0 }
 0x8fc   : > { %v4566_v33 = vpack.c.bf16 %v3770_v31, %v3769_v29  ;;  %v1649_v35 = vpop.f32.mrb[15].mxu0 }
 0x8fd   : > { %v4568_v36 = vpack.c.bf16 %v1649_v35, %v1646_v30 }
 0x901   : > { %v3773_v37 = vpop.f32.mrb[16].mxu0 }
 0x902   : > { %v1662_v39 = vpop.f32.mrb[17].mxu0 }
 0x903   : > { %v3774_v41 = vpop.f32.mrb[18].mxu0 }
 0x904   : > { %v4570_v42 = vpack.c.bf16 %v3774_v41, %v3773_v37  ;;  %v1665_v43 = vpop.f32.mrb[19].mxu0 }
 0x905   : > { %v4572_v45 = vpack.c.bf16 %v1665_v43, %v1662_v39 }
 0x909   : > { %v3777_v48 = vpop.f32.mrb[20].mxu0 }
 0x90a   : > { %v1678_v50 = vpop.f32.mrb[21].mxu0 }
 0x90b   : > { %v3778_v51 = vpop.f32.mrb[22].mxu0 }
 0x90c   : > { %v4574_v52 = vpack.c.bf16 %v3778_v51, %v3777_v48  ;;  %v1681_v54 = vpop.f32.mrb[23].mxu0 }
 0x90d   : > { %v4576_v56 = vpop.f32.mrb[40].mxu1  ;;  %v4578_v58 = vpack.c.bf16 %v1681_v54, %v1678_v50 }
 0x90e   : > { %v4580_v59 = vpop.f32.mrb[41].mxu1 }
 0x90f   : > { %v4582_v60 = vpop.f32.mrb[42].mxu1  ;;  %v2085_v61 = vmax.f32 %v4576_v56, %v4580_v59 }
 0x910   : > { %v4586_v62 = vpop.f32.mrb[43].mxu1 }
 0x911   : > { %v3781_v0 = vpop.f32.mrb[24].mxu0  ;;  %v2088_v4 = vmax.f32 %v4582_v60, %v4586_v62 }
 0x912   : > { %v1694_v5 = vpop.f32.mrb[25].mxu0 }
 0x913   : > { %v3782_v6 = vpop.f32.mrb[26].mxu0 }
 0x914   : > { %v4590_v7 = vpack.c.bf16 %v3782_v6, %v3781_v0  ;;  %v1697_v8 = vpop.f32.mrb[27].mxu0 }
 0x915   : > { %v4592_v18 = vpack.c.bf16 %v1697_v8, %v1694_v5 }
 0x917   : > { %2149 = vrot.lane.b32.xlu1 %v4592_v18, %s4077_s3  ;;  %3531 = vmatprep.subr.bf16.mxu0 %v4592_v18 }
 0x918   : > { %3532 = vmatpush3.bf16.msra.mxu0 %v4562_v27 }
 0x919   : > { %v3785_v20 = vpop.f32.mrb[28].mxu0  ;;  %3533 = vmatprep.subr.bf16.mxu0 %v4590_v7 }
 0x91a   : > { %v1710_v22 = vpop.f32.mrb[29].mxu0 }
 0x91b   : > { %2151 = vrot.lane.b32.xlu1 %v4590_v7, %s4077_s3  ;;  %v3786_v24 = vpop.f32.mrb[30].mxu0 }
 0x91c   : > { %v4601_v29 = vpack.c.bf16 %v3786_v24, %v3785_v20  ;;  %v1713_v30 = vpop.f32.mrb[31].mxu0  ;;  %3534 = vmatpush3.bf16.msra.mxu0 %v4560_v23 }
 0x91d   : > { %v4604_v31 = vpack.c.bf16 %v1713_v30, %v1710_v22 }
 0x91f   : > { %2135 = vrot.lane.b32.xlu1 %v4560_v23, %s4077_s3  ;;  %2153 = vrot.lane.b32.xlu0 %v4604_v31, %s4077_s3 }
 0x920   : > { %3535 = vmatprep.subr.bf16.mxu0 %v4604_v31 }
 0x921   : > { %3536 = vmatpush3.bf16.msra.mxu0 %v4568_v36  ;;  %v3789_v35 = vpop.f32.mrb[32].mxu0 }
 0x922   : > { %3537 = vmatprep.subr.bf16.mxu0 %v4601_v29  ;;  %v1726_v37 = vpop.f32.mrb[33].mxu0 }
 0x923   : > { %v3790_v39 = vpop.f32.mrb[34].mxu0 }
 0x924   : > { %v4613_v41 = vpack.c.bf16 %v3790_v39, %v3789_v35  ;;  %v1729_v43 = vpop.f32.mrb[35].mxu0 }
 0x925   : > { %v4615_v48 = vpack.c.bf16 %v1729_v43, %v1726_v37  ;;  %3538 = vmatpush3.bf16.msra.mxu0 %v4566_v33 }
 0x927   : > { %3539 = vmatprep.subr.bf16.mxu0 %v4615_v48 }
 0x929   : > { %3540 = vmatpush3.bf16.msra.mxu0 %v4572_v45  ;;  %v3793_v50 = vpop.f32.mrb[36].mxu0 }
 0x92a   : > { %v1742_v51 = vpop.f32.mrb[37].mxu0  ;;  %3541 = vmatprep.subr.bf16.mxu0 %v4613_v41 }
 0x92b   : > { %v3794_v54 = vpop.f32.mrb[38].mxu0 }
 0x92c   : > { %v4621_v0 = vpack.c.bf16 %v3794_v54, %v3793_v50  ;;  %v1745_v5 = vpop.f32.mrb[39].mxu0 }
 0x92d   : > { %v4623_v6 = vpack.c.bf16 %v1745_v5, %v1742_v51  ;;  %3542 = vmatpush3.bf16.msra.mxu0 %v4570_v42 }
 0x92f   : > { %3543 = vmatprep.subr.bf16.mxu0 %v4623_v6 }
 0x931   : > { %3544 = vmatpush3.bf16.msra.mxu0 %v4578_v58 }
 0x932   : > { %3545 = vmatprep.subr.bf16.mxu0 %v4621_v0 }
 0x935   : > { %3546 = vmatpush3.bf16.msra.mxu0 %v4574_v52 }
 0x93e   : > { %1869 = vmax.xlane.f32.xlu0 %v1868_v15 }
 0x943   : > { %1872 = vmax.xlane.f32.xlu1 %v1871_v17 }
 0x954   : > { %2137 = vrot.lane.b32.xlu1 %v4568_v36, %s4077_s3  ;;  %2155 = vrot.lane.b32.xlu0 %v4601_v29, %s4077_s3 }
 0x958   : > { %2139 = vrot.lane.b32.xlu1 %v4566_v33, %s4077_s3  ;;  %2157 = vrot.lane.b32.xlu0 %v4615_v48, %s4077_s3 }
 0x95c   : > { %2141 = vrot.lane.b32.xlu1 %v4572_v45, %s4077_s3  ;;  %2159 = vrot.lane.b32.xlu0 %v4613_v41, %s4077_s3 }
 0x960   : > { %2143 = vrot.lane.b32.xlu1 %v4570_v42, %s4077_s3 }
 0x964   : > { %2145 = vrot.lane.b32.xlu1 %v4578_v58, %s4077_s3 }
 0x969   : > { %v4654_v17 = vpop.permute.xlu0 %2133 }
 0x97b   : > { %2086 = vmax.xlane.f32.xlu0 %v2085_v61 }
 0x97f   : > { %2089 = vmax.xlane.f32.xlu0 %v2088_v4 }
 0x989   : > { %v2150_v15 = vpop.permute.xlu1 %2149 }
 0x98a   : > { %3571 = vmatprep.subr.bf16.mxu0 %v2150_v15 }
 0x98d   : > { %v4656_v8 = vpop.permute.xlu1 %2151 }
 0x991   : > { %v4658_v20 = vpop.permute.xlu0 %2153  ;;  %v4660_v24 = vpop.permute.xlu1 %2135 }
 0x995   : > { %2161 = vrot.lane.b32.xlu0 %v4623_v6, %s4077_s3 }
 0x9cb   : > { %v1870_v22 = vpop.xlane.xlu0 %1869 }
 0x9cc   : > { %v1874_v30 = vsub.f32 %v4548_v9, %v1870_v22  ;;  %v1875_v35 = vsub.f32 %v4550_v11, %v1870_v22 }
 0x9ce   : > { %v1878_v61 = vmul.f32 1.442695, %v1874_v30  ;;  %v1880_v4 = vmul.f32 1.442695, %v1875_v35 }
 0x9d0   : > { %3994 = vpow2.f32 %v1878_v61  ;;  %v1873_v37 = vpop.xlane.xlu1 %1872 }
 0x9d1   : > { %3996 = vpow2.f32 %v1880_v4  ;;  %v1876_v39 = vsub.f32 %v4552_v12, %v1873_v37  ;;  %v1877_v43 = vsub.f32 %v4556_v16, %v1873_v37  ;;  %v4677_v12 = vpop.permute.xlu0 %2155 }
 0x9d3   : > { %v1882_v50 = vmul.f32 1.442695, %v1876_v39  ;;  %v1884_v51 = vmul.f32 1.442695, %v1877_v43 }
 0x9d5   : > { %3998 = vpow2.f32 %v1882_v50  ;;  %v4681_v16 = vpop.permute.xlu0 %2157 }
 0x9d6   : > { %4000 = vpow2.f32 %v1884_v51 }
 0x9d9   : > { %v4683_v30 = vpop.permute.xlu0 %2159 }
 0x9da   : > { %v4666_v54 = vpop.eup %3994 }
 0x9db   : > { %v4668_v5 = vpop.eup %3996 }
 0x9dc   : > { %v1886_v9 = vadd.f32 %v4668_v5, %v4666_v54 }
 0x9de   : > { %1887 = vadd.xlane.f32.xlu1 %v1886_v9 }
 0x9df   : > { %v3999_v11 = vpop.eup %3998 }
 0x9e0   : > { %v4672_v15 = vpop.eup %4000 }
 0x9e1   : > { %v1889_v22 = vadd.f32 %v4672_v15, %v3999_v11 }
 0x9e3   : > { %1890 = vadd.xlane.f32.xlu0 %v1889_v22 }
 0x9ef   : > { %2147 = vrot.lane.b32.xlu1 %v4574_v52, %s4077_s3 }
 0x9f9   : > { %2163 = vrot.lane.b32.xlu0 %v4621_v0, %s4077_s3  ;;  %s4079_s3 = smov 112  }
 0xa08   : > { %v2087_v35 = vpop.xlane.xlu0 %2086 }
 0xa09   : > { %v2091_v61 = vsub.f32 %v4576_v56, %v2087_v35  ;;  %v2092_v4 = vsub.f32 %v4580_v59, %v2087_v35 }
 0xa0b   : > { %v2095_v37 = vmul.f32 1.442695, %v2091_v61  ;;  %v2097_v39 = vmul.f32 1.442695, %v2092_v4 }
 0xa0c   : > { %v2090_v43 = vpop.xlane.xlu0 %2089 }
 0xa0d   : > { %4002 = vpow2.f32 %v2095_v37  ;;  %v2093_v50 = vsub.f32 %v4582_v60, %v2090_v43  ;;  %v2094_v51 = vsub.f32 %v4586_v62, %v2090_v43  ;;  %v2138_v62 = vpop.permute.xlu1 %2137 }
 0xa0e   : > { %4004 = vpow2.f32 %v2097_v39 }
 0xa0f   : > { %v2099_v9 = vmul.f32 1.442695, %v2093_v50  ;;  %v2101_v22 = vmul.f32 1.442695, %v2094_v51 }
 0xa10   : > { %v2162_v43 = vpop.permute.xlu0 %2161 }
 0xa11   : > { %4006 = vpow2.f32 %v2099_v9  ;;  %v2140_v61 = vpop.permute.xlu1 %2139 }
 0xa12   : > { %4008 = vpow2.f32 %v2101_v22 }
 0xa15   : > { %v2142_v4 = vpop.permute.xlu1 %2141 }
 0xa17   : > { %v4689_v26 = vpop.eup %4002 }
 0xa18   : > { %v4691_v46 = vpop.eup %4004 }
 0xa19   : > { %v2103_v56 = vadd.f32 %v4691_v46, %v4689_v26  ;;  %v2144_v37 = vpop.permute.xlu1 %2143 }
 0xa1b   : > { %v4695_v59 = vpop.eup %4006  ;;  %2104 = vadd.xlane.f32.xlu0 %v2103_v56 }
 0xa1c   : > { %v4697_v35 = vpop.eup %4008 }
 0xa1d   : > { %v2106_v60 = vadd.f32 %v4697_v35, %v4695_v59  ;;  %v2146_v39 = vpop.permute.xlu1 %2145 }
 0xa1f   : > { %2107 = vadd.xlane.f32.xlu1 %v2106_v60 }
 0xa30   : > { %2240 = vrot.lane.b32.xlu1 %v4385_v40, %s4079_s3 }
 0xa31   : > { %2224 = vrot.lane.b32.xlu0 %v4367_v3, %s4079_s3 }
 0xa34   : > { %2242 = vrot.lane.b32.xlu1 %v4383_v38, %s4079_s3 }
 0xa35   : > { %2226 = vrot.lane.b32.xlu0 %v4365_v13, %s4079_s3 }
 0xa38   : > { %2244 = vrot.lane.b32.xlu1 %v4401_v49, %s4079_s3 }
 0xa39   : > { %2228 = vrot.lane.b32.xlu0 %v4373_v21, %s4079_s3 }
 0xa3c   : > { %2246 = vrot.lane.b32.xlu1 %v4399_v47, %s4079_s3 }
 0xa3d   : > { %2230 = vrot.lane.b32.xlu0 %v4371_v19, %s4079_s3 }
 0xa40   : > { %2248 = vrot.lane.b32.xlu1 %v4413_v57, %s4079_s3 }
 0xa41   : > { %2232 = vrot.lane.b32.xlu0 %v4377_v28, %s4079_s3 }
 0xa44   : > { %2250 = vrot.lane.b32.xlu1 %v4411_v55, %s4079_s3 }
 0xa45   : > { %2234 = vrot.lane.b32.xlu0 %v4375_v25, %s4079_s3 }
 0xa48   : > { %2252 = vrot.lane.b32.xlu1 %v4432_v1, %s4079_s3 }
 0xa49   : > { %2236 = vrot.lane.b32.xlu0 %v4381_v34, %s4079_s3 }
 0xa4c   : > { %2254 = vrot.lane.b32.xlu1 %v4430_v63, %s4079_s3 }
 0xa4d   : > { %2238 = vrot.lane.b32.xlu0 %v4379_v32, %s4079_s3 }
 0xa51   : > { %2222 = vrot.lane.b32.xlu0 %v4300_v53, %s4079_s3 }
 0xa6b   : > { %v1888_v50 = vpop.xlane.xlu1 %1887 }
 0xa6c   : > { %4010 = vrcp.f32 %v1888_v50 }
 0xa70   : > { %v1891_v51 = vpop.xlane.xlu0 %1890 }
 0xa71   : > { %4012 = vrcp.f32 %v1891_v51 }
 0xa76   : > { %v4011_v9 = vpop.eup %4010 }
 0xa77   : > { %v1894_v56 = vmul.f32 %v4011_v9, %v4666_v54  ;;  %v1895_v44 = vmul.f32 %v4011_v9, %v4668_v5 }
 0xa7b   : > { %v4013_v22 = vpop.eup %4012 }
 0xa7c   : > { %v1896_v60 = vmul.f32 %v4013_v22, %v3999_v11  ;;  %v1897_v2 = vmul.f32 %v4013_v22, %v4672_v15 }
 0xa7e   : > { %v1899_v14 = vpack.c.bf16 %v1897_v2, %v1895_v44  ;;  %v1898_v10 = vpack.c.bf16 %v1896_v60, %v1894_v56  ;;  %v2164_v2 = vpop.permute.xlu0 %2163  ;;  %v2148_v44 = vpop.permute.xlu1 %2147 }
 0xa80   : > { %1932 = vmatprep.mubr.bf16.mxu0 %v1899_v14 }
 0xa81   : > { %1933 = vmatmul.mubr.bf16.vlgmr.msra.gmra.mrb[40].mxu0 %v1898_v10 }
 0xa82   : > { %3572 = vmatpush3.bf16.msra.mxu0 %v4654_v17 }
 0xa83   : > { %3573 = vmatprep.subr.bf16.mxu0 %v4656_v8 }
 0xa86   : > { %3574 = vmatpush3.bf16.msra.mxu0 %v4660_v24 }
 0xa87   : > { %3575 = vmatprep.subr.bf16.mxu0 %v4658_v20 }
 0xa8a   : > { %3576 = vmatpush3.bf16.msra.mxu0 %v2138_v62 }
 0xa8b   : > { %3577 = vmatprep.subr.bf16.mxu0 %v4677_v12 }
 0xa8e   : > { %3578 = vmatpush3.bf16.msra.mxu0 %v2140_v61 }
 0xa8f   : > { %3579 = vmatprep.subr.bf16.mxu0 %v4681_v16 }
 0xa92   : > { %3580 = vmatpush3.bf16.msra.mxu0 %v2142_v4 }
 0xa93   : > { %3581 = vmatprep.subr.bf16.mxu0 %v4683_v30 }
 0xa96   : > { %3582 = vmatpush3.bf16.msra.mxu0 %v2144_v37 }
 0xa97   : > { %3583 = vmatprep.subr.bf16.mxu0 %v2162_v43 }
 0xa9a   : > { %3584 = vmatpush3.bf16.msra.mxu0 %v2146_v39 }
 0xa9b   : > { %3585 = vmatprep.subr.bf16.mxu0 %v2164_v2 }
 0xa9e   : > { %3586 = vmatpush3.bf16.msra.mxu0 %v2148_v44 }
 0xaa8   : > { %v2105_v10 = vpop.xlane.xlu0 %2104 }
 0xaa9   : > { %4014 = vrcp.f32 %v2105_v10 }
 0xaac   : > { %v2108_v14 = vpop.xlane.xlu1 %2107  ;;  %v2225_v17 = vpop.permute.xlu0 %2224 }
 0xaad   : > { %4016 = vrcp.f32 %v2108_v14  ;;  %v2260_v37 = vsel %vm1773_vm7, %v2225_v17, 0 }
 0xab0   : > { %v2241_v8 = vpop.permute.xlu1 %2240  ;;  %v2227_v20 = vpop.permute.xlu0 %2226 }
 0xab1   : > { %3879 = vmatprep.subr.msk.bf16.mxu0 %vm1773_vm7, %v2241_v8 }
 0xab3   : > { %v4015_v54 = vpop.eup %4014 }
 0xab4   : > { %v2229_v24 = vpop.permute.xlu0 %2228  ;;  %v2112_v15 = vmul.f32 %v4015_v54, %v4691_v46  ;;  %v2111_v16 = vmul.f32 %v4015_v54, %v4689_v26  ;;  %v2243_v39 = vpop.permute.xlu1 %2242  ;;  %v2263_v46 = vsel %vm1773_vm7, %v2227_v20, 0 }
 0xab5   : > { %v2266_v51 = vsel %vm1773_vm7, %v2229_v24, 0 }
 0xab7   : > { %v4017_v5 = vpop.eup %4016 }
 0xab8   : > { %v2231_v11 = vpop.permute.xlu0 %2230  ;;  %v2114_v12 = vmul.f32 %v4017_v5, %v4697_v35  ;;  %v2113_v30 = vmul.f32 %v4017_v5, %v4695_v59  ;;  %v2245_v35 = vpop.permute.xlu1 %2244 }
 0xab9   : > { %v2269_v22 = vsel %vm1773_vm7, %v2231_v11, 0 }
 0xaba   : > { %v2116_v62 = vpack.c.bf16 %v2114_v12, %v2112_v15  ;;  %v2115_v61 = vpack.c.bf16 %v2113_v30, %v2111_v16 }
 0xabc   : > { %v2233_v4 = vpop.permute.xlu0 %2232  ;;  %2213 = vmatprep.mubr.bf16.mxu0 %v2116_v62  ;;  %v2247_v9 = vpop.permute.xlu1 %2246 }
 0xabd   : > { %2214 = vmatmul.mubr.bf16.vlgmr.msra.gmra.mrb[44].mxu0 %v2115_v61  ;;  %v2272_v60 = vsel %vm1773_vm7, %v2233_v4, 0 }
 0xabe   : > { %3594 = vmatpush3.bf16.xpose.msra.mxu0 %v2260_v37 }
 0xabf   : > { %3880 = vmatprep.subr.msk.bf16.mxu0 %vm1773_vm7, %v2243_v39 }
 0xac0   : > { %v2235_v43 = vpop.permute.xlu0 %2234  ;;  %v2249_v56 = vpop.permute.xlu1 %2248 }
 0xac1   : > { %v2275_v44 = vsel %vm1773_vm7, %v2235_v43, 0 }
 0xac4   : > { %v2237_v50 = vpop.permute.xlu0 %2236  ;;  %v2251_v2 = vpop.permute.xlu1 %2250 }
 0xac5   : > { %v2278_v14 = vsel %vm1773_vm7, %v2237_v50, 0 }
 0xac6   : > { %3596 = vmatpush3.bf16.xpose.msra.mxu0 %v2263_v46 }
 0xac7   : > { %3881 = vmatprep.subr.msk.bf16.mxu0 %vm1773_vm7, %v2245_v35 }
 0xac8   : > { %v2239_v26 = vpop.permute.xlu0 %2238  ;;  %v2253_v10 = vpop.permute.xlu1 %2252 }
 0xac9   : > { %v2281_v8 = vsel %vm1773_vm7, %v2239_v26, 0 }
 0xacc   : > { %v2223_v59 = vpop.permute.xlu0 %2222  ;;  %v2255_v17 = vpop.permute.xlu1 %2254 }
 0xacd   : > { %3609 = vmatprep.mubr.msk.bf16.mxu0 %vm1773_vm7, %v2223_v59 }
 0xace   : > { %3598 = vmatpush3.bf16.xpose.msra.mxu0 %v2266_v51 }
 0xacf   : > { %3882 = vmatprep.subr.msk.bf16.mxu0 %vm1773_vm7, %v2247_v9 }
 0xad6   : > { %3600 = vmatpush3.bf16.xpose.msra.mxu0 %v2269_v22 }
 0xad7   : > { %3883 = vmatprep.subr.msk.bf16.mxu0 %vm1773_vm7, %v2249_v56 }
 0xade   : > { %3602 = vmatpush3.bf16.xpose.msra.mxu0 %v2272_v60 }
 0xadf   : > { %3884 = vmatprep.subr.msk.bf16.mxu0 %vm1773_vm7, %v2251_v2 }
 0xae6   : > { %3604 = vmatpush3.bf16.xpose.msra.mxu0 %v2275_v44 }
 0xae7   : > { %3885 = vmatprep.subr.msk.bf16.mxu0 %vm1773_vm7, %v2253_v10 }
 0xaee   : > { %3606 = vmatpush3.bf16.xpose.msra.mxu0 %v2278_v14 }
 0xaef   : > { %3886 = vmatprep.subr.msk.bf16.mxu0 %vm1773_vm7, %v2255_v17 }
 0xaf6   : > { %3608 = vmatpush3.bf16.xpose.msra.mxu0 %v2281_v8 }
 0xafd   : > { %3610 = vmatmul.mubr.msk.bf16.vlgmr.msra.gmra.mrb[48].mxu0 %vm1773_vm7, %v2223_v59 }
 0xb54   : > { %v3547_v20 = vpop.f32.mrb[40].mxu0 }
 0xb55   : > { %v3548_v24 = vpop.f32.mrb[41].mxu0 }
 0xb56   : > { %v4767_v54 = vadd.f32 %v3548_v24, %v3547_v20  ;;  %v3550_v5 = vpop.f32.mrb[42].mxu0 }
 0xb57   : > { %v3551_v11 = vpop.f32.mrb[43].mxu0 }
 0xb58   : > { %v4769_v15 = vadd.f32 %v3551_v11, %v3550_v5 }
 0xb90   : > { %v3587_v12 = vpop.f32.mrb[44].mxu0 }
 0xb91   : > { %v3588_v16 = vpop.f32.mrb[45].mxu0 }
 0xb92   : > { %v4771_v30 = vadd.f32 %v3588_v16, %v3587_v12  ;;  %v3590_v62 = vpop.f32.mrb[46].mxu0 }
 0xb93   : > { %v3591_v61 = vpop.f32.mrb[47].mxu0 }
 0xb94   : > { %v4773_v4 = vadd.f32 %v3591_v61, %v3590_v62 }
 0xb96   : > { %v3919_v37 = vpack.i.bf16 %v4773_v4, %v4771_v30  ;;  %v3968_v30 = vld [vmem:[%s5083_s8] sm:$0xff]   ;;  %v3969_v4 = vld [vmem:[%s5083_s8 + $0x8] sm:$0xff]  }
 0xbd0   : > { %v2341_v39 = vpop.f32.mrb[48].mxu0 }
 0xbd1   : > { %v2343_v43 = vpop.f32.mrb[49].mxu0 }
 0xbd2   : > { %v2345_v50 = vpop.f32.mrb[50].mxu0  ;;  %v2350_v46 = vmax.f32 %v2341_v39, %v2343_v43 }
 0xbd3   : > { %v2347_v35 = vpop.f32.mrb[51].mxu0 }
 0xbd4   : > { %2351 = vmax.xlane.f32.xlu1 %v2350_v46  ;;  %v2353_v26 = vmax.f32 %v2345_v50, %v2347_v35 }
 0xbd6   : > { %2354 = vmax.xlane.f32.xlu0 %v2353_v26 }
 0xbe5   : > { %2382 = vrot.lane.b32.xlu1 %v4562_v27, %s4079_s3 }
 0xbe9   : > { %2400 = vrot.lane.b32.xlu1 %v4590_v7, %s4079_s3 }
 0xbec   : > { %2398 = vrot.lane.b32.xlu0 %v4592_v18, %s4079_s3 }
 0xbed   : > { %2386 = vrot.lane.b32.xlu1 %v4568_v36, %s4079_s3 }
 0xbf0   : > { %2384 = vrot.lane.b32.xlu0 %v4560_v23, %s4079_s3 }
 0xbf1   : > { %2404 = vrot.lane.b32.xlu1 %v4601_v29, %s4079_s3 }
 0xbf4   : > { %2402 = vrot.lane.b32.xlu0 %v4604_v31, %s4079_s3 }
 0xbf5   : > { %2406 = vrot.lane.b32.xlu1 %v4615_v48, %s4079_s3 }
 0xbf8   : > { %2388 = vrot.lane.b32.xlu0 %v4566_v33, %s4079_s3 }
 0xbf9   : > { %2408 = vrot.lane.b32.xlu1 %v4613_v41, %s4079_s3 }
 0xbfc   : > { %2390 = vrot.lane.b32.xlu0 %v4572_v45, %s4079_s3 }
 0xbfd   : > { %2410 = vrot.lane.b32.xlu1 %v4623_v6, %s4079_s3 }
 0xc00   : > { %2392 = vrot.lane.b32.xlu0 %v4570_v42, %s4079_s3 }
 0xc01   : > { %2412 = vrot.lane.b32.xlu1 %v4621_v0, %s4079_s3 }
 0xc04   : > { %2394 = vrot.lane.b32.xlu0 %v4578_v58, %s4079_s3 }
 0xc08   : > { %2396 = vrot.lane.b32.xlu0 %v4574_v52, %s4079_s3 }
 0xc61   : > { %v2352_v59 = vpop.xlane.xlu1 %2351 }
 0xc62   : > { %v2356_v51 = vsub.f32 %v2341_v39, %v2352_v59  ;;  %v2357_v9 = vsub.f32 %v2343_v43, %v2352_v59 }
 0xc63   : > { %v2355_v22 = vpop.xlane.xlu0 %2354 }
 0xc64   : > { %v2360_v56 = vmul.f32 1.442695, %v2356_v51  ;;  %v2362_v60 = vmul.f32 1.442695, %v2357_v9  ;;  %v2358_v2 = vsub.f32 %v2345_v50, %v2355_v22  ;;  %v2359_v44 = vsub.f32 %v2347_v35, %v2355_v22 }
 0xc65   : > { %v2383_v10 = vpop.permute.xlu1 %2382 }
 0xc66   : > { %4018 = vpow2.f32 %v2360_v56  ;;  %v2364_v14 = vmul.f32 1.442695, %v2358_v2  ;;  %v2366_v17 = vmul.f32 1.442695, %v2359_v44 }
 0xc67   : > { %4020 = vpow2.f32 %v2362_v60  ;;  %v2399_v8 = vpop.permute.xlu0 %2398 }
 0xc68   : > { %4022 = vpow2.f32 %v2364_v14  ;;  %3611 = vmatprep.subr.bf16.mxu1 %v2399_v8 }
 0xc69   : > { %4024 = vpow2.f32 %v2366_v17  ;;  %v2401_v20 = vpop.permute.xlu1 %2400  ;;  %3612 = vmatpush3.bf16.msra.mxu1 %v2383_v10 }
 0xc6a   : > { %3613 = vmatprep.subr.bf16.mxu1 %v2401_v20 }
 0xc6b   : > { %v2385_v24 = vpop.permute.xlu0 %2384 }
 0xc6d   : > { %v2387_v5 = vpop.permute.xlu1 %2386  ;;  %3614 = vmatpush3.bf16.msra.mxu1 %v2385_v24 }
 0xc6f   : > { %v2403_v11 = vpop.permute.xlu0 %2402 }
 0xc70   : > { %v4019_v12 = vpop.eup %4018  ;;  %3615 = vmatprep.subr.bf16.mxu1 %v2403_v11 }
 0xc71   : > { %v4021_v16 = vpop.eup %4020  ;;  %v2405_v62 = vpop.permute.xlu1 %2404  ;;  %3616 = vmatpush3.bf16.msra.mxu1 %v2387_v5 }
 0xc72   : > { %v4023_v61 = vpop.eup %4022  ;;  %3617 = vmatprep.subr.bf16.mxu1 %v2405_v62  ;;  %v2368_v39 = vadd.f32 %v4021_v16, %v4019_v12 }
 0xc73   : > { %v4025_v43 = vpop.eup %4024  ;;  %v2389_v50 = vpop.permute.xlu0 %2388 }
 0xc74   : > { %2369 = vadd.xlane.f32.xlu1 %v2368_v39  ;;  %v2371_v46 = vadd.f32 %v4025_v43, %v4023_v61 }
 0xc75   : > { %v2407_v35 = vpop.permute.xlu1 %2406  ;;  %3618 = vmatpush3.bf16.msra.mxu1 %v2389_v50 }
 0xc76   : > { %2372 = vadd.xlane.f32.xlu0 %v2371_v46  ;;  %3619 = vmatprep.subr.bf16.mxu1 %v2407_v35  ;;  %v5123_v35 = vmov 0.0  }
 0xc77   : > { %v2391_v26 = vpop.permute.xlu0 %2390 }
 0xc79   : > { %v2409_v59 = vpop.permute.xlu1 %2408  ;;  %3620 = vmatpush3.bf16.msra.mxu1 %v2391_v26 }
 0xc7a   : > { %3621 = vmatprep.subr.bf16.mxu1 %v2409_v59 }
 0xc7b   : > { %v2393_v51 = vpop.permute.xlu0 %2392 }
 0xc7d   : > { %v2411_v9 = vpop.permute.xlu1 %2410  ;;  %3622 = vmatpush3.bf16.msra.mxu1 %v2393_v51 }
 0xc7e   : > { %3623 = vmatprep.subr.bf16.mxu1 %v2411_v9 }
 0xc7f   : > { %v2395_v22 = vpop.permute.xlu0 %2394 }
 0xc81   : > { %v2413_v56 = vpop.permute.xlu1 %2412  ;;  %3624 = vmatpush3.bf16.msra.mxu1 %v2395_v22 }
 0xc82   : > { %3625 = vmatprep.subr.bf16.mxu1 %v2413_v56 }
 0xc83   : > { %v2397_v60 = vpop.permute.xlu0 %2396 }
 0xc85   : > { %2473 = vrot.lane.b32.xlu1 %v4367_v3, %s4080_s27  ;;  %3626 = vmatpush3.bf16.msra.mxu1 %v2397_v60 }
 0xc89   : > { %2475 = vrot.lane.b32.xlu1 %v4365_v13, %s4080_s27 }
 0xc8c   : > { %2489 = vrot.lane.b32.xlu0 %v4385_v40, %s4080_s27 }
 0xc8d   : > { %2477 = vrot.lane.b32.xlu1 %v4373_v21, %s4080_s27 }
 0xc90   : > { %2491 = vrot.lane.b32.xlu0 %v4383_v38, %s4080_s27 }
 0xc91   : > { %2479 = vrot.lane.b32.xlu1 %v4371_v19, %s4080_s27 }
 0xc94   : > { %2493 = vrot.lane.b32.xlu0 %v4401_v49, %s4080_s27 }
 0xc95   : > { %2481 = vrot.lane.b32.xlu1 %v4377_v28, %s4080_s27 }
 0xc98   : > { %2495 = vrot.lane.b32.xlu0 %v4399_v47, %s4080_s27 }
 0xc99   : > { %2483 = vrot.lane.b32.xlu1 %v4375_v25, %s4080_s27 }
 0xc9c   : > { %2497 = vrot.lane.b32.xlu0 %v4413_v57, %s4080_s27 }
 0xc9d   : > { %2485 = vrot.lane.b32.xlu1 %v4381_v34, %s4080_s27 }
 0xca0   : > { %2499 = vrot.lane.b32.xlu0 %v4411_v55, %s4080_s27 }
 0xca1   : > { %2487 = vrot.lane.b32.xlu1 %v4379_v32, %s4080_s27 }
 0xca4   : > { %2501 = vrot.lane.b32.xlu0 %v4432_v1, %s4080_s27 }
 0xca5   : > { %2471 = vrot.lane.b32.xlu1 %v4300_v53, %s4080_s27 }
 0xca8   : > { %2503 = vrot.lane.b32.xlu0 %v4430_v63, %s4080_s27 }
 0xd01   : > { %v2370_v13 = vpop.xlane.xlu1 %2369 }
 0xd02   : > { %4026 = vrcp.f32 %v2370_v13 }
 0xd03   : > { %v2373_v3 = vpop.xlane.xlu0 %2372 }
 0xd04   : > { %4028 = vrcp.f32 %v2373_v3 }
 0xd05   : > { %v2474_v19 = vpop.permute.xlu1 %2473 }
 0xd06   : > { %v2509_v63 = vsel %vm1773_vm7, %v2474_v19, 0 }
 0xd07   : > { %v2490_v21 = vpop.permute.xlu0 %2489 }
 0xd08   : > { %3887 = vmatprep.subr.msk.bf16.mxu1 %vm1773_vm7, %v2490_v21 }
 0xd09   : > { %v2476_v25 = vpop.permute.xlu1 %2475 }
 0xd0a   : > { %v2512_v10 = vsel %vm1773_vm7, %v2476_v25, 0 }
 0xd0b   : > { %v2492_v1 = vpop.permute.xlu0 %2491 }
 0xd0c   : > { %v4027_v28 = vpop.eup %4026 }
 0xd0d   : > { %v2478_v32 = vpop.permute.xlu1 %2477  ;;  %v2377_v38 = vmul.f32 %v4027_v28, %v4021_v16  ;;  %v2376_v47 = vmul.f32 %v4027_v28, %v4019_v12 }
 0xd0e   : > { %v4029_v34 = vpop.eup %4028  ;;  %v2515_v20 = vsel %vm1773_vm7, %v2478_v32, 0 }
 0xd0f   : > { %v2379_v40 = vmul.f32 %v4029_v34, %v4025_v43  ;;  %v2378_v49 = vmul.f32 %v4029_v34, %v4023_v61  ;;  %v2494_v14 = vpop.permute.xlu0 %2493 }
 0xd11   : > { %v2480_v53 = vpop.permute.xlu1 %2479  ;;  %v2381_v55 = vpack.c.bf16 %v2379_v40, %v2377_v38  ;;  %v2380_v57 = vpack.c.bf16 %v2378_v49, %v2376_v47 }
 0xd12   : > { %v2518_v11 = vsel %vm1773_vm7, %v2480_v53, 0 }
 0xd13   : > { %2462 = vmatprep.mubr.bf16.mxu1 %v2381_v55  ;;  %v2496_v24 = vpop.permute.xlu0 %2495 }
 0xd14   : > { %2463 = vmatmul.mubr.bf16.vlgmr.msra.gmra.mrb[44].mxu1 %v2380_v57 }
 0xd15   : > { %3634 = vmatpush3.bf16.xpose.msra.mxu1 %v2509_v63  ;;  %v2482_v2 = vpop.permute.xlu1 %2481 }
 0xd16   : > { %3888 = vmatprep.subr.msk.bf16.mxu1 %vm1773_vm7, %v2492_v1  ;;  %v2521_v16 = vsel %vm1773_vm7, %v2482_v2, 0 }
 0xd17   : > { %v2498_v12 = vpop.permute.xlu0 %2497 }
 0xd19   : > { %v2484_v44 = vpop.permute.xlu1 %2483 }
 0xd1a   : > { %v2524_v61 = vsel %vm1773_vm7, %v2484_v44, 0 }
 0xd1b   : > { %v2500_v62 = vpop.permute.xlu0 %2499 }
 0xd1d   : > { %3636 = vmatpush3.bf16.xpose.msra.mxu1 %v2512_v10  ;;  %v2486_v17 = vpop.permute.xlu1 %2485 }
 0xd1e   : > { %3889 = vmatprep.subr.msk.bf16.mxu1 %vm1773_vm7, %v2494_v14  ;;  %v2527_v43 = vsel %vm1773_vm7, %v2486_v17, 0 }
 0xd1f   : > { %v2502_v39 = vpop.permute.xlu0 %2501 }
 0xd21   : > { %v2488_v8 = vpop.permute.xlu1 %2487 }
 0xd22   : > { %v2530_v46 = vsel %vm1773_vm7, %v2488_v8, 0 }
 0xd23   : > { %v2504_v50 = vpop.permute.xlu0 %2503 }
 0xd25   : > { %3638 = vmatpush3.bf16.xpose.msra.mxu1 %v2515_v20  ;;  %v2472_v5 = vpop.permute.xlu1 %2471 }
 0xd26   : > { %3890 = vmatprep.subr.msk.bf16.mxu1 %vm1773_vm7, %v2496_v24  ;;  %3649 = vmatprep.mubr.msk.bf16.mxu1 %vm1773_vm7, %v2472_v5 }
 0xd2d   : > { %3640 = vmatpush3.bf16.xpose.msra.mxu1 %v2518_v11 }
 0xd2e   : > { %3891 = vmatprep.subr.msk.bf16.mxu1 %vm1773_vm7, %v2498_v12 }
 0xd35   : > { %3642 = vmatpush3.bf16.xpose.msra.mxu1 %v2521_v16 }
 0xd36   : > { %3892 = vmatprep.subr.msk.bf16.mxu1 %vm1773_vm7, %v2500_v62 }
 0xd3d   : > { %3644 = vmatpush3.bf16.xpose.msra.mxu1 %v2524_v61 }
 0xd3e   : > { %3893 = vmatprep.subr.msk.bf16.mxu1 %vm1773_vm7, %v2502_v39 }
 0xd45   : > { %3646 = vmatpush3.bf16.xpose.msra.mxu1 %v2527_v43 }
 0xd46   : > { %3894 = vmatprep.subr.msk.bf16.mxu1 %vm1773_vm7, %v2504_v50 }
 0xd4d   : > { %3648 = vmatpush3.bf16.xpose.msra.mxu1 %v2530_v46 }
 0xd4e   : > { %3831 = vmatprep.subr.bf16.mxu1 %v5123_v35 }
 0xd54   : > { %3650 = vmatmul.mubr.msk.bf16.vlgmr.msra.gmra.mrb[48].mxu1 %vm1773_vm7, %v2472_v5 }
 0xd55   : > { %3835 = vmatprep.mubr.msk.bf16.mxu1 %vm4075_vm5, %v5123_v35 }
 0xde7   : > { %v3627_v26 = vpop.f32.mrb[44].mxu1 }
 0xde8   : > { %v3628_v59 = vpop.f32.mrb[45].mxu1 }
 0xde9   : > { %v4864_v51 = vadd.f32 %v3628_v59, %v3627_v26  ;;  %v3630_v9 = vpop.f32.mrb[46].mxu1 }
 0xdea   : > { %v3631_v22 = vpop.f32.mrb[47].mxu1 }
 0xdeb   : > { %v4866_v56 = vadd.f32 %v3631_v22, %v3630_v9 }
 0xded   : > { %v3924_v60 = vpack.i.bf16 %v4866_v56, %v4864_v51 }
 0xe27   : > { %v2590_v13 = vpop.f32.mrb[48].mxu1 }
 0xe28   : > { %v2592_v3 = vpop.f32.mrb[49].mxu1 }
 0xe29   : > { %v2599_v19 = vmax.f32 %v2590_v13, %v2592_v3  ;;  %v2594_v21 = vpop.f32.mrb[50].mxu1 }
 0xe2a   : > { %v2596_v25 = vpop.f32.mrb[51].mxu1 }
 0xe2b   : > { %v2602_v28 = vmax.f32 %v2594_v21, %v2596_v25  ;;  %2600 = vmax.xlane.f32.xlu0 %v2599_v19 }
 0xe2d   : > { %2603 = vmax.xlane.f32.xlu1 %v2602_v28 }
 0xe3e   : > { %2631 = vrot.lane.b32.xlu1 %v4562_v27, %s4080_s27 }
 0xe41   : > { %2647 = vrot.lane.b32.xlu0 %v4592_v18, %s4080_s27 }
 0xe42   : > { %2633 = vrot.lane.b32.xlu1 %v4560_v23, %s4080_s27 }
 0xe45   : > { %2649 = vrot.lane.b32.xlu0 %v4590_v7, %s4080_s27 }
 0xe46   : > { %2635 = vrot.lane.b32.xlu1 %v4568_v36, %s4080_s27 }
 0xe49   : > { %2651 = vrot.lane.b32.xlu0 %v4604_v31, %s4080_s27 }
 0xe4a   : > { %2637 = vrot.lane.b32.xlu1 %v4566_v33, %s4080_s27 }
 0xe4d   : > { %2653 = vrot.lane.b32.xlu0 %v4601_v29, %s4080_s27 }
 0xe4e   : > { %2639 = vrot.lane.b32.xlu1 %v4572_v45, %s4080_s27 }
 0xe51   : > { %2655 = vrot.lane.b32.xlu0 %v4615_v48, %s4080_s27 }
 0xe52   : > { %2641 = vrot.lane.b32.xlu1 %v4570_v42, %s4080_s27 }
 0xe55   : > { %2657 = vrot.lane.b32.xlu0 %v4613_v41, %s4080_s27 }
 0xe56   : > { %2643 = vrot.lane.b32.xlu1 %v4578_v58, %s4080_s27 }
 0xe59   : > { %2659 = vrot.lane.b32.xlu0 %v4623_v6, %s4080_s27 }
 0xeb8   : > { %v2601_v23 = vpop.xlane.xlu0 %2600 }
 0xeb9   : > { %v2605_v27 = vsub.f32 %v2590_v13, %v2601_v23  ;;  %v2606_v33 = vsub.f32 %v2592_v3, %v2601_v23 }
 0xeba   : > { %v2604_v36 = vpop.xlane.xlu1 %2603 }
 0xebb   : > { %v2609_v45 = vmul.f32 1.442695, %v2605_v27  ;;  %v2611_v7 = vmul.f32 1.442695, %v2606_v33  ;;  %v2607_v18 = vsub.f32 %v2594_v21, %v2604_v36  ;;  %v2608_v29 = vsub.f32 %v2596_v25, %v2604_v36 }
 0xebc   : > { %v2648_v31 = vpop.permute.xlu0 %2647 }
 0xebd   : > { %4030 = vpow2.f32 %v2609_v45  ;;  %v2613_v42 = vmul.f32 1.442695, %v2607_v18  ;;  %v2615_v48 = vmul.f32 1.442695, %v2608_v29  ;;  %3651 = vmatprep.subr.bf16.mxu0 %v2648_v31 }
 0xebe   : > { %4032 = vpow2.f32 %v2611_v7  ;;  %v2632_v41 = vpop.permute.xlu1 %2631 }
 0xebf   : > { %4034 = vpow2.f32 %v2613_v42  ;;  %3652 = vmatpush3.bf16.msra.mxu0 %v2632_v41  ;;  %v5124_v42 = vld [vmem:[#allocation5_spill] sm:$0xff] }
 0xec0   : > { %4036 = vpow2.f32 %v2615_v48  ;;  %v2650_v58 = vpop.permute.xlu0 %2649 }
 0xec1   : > { %3653 = vmatprep.subr.bf16.mxu0 %v2650_v58 }
 0xec2   : > { %v2634_v6 = vpop.permute.xlu1 %2633 }
 0xec3   : > { %3654 = vmatpush3.bf16.msra.mxu0 %v2634_v6  ;;  %v5125_v6 = vld [vmem:[#allocation6_spill] sm:$0xff] }
 0xec4   : > { %v2652_v32 = vpop.permute.xlu0 %2651 }
 0xec5   : > { %3655 = vmatprep.subr.bf16.mxu0 %v2652_v32 }
 0xec6   : > { %v2636_v34 = vpop.permute.xlu1 %2635 }
 0xec7   : > { %v4031_v38 = vpop.eup %4030  ;;  %3656 = vmatpush3.bf16.msra.mxu0 %v2636_v34 }
 0xec8   : > { %v4033_v40 = vpop.eup %4032  ;;  %v2654_v47 = vpop.permute.xlu0 %2653 }
 0xec9   : > { %v4035_v49 = vpop.eup %4034  ;;  %3657 = vmatprep.subr.bf16.mxu0 %v2654_v47  ;;  %v2617_v53 = vadd.f32 %v4033_v40, %v4031_v38 }
 0xeca   : > { %v4037_v55 = vpop.eup %4036  ;;  %v2638_v57 = vpop.permute.xlu1 %2637 }
 0xecb   : > { %2618 = vadd.xlane.f32.xlu0 %v2617_v53  ;;  %3658 = vmatpush3.bf16.msra.mxu0 %v2638_v57  ;;  %v2620_v63 = vadd.f32 %v4037_v55, %v4035_v49 }
 0xecc   : > { %v2656_v1 = vpop.permute.xlu0 %2655 }
 0xecd   : > { %2621 = vadd.xlane.f32.xlu1 %v2620_v63  ;;  %3659 = vmatprep.subr.bf16.mxu0 %v2656_v1 }
 0xece   : > { %v2640_v2 = vpop.permute.xlu1 %2639 }
 0xecf   : > { %3660 = vmatpush3.bf16.msra.mxu0 %v2640_v2 }
 0xed0   : > { %v2658_v44 = vpop.permute.xlu0 %2657 }
 0xed1   : > { %3661 = vmatprep.subr.bf16.mxu0 %v2658_v44 }
 0xed2   : > { %v2642_v10 = vpop.permute.xlu1 %2641 }
 0xed3   : > { %3662 = vmatpush3.bf16.msra.mxu0 %v2642_v10  ;;  %v3970_v10 = vld [vmem:[%s5085_s10] sm:$0xff]  }
 0xed4   : > { %v2660_v14 = vpop.permute.xlu0 %2659 }
 0xed5   : > { %3663 = vmatprep.subr.bf16.mxu0 %v2660_v14  ;;  %v3971_v14 = vld [vmem:[%s5085_s10 + $0x8] sm:$0xff]  }
 0xed6   : > { %v2644_v17 = vpop.permute.xlu1 %2643 }
 0xed7   : > { %3664 = vmatpush3.bf16.msra.mxu0 %v2644_v17 }
 0xede   : > { %2645 = vrot.lane.b32.xlu1 %v4574_v52, %s4080_s27 }
 0xee1   : > { %2661 = vrot.lane.b32.xlu0 %v4621_v0, %s4080_s27  ;;  %s3895_s27 = smul.u32 24, %s5130_s22 }
 0xee2   : > { %3925 = vrot.lane.b32.xlu1 %v3924_v60, %s4081_s28 }
 0xee3   : > { %s623_s0 = scalar_lea.vmem %s5095_s20, %s3895_s27 }
 0xee5   : > { %3920 = vrot.lane.b32.xlu0 %v3919_v37, %s4082_s30 }
 0xf58   : > { %v2619_v8 = vpop.xlane.xlu0 %2618 }
 0xf59   : > { %4038 = vrcp.f32 %v2619_v8 }
 0xf5a   : > { %v2622_v20 = vpop.xlane.xlu1 %2621 }
 0xf5b   : > { %4040 = vrcp.f32 %v2622_v20 }
 0xf5c   : > { %v2662_v24 = vpop.permute.xlu0 %2661 }
 0xf5d   : > { %3665 = vmatprep.subr.bf16.mxu0 %v2662_v24 }
 0xf5e   : > { %v2646_v52 = vpop.permute.xlu1 %2645 }
 0xf5f   : > { %3666 = vmatpush3.bf16.msra.mxu0 %v2646_v52 }
 0xf60   : > { %3795 = vmatprep.subr.bf16.mxu0 %v5123_v35  ;;  %v3921_v9 = vpop.permute.xlu0 %3920 }
 0xf61   : > { %v3923_v22 = vunpack.i.h.bf16 %v3921_v9  ;;  %v3922_v56 = vunpack.i.l.bf16 %v3921_v9  ;;  %v3973_v9 = vld [vmem:[%s5087_s12 + $0x8] sm:$0xff]  }
 0xf62   : > { %v3926_v60 = vpop.permute.xlu1 %3925 }
 0xf63   : > { %v4039_v0 = vpop.eup %4038  ;;  %v3928_v13 = vunpack.i.h.bf16 %v3926_v60  ;;  %v3927_v3 = vunpack.i.l.bf16 %v3926_v60  ;;  %v2744_v19 = vsel %vm1773_vm7, %v4767_v54, %v3922_v56  ;;  %v2745_v21 = vsel %vm1773_vm7, %v4769_v15, %v3923_v22  ;;  %v3430_v54 = vld [vmem:[%s5084_s9] ss:$0 sm:$0xff]  ;;  %v3974_v22 = vld [vmem:[%s5087_s12 + $0x10] sm:$0xff]   ;;  %v3975_v56 = vld [vmem:[%s5087_s12 + $0x18] sm:$0xff]  }
 0xf64   : > { %v2626_v11 = vmul.f32 %v4039_v0, %v4033_v40  ;;  %v2625_v16 = vmul.f32 %v4039_v0, %v4031_v38  ;;  %v3976_v60 = vld [vmem:[%s5087_s12 + $0x20] sm:$0xff]  }
 0xf65   : > { %v4041_v5 = vpop.eup %4040  ;;  %v2746_v27 = vsel %vm1239_vm6, %v2744_v19, %v3927_v3  ;;  %v2747_v33 = vsel %vm1239_vm6, %v2745_v21, %v3928_v13  ;;  %v3977_v13 = vld [vmem:[%s5087_s12 + $0x28] sm:$0xff]   ;;  %v3978_v3 = vld [vmem:[%s5087_s12 + $0x30] sm:$0xff]   ;;  %v3979_v19 = vld [vmem:[%s5087_s12 + $0x38] sm:$0xff]  }
 0xf66   : > { %v2628_v12 = vmul.f32 %v4041_v5, %v4037_v55  ;;  %v2627_v62 = vmul.f32 %v4041_v5, %v4035_v49  ;;  %v5126_v5 = vld [vmem:[#allocation2_spill] sm:$0xff] }
 0xf67   : > { %v3434_v21 = vld [vmem:[%s5086_s11] ss:$0 sm:$0xff] }
 0xf68   : > { %v2630_v61 = vpack.c.bf16 %v2628_v12, %v2626_v11  ;;  %v2629_v39 = vpack.c.bf16 %v2627_v62, %v2625_v16  ;;  %v2844_v11 = vsub.s32 4, %v5126_v5  ;;  %v4957_v12 = vld [vmem:[%s5120_s24] sm:$0xff]  ;;  %v2850_v62 = vsub.s32 5, %v5126_v5 }
 0xf6a   : > { %2711 = vmatprep.mubr.bf16.mxu0 %v2630_v61  ;;  %v2845_v16 = vrot.slane %v4957_v12, %v2844_v11  ;;  %v3447_v11 = vld [vmem:[%s5090_s15] ss:$0 sm:$0xff] }
 0xf6b   : > { %2712 = vmatmul.mubr.bf16.vlgmr.msra.gmra.mrb[52].mxu0 %v2629_v39 }
 0xf6c   : > { %3799 = vmatprep.mubr.msk.bf16.mxu0 %vm4075_vm5, %v5123_v35  ;;  %3796 = vmatpush3.bf16.msra.mxu0 %v3968_v30 }
 0xf6d   : > { %3797 = vmatprep.subr.bf16.mxu0 %v5123_v35 }
 0xf70   : > { %3798 = vmatpush3.bf16.msra.mxu0 %v3969_v4 }
 0xf71   : > { %3803 = vmatprep.subr.bf16.mxu0 %v5123_v35 }
0x103e   : > { %v3667_v37 = vpop.f32.mrb[52].mxu0 }
0x103f   : > { %v3668_v43 = vpop.f32.mrb[53].mxu0 }
0x1040   : > { %v3669_v50 = vadd.f32 %v3668_v43, %v3667_v37  ;;  %v3670_v46 = vpop.f32.mrb[54].mxu0  ;;  %v2851_v43 = vrot.slane %v4957_v12, %v2850_v62 }
0x1041   : > { %v3671_v26 = vpop.f32.mrb[55].mxu0 }
0x1042   : > { %v3672_v59 = vadd.f32 %v3671_v26, %v3670_v46 }
0x1044   : > { %v3929_v51 = vpack.i.bf16 %v3672_v59, %v3669_v50 }
0x1046   : > { %3930 = vrot.lane.b32.xlu0 %v3929_v51, %s4083_s26  ;;  %v3972_v51 = vld [vmem:[%s5087_s12] sm:$0xff]  }
0x10b8   : > { %v3931_v25 = vpop.permute.xlu0 %3930 }
0x10b9   : > { %v3933_v28 = vunpack.i.h.bf16 %v3931_v25  ;;  %v3932_v23 = vunpack.i.l.bf16 %v3931_v25 }
0x10bb   : > { %v2749_v36 = vsel %vm2748_vm8, %v2746_v27, %v3932_v23  ;;  %v2750_v45 = vsel %vm2748_vm8, %v2747_v33, %v3933_v28 }
0x10bc   : > { %v2751_v7 = vpack.c.bf16 %v2750_v45, %v2749_v36 }
0x10be   : > { %3800 = vmatmul.mubr.msk.bf16.vlgmr.msra.gmra.mrb[56].mxu0 %vm779_vm4, %v2751_v7 }
0x10bf   : > { %3807 = vmatprep.mubr.msk.bf16.mxu0 %vm4075_vm5, %v5123_v35  ;;  %3804 = vmatpush3.bf16.msra.mxu0 %v3970_v10 }
0x10c0   : > { %3805 = vmatprep.subr.bf16.mxu0 %v5123_v35 }
0x10c3   : > { %3806 = vmatpush3.bf16.msra.mxu0 %v3971_v14 }
0x10c4   : > { %3811 = vmatprep.subr.bf16.mxu0 %v5123_v35 }
0x1191   : > { %v2807_v15 = vpop.f32.mrb[56].mxu0 }
0x1192   : > { %v2808_v18 = vadd.f32 %v3430_v54, %v2807_v15  ;;  %v3801_v29 = vpop.f32.mrb[57].mxu0 }
0x1193   : > { %v2810_v31 = vpop.f32.mrb[58].mxu0 }
0x1194   : > { %v4932_v48 = vadd.f32 %v2808_v18, %v5124_v42  ;;  %v2811_v41 = vadd.f32 %v3430_v54, %v2810_v31  ;;  %v3802_v58 = vpop.f32.mrb[59].mxu0 }
0x1196   : > { %v4935_v32 = vadd.f32 %v2811_v41, %v5125_v6  ;;  %v2816_v34 = vsel %vm779_vm4, %v4932_v48, 0.0 }
0x1197   : > { %2817 = vadd.xlane.f32.xlu1 %v2816_v34 }
0x1198   : > { %v2819_v38 = vsel %vm779_vm4, %v4935_v32, 0.0 }
0x1199   : > { %2820 = vadd.xlane.f32.xlu0 %v2819_v38 }
0x1224   : > { %v2818_v40 = vpop.xlane.xlu1 %2817 }
0x1225   : > { %v2822_v47 = vmul.f32 0.03125, %v2818_v40 }
0x1226   : > { %v2821_v49 = vpop.xlane.xlu0 %2820 }
0x1227   : > { %v2824_v53 = vsub.f32 %v4932_v48, %v2822_v47  ;;  %v2823_v55 = vmul.f32 0.03125, %v2821_v49 }
0x1229   : > { %v2825_v57 = vsub.f32 %v4935_v32, %v2823_v55  ;;  %v2826_v63 = vmul.f32 %v2824_v53, %v2824_v53 }
0x122b   : > { %v2828_v1 = vsel %vm779_vm4, %v2826_v63, 0.0  ;;  %v2827_v2 = vmul.f32 %v2825_v57, %v2825_v57  ;;  %v3980_v63 = vld [vmem:[%s5089_s14] sm:$0xff]  }
0x122c   : > { %2829 = vadd.xlane.f32.xlu0 %v2828_v1  ;;  %3832 = vmatpush3.bf16.msra.mxu1 %v3980_v63  ;;  %v3981_v1 = vld [vmem:[%s5089_s14 + $0x8] sm:$0xff]  }
0x122d   : > { %v2831_v44 = vsel %vm779_vm4, %v2827_v2, 0.0  ;;  %3833 = vmatprep.subr.bf16.mxu1 %v5123_v35  ;;  %v3438_v2 = vld [vmem:[%s5088_s13] ss:$0 sm:$0xff] }
0x122e   : > { %2832 = vadd.xlane.f32.xlu1 %v2831_v44 }
0x1230   : > { %3834 = vmatpush3.bf16.msra.mxu1 %v3981_v1 }
0x1231   : > { %3839 = vmatprep.subr.bf16.mxu1 %v5123_v35 }
0x12b9   : > { %v2830_v17 = vpop.xlane.xlu0 %2829 }
0x12ba   : > { %v2834_v8 = vmul.f32 0.03125, %v2830_v17 }
0x12bb   : > { %v2833_v20 = vpop.xlane.xlu1 %2832 }
0x12bc   : > { %v2836_v24 = vadd.f32 1e-05, %v2834_v8  ;;  %v2835_v52 = vmul.f32 0.03125, %v2833_v20 }
0x12be   : > { %4042 = vrsqrt.f32 %v2836_v24  ;;  %v2837_v0 = vadd.f32 1e-05, %v2835_v52 }
0x12c0   : > { %4044 = vrsqrt.f32 %v2837_v0 }
0x12c8   : > { %v4043_v61 = vpop.eup %4042 }
0x12c9   : > { %v2840_v39 = vmul.f32 %v4043_v61, %v2824_v53 }
0x12ca   : > { %v4045_v30 = vpop.eup %4044 }
0x12cb   : > { %v2846_v4 = vmul.f32 %v2845_v16, %v2840_v39  ;;  %v2841_v37 = vmul.f32 %v4045_v30, %v2825_v57  ;;  %v5127_v30 = vld [vmem:[#allocation3_spill] sm:$0xff] }
0x12cd   : > { %v2847_v50 = vmul.f32 %v2845_v16, %v2841_v37  ;;  %v2852_v46 = vadd.f32 %v2851_v43, %v2846_v4 }
0x12cf   : > { %v2853_v26 = vadd.f32 %v2851_v43, %v2847_v50 }
0x12d1   : > { %v2854_v59 = vpack.c.bf16 %v2853_v26, %v2852_v46 }
0x12d3   : > { %3808 = vmatmul.mubr.msk.bf16.vlgmr.msra.gmra.mrb[60].mxu0 %vm779_vm4, %v2854_v59 }
0x12d4   : > { %3827 = vmatprep.mubr.msk.bf16.mxu0 %vm4075_vm5, %v5123_v35  ;;  %3812 = vmatpush3.bf16.msra.mxu0 %v3972_v51 }
0x12d5   : > { %3813 = vmatprep.subr.bf16.mxu0 %v5123_v35 }
0x12d8   : > { %3814 = vmatpush3.bf16.msra.mxu0 %v3973_v9 }
0x12d9   : > { %3815 = vmatprep.subr.bf16.mxu0 %v5123_v35 }
0x12dc   : > { %3816 = vmatpush3.bf16.msra.mxu0 %v3974_v22 }
0x12dd   : > { %3817 = vmatprep.subr.bf16.mxu0 %v5123_v35 }
0x12e0   : > { %3818 = vmatpush3.bf16.msra.mxu0 %v3975_v56 }
0x12e1   : > { %3819 = vmatprep.subr.bf16.mxu0 %v5123_v35 }
0x12e4   : > { %3820 = vmatpush3.bf16.msra.mxu0 %v3976_v60 }
0x12e5   : > { %3821 = vmatprep.subr.bf16.mxu0 %v5123_v35 }
0x12e8   : > { %3822 = vmatpush3.bf16.msra.mxu0 %v3977_v13 }
0x12e9   : > { %3823 = vmatprep.subr.bf16.mxu0 %v5123_v35 }
0x12ec   : > { %3824 = vmatpush3.bf16.msra.mxu0 %v3978_v3 }
0x12ed   : > { %3825 = vmatprep.subr.bf16.mxu0 %v5123_v35 }
0x12f0   : > { %3826 = vmatpush3.bf16.msra.mxu0 %v3979_v19 }
0x13a6   : > { %v2910_v25 = vpop.f32.mrb[60].mxu0 }
0x13a7   : > { %v2911_v28 = vadd.f32 %v3434_v21, %v2910_v25  ;;  %v3809_v23 = vpop.f32.mrb[61].mxu0  ;;  %v3983_v25 = vld [vmem:[%s5091_s16 + $0x8] sm:$0xff]  }
0x13a8   : > { %v2913_v27 = vpop.f32.mrb[62].mxu0 }
0x13a9   : > { %v2917_v33 = vmul.f32 %v2911_v28, %v2911_v28  ;;  %v2914_v36 = vadd.f32 %v3434_v21, %v2913_v27  ;;  %v3810_v45 = vpop.f32.mrb[63].mxu0  ;;  %v3982_v21 = vld [vmem:[%s5091_s16] sm:$0xff]  }
0x13ab   : > { %v2919_v7 = vmul.f32 %v2917_v33, %v2911_v28  ;;  %v2918_v54 = vmul.f32 %v2914_v36, %v2914_v36 }
0x13ad   : > { %v2921_v15 = vmul.f32 0.044715, %v2919_v7  ;;  %v2920_v18 = vmul.f32 %v2918_v54, %v2914_v36  ;;  %v3126_v7 = vsub.s32 6, %v5126_v5 }
0x13af   : > { %v2923_v29 = vadd.f32 %v2921_v15, %v2911_v28  ;;  %v2922_v31 = vmul.f32 0.044715, %v2920_v18  ;;  %v3127_v54 = vrot.slane %v4957_v12, %v3126_v7  ;;  %v3132_v15 = vsub.s32 7, %v5126_v5  ;;  %v3984_v5 = vld [vmem:[%s5093_s18] sm:$0xff]  }
0x13b1   : > { %v2925_v42 = vmul.f32 0.7978846, %v2923_v29  ;;  %v2924_v41 = vadd.f32 %v2922_v31, %v2914_v36 }
0x13b3   : > { %4046 = vtanh.f32 %v2925_v42  ;;  %v2926_v58 = vmul.f32 0.7978846, %v2924_v41 }
0x13b5   : > { %4048 = vtanh.f32 %v2926_v58  ;;  %v3133_v58 = vrot.slane %v4957_v12, %v3132_v15  ;;  %v3985_v12 = vld [vmem:[%s5093_s18 + $0x8] sm:$0xff]  }
0x13bd   : > { %v4047_v6 = vpop.eup %4046 }
0x13be   : > { %v2929_v34 = vadd.f32 1.0, %v4047_v6 }
0x13bf   : > { %v4049_v38 = vpop.eup %4048 }
0x13c0   : > { %v2931_v40 = vmul.f32 0.5, %v2929_v34  ;;  %v2930_v47 = vadd.f32 1.0, %v4049_v38 }
0x13c2   : > { %v2932_v49 = vmul.f32 0.5, %v2930_v47  ;;  %v2933_v53 = vmul.f32 %v2931_v40, %v2911_v28  ;;  %v3451_v47 = vld [vmem:[%s5092_s17] ss:$0 sm:$0xff] }
0x13c4   : > { %v2934_v55 = vmul.f32 %v2932_v49, %v2914_v36 }
0x13c6   : > { %v2935_v57 = vpack.c.bf16 %v2934_v55, %v2933_v53 }
0x13c8   : > { %3828 = vmatmul.mubr.bf16.vlgmr.msra.gmra.mrb[64].mxu0 %v2935_v57 }
0x149b   : > { %v3024_v44 = vpop.f32.mrb[64].mxu0 }
0x149c   : > { %v3025_v10 = vadd.f32 %v3438_v2, %v3024_v44  ;;  %v3829_v14 = vpop.f32.mrb[65].mxu0 }
0x149d   : > { %v3027_v17 = vpop.f32.mrb[66].mxu0 }
0x149e   : > { %v3028_v8 = vadd.f32 %v3438_v2, %v3027_v17  ;;  %v3830_v20 = vpop.f32.mrb[67].mxu0  ;;  %v3031_v24 = vadd.f32 %v3025_v10, %v4932_v48 }
0x14a0   : > { %v3032_v52 = vadd.f32 %v3028_v8, %v4935_v32  ;;  %v5128_v32 = vld [vmem:[#allocation4_spill] sm:$0xff] }
0x14a2   : > { %v3033_v0 = vpack.c.bf16 %v3032_v52, %v3031_v24 }
0x14a4   : > { %3836 = vmatmul.mubr.msk.bf16.vlgmr.msra.gmra.mrb[52].mxu1 %vm779_vm4, %v3033_v0 }
0x14a5   : > { %3843 = vmatprep.mubr.msk.bf16.mxu1 %vm4075_vm5, %v5123_v35  ;;  %3840 = vmatpush3.bf16.msra.mxu1 %v3982_v21 }
0x14a6   : > { %3841 = vmatprep.subr.bf16.mxu1 %v5123_v35 }
0x14a9   : > { %3842 = vmatpush3.bf16.msra.mxu1 %v3983_v25 }
0x14aa   : > { %3847 = vmatprep.subr.bf16.mxu1 %v5123_v35 }
0x1577   : > { %v3089_v16 = vpop.f32.mrb[52].mxu1 }
0x1578   : > { %v3090_v62 = vadd.f32 %v3447_v11, %v3089_v16  ;;  %v3837_v61 = vpop.f32.mrb[53].mxu1 }
0x1579   : > { %v3092_v39 = vpop.f32.mrb[54].mxu1 }
0x157a   : > { %v5019_v4 = vadd.f32 %v3090_v62, %v5127_v30  ;;  %v3093_v48 = vadd.f32 %v3447_v11, %v3092_v39  ;;  %v3838_v37 = vpop.f32.mrb[55].mxu1  ;;  %v3457_v11 = vld [vmem:[%s5094_s19] ss:$0 sm:$0xff] }
0x157c   : > { %v5022_v43 = vadd.f32 %v3093_v48, %v5128_v32  ;;  %v3098_v50 = vsel %vm779_vm4, %v5019_v4, 0.0 }
0x157d   : > { %3099 = vadd.xlane.f32.xlu0 %v3098_v50 }
0x157e   : > { %v3101_v46 = vsel %vm779_vm4, %v5022_v43, 0.0 }
0x157f   : > { %3102 = vadd.xlane.f32.xlu1 %v3101_v46 }
0x160a   : > { %v3100_v26 = vpop.xlane.xlu0 %3099 }
0x160b   : > { %v3104_v59 = vmul.f32 0.03125, %v3100_v26 }
0x160c   : > { %v3103_v51 = vpop.xlane.xlu1 %3102 }
0x160d   : > { %v3106_v9 = vsub.f32 %v5019_v4, %v3104_v59  ;;  %v3105_v22 = vmul.f32 0.03125, %v3103_v51 }
0x160f   : > { %v3107_v56 = vsub.f32 %v5022_v43, %v3105_v22  ;;  %v3108_v60 = vmul.f32 %v3106_v9, %v3106_v9 }
0x1611   : > { %v3110_v13 = vsel %vm779_vm4, %v3108_v60, 0.0  ;;  %v3109_v3 = vmul.f32 %v3107_v56, %v3107_v56 }
0x1612   : > { %3111 = vadd.xlane.f32.xlu0 %v3110_v13 }
0x1613   : > { %v3113_v19 = vsel %vm779_vm4, %v3109_v3, 0.0 }
0x1614   : > { %3114 = vadd.xlane.f32.xlu1 %v3113_v19 }
0x169f   : > { %v3112_v28 = vpop.xlane.xlu0 %3111 }
0x16a0   : > { %v3116_v23 = vmul.f32 0.03125, %v3112_v28 }
0x16a1   : > { %v3115_v27 = vpop.xlane.xlu1 %3114 }
0x16a2   : > { %v3118_v33 = vadd.f32 1e-05, %v3116_v23  ;;  %v3117_v36 = vmul.f32 0.03125, %v3115_v27 }
0x16a4   : > { %4050 = vrsqrt.f32 %v3118_v33  ;;  %v3119_v45 = vadd.f32 1e-05, %v3117_v36 }
0x16a6   : > { %4052 = vrsqrt.f32 %v3119_v45 }
0x16ae   : > { %v4051_v18 = vpop.eup %4050 }
0x16af   : > { %v3122_v29 = vmul.f32 %v4051_v18, %v3106_v9 }
0x16b0   : > { %v4053_v31 = vpop.eup %4052 }
0x16b1   : > { %v3128_v42 = vmul.f32 %v3127_v54, %v3122_v29  ;;  %v3123_v41 = vmul.f32 %v4053_v31, %v3107_v56 }
0x16b3   : > { %v3129_v6 = vmul.f32 %v3127_v54, %v3123_v41  ;;  %v3134_v34 = vadd.f32 %v3133_v58, %v3128_v42 }
0x16b5   : > { %v3135_v38 = vadd.f32 %v3133_v58, %v3129_v6 }
0x16b7   : > { %v3136_v40 = vpack.c.bf16 %v3135_v38, %v3134_v34 }
0x16b9   : > { %3844 = vmatmul.mubr.msk.bf16.vlgmr.msra.gmra.mrb[56].mxu1 %vm779_vm4, %v3136_v40 }
0x16ba   : > { %3851 = vmatprep.mubr.msk.bf16.mxu1 %vm4075_vm5, %v5123_v35  ;;  %3848 = vmatpush3.bf16.msra.mxu1 %v3984_v5 }
0x16bb   : > { %3849 = vmatprep.subr.bf16.mxu1 %v5123_v35 }
0x16be   : > { %3850 = vmatpush3.bf16.msra.mxu1 %v3985_v12 }
0x178c   : > { %v3192_v49 = vpop.f32.mrb[56].mxu1 }
0x178d   : > { %v3193_v53 = vadd.f32 %v3451_v47, %v3192_v49  ;;  %v3845_v55 = vpop.f32.mrb[57].mxu1 }
0x178e   : > { %v3195_v57 = vpop.f32.mrb[58].mxu1 }
0x178f   : > { %v3455_v63 = vmul.f32 -1.442695, %v3193_v53  ;;  %v3196_v1 = vadd.f32 %v3451_v47, %v3195_v57  ;;  %v3846_v2 = vpop.f32.mrb[59].mxu1 }
0x1791   : > { %4054 = vpow2.f32 %v3455_v63  ;;  %v3456_v44 = vmul.f32 -1.442695, %v3196_v1 }
0x1793   : > { %4056 = vpow2.f32 %v3456_v44 }
0x179b   : > { %v4055_v35 = vpop.eup %4054 }
0x179c   : > { %v3205_v10 = vadd.f32 1.0, %v4055_v35 }
0x179d   : > { %v4057_v14 = vpop.eup %4056 }
0x179e   : > { %4058 = vrcp.f32 %v3205_v10  ;;  %v3206_v17 = vadd.f32 1.0, %v4057_v14 }
0x17a0   : > { %4060 = vrcp.f32 %v3206_v17 }
0x17a8   : > { %v4059_v8 = vpop.eup %4058 }
0x17a9   : > { %v3211_v24 = vmul.f32 %v4059_v8, %v3193_v53 }
0x17aa   : > { %v4061_v20 = vpop.eup %4060 }
0x17ab   : > { %v3212_v52 = vmul.f32 %v4061_v20, %v3196_v1 }
0x17ad   : > { %v3213_v0 = vpack.c.bf16 %v3212_v52, %v3211_v24 }
0x17af   : > { %3852 = vmatmul.mubr.msk.bf16.vlgmr.msra.gmra.mrb[60].mxu1 %vm779_vm4, %v3213_v0 }
0x1882   : > { %v3269_v16 = vpop.f32.mrb[60].mxu1 }
0x1883   : > { %v3270_v62 = vadd.f32 %v3457_v11, %v3269_v16  ;;  %v3853_v61 = vpop.f32.mrb[61].mxu1 }
0x1884   : > { %v3272_v39 = vpop.f32.mrb[62].mxu1 }
0x1885   : > { %v3276_v30 = vadd.f32 %v3270_v62, %v5019_v4  ;;  %v3273_v48 = vadd.f32 %v3457_v11, %v3272_v39  ;;  %v3854_v37 = vpop.f32.mrb[63].mxu1 }
0x1887   : > { %v3280_v32 = vrot.slane %v3276_v30, 7  ;;  %v3277_v50 = vadd.f32 %v3273_v48, %v5022_v43 }
0x1889   : > { %v3286_v46 = vsel %vm637_vm1, 0.0, %v3280_v32  ;;  %v3281_v26 = vrot.slane %v3277_v50, 7 }
0x188a   : > { %3288 = vst.msk [vmem:[%s623_s0] sm:$0xff] %vm779_vm4, %v3286_v46 }
0x188b   : > { %v3282_v59 = vsel %vm637_vm1, %v3280_v32, %v3281_v26  ;;  %v3287_v51 = vsel %vm637_vm1, %v3281_v26, 0.0 }
0x188c   : > { %3289 = vst.msk [vmem:[%s623_s0 + $0x8] sm:$0xff] %vm779_vm4, %v3282_v59 }
0x188d   : > { %3291 = vst.msk [vmem:[%s623_s0 + $0x10] sm:$0x3] %vm3290_vm9, %v3287_v51 }
0x188e PF: > { %s30_s1 = sadd.s32 1, %s4069_s1  }
0x188f   : > { %p27_p4 = scmp.ge.s32.totalorder %s30_s1, 10  }
0x1891   :  { %29 = sbr.rel (!%p27_p4) target bundleno = 6 (0x6), region = 130 }

// kernel: scfe_block_linformer.4
= control target key start
LH: loop header
LB: loop body
LE: loop exit
PB: predicated region body
PF: predicated region fallthrough
CT: control target
= control target key end

     0   :  { %s5009_s0 = inlined_call_operand.vmem [shape: f32[8,18,32], index: 0, kind: input, shape index: {}]   ;;  %s5010_s1 = inlined_call_operand.vmem [shape: bf16[96,64], index: 1, kind: input, shape index: {}]   ;;  %s5011_s2 = inlined_call_operand.vmem [shape: f32[1,64], index: 2, kind: input, shape index: {}]   ;;  %s5012_s3 = inlined_call_operand.vmem [shape: f32[8,16], index: 3, kind: input, shape index: {}]   ;;  %s5013_s4 = inlined_call_operand.vmem [shape: f32[8,64], index: 4, kind: input, shape index: {}]   ;;  %s5014_s5 = inlined_call_operand.vmem [shape: bf16[64,192], index: 5, kind: input, shape index: {}]   ;;  %s5015_s6 = inlined_call_operand.vmem [shape: bf16[256,8], index: 6, kind: input, shape index: {}]   ;;  %s5016_s7 = inlined_call_operand.vmem [shape: bf16[256,8], index: 7, kind: input, shape index: {}]   ;;  %s5017_s8 = inlined_call_operand.vmem [shape: bf16[64,64], index: 8, kind: input, shape index: {}]   ;;  %s5018_s9 = inlined_call_operand.vmem [shape: f32[1,64], index: 9, kind: input, shape index: {}]   ;;  %s5019_s10 = inlined_call_operand.vmem [shape: bf16[64,256], index: 10, kind: input, shape index: {}]   ;;  %s5020_s11 = inlined_call_operand.vmem [shape: f32[1,256], index: 11, kind: input, shape index: {}]   ;;  %s5021_s12 = inlined_call_operand.vmem [shape: bf16[256,64], index: 12, kind: input, shape index: {}]   ;;  %s5022_s13 = inlined_call_operand.vmem [shape: f32[1,64], index: 13, kind: input, shape index: {}]   ;;  %s5023_s14 = inlined_call_operand.vmem [shape: bf16[64,64], index: 14, kind: input, shape index: {}]   ;;  %s5024_s15 = inlined_call_operand.vmem [shape: f32[1,64], index: 15, kind: input, shape index: {}]   ;;  %s5025_s16 = inlined_call_operand.vmem [shape: bf16[64,64], index: 16, kind: input, shape index: {}]   ;;  %s5026_s17 = inlined_call_operand.vmem [shape: f32[1,64], index: 17, kind: input, shape index: {}]   ;;  %s5027_s18 = inlined_call_operand.vmem [shape: bf16[64,64], index: 18, kind: input, shape index: {}]   ;;  %s5028_s19 = inlined_call_operand.vmem [shape: f32[1,64], index: 19, kind: input, shape index: {}]   ;;  %s5029_s20 = inlined_call_operand.vmem [shape: f32[8,10,64], index: 20, kind: output, shape index: {}]  }
   0x1   :  { %5032 = sst [smem:[#allocation2_spill]] %s5009_s0 }
   0x2   :  { %5033 = sst [smem:[#allocation3_spill]] %s5010_s1  ;;  %s4175_s1 = smov 0  }
   0x3   :  { %5034 = sst [smem:[#allocation4_spill]] %s5011_s2 }
   0x4   :  { %5035 = sst [smem:[#allocation5_spill]] %s5012_s3 }
   0x5   :  { %5036 = sst [smem:[#allocation6_spill]] %s5013_s4 }
   0x6 LB: > { %s3316_s22 = sadd.s32 4294967295, %s4057_s1   ;;  %p3320_p0 = scmp.ge.s32.totalorder %s4057_s1, 1  ;;  %s4057_s1 = sphi %s4175_s1, %s30_s1  }
   0x7   : > { %p562_p1 = scmp.lt.s32.totalorder %s4057_s1, 9 }
   0x9   : > { %p563_p2 = pnand %p3320_p0, %p562_p1 }
   0xa   : > { %p620_p3 = scmp.lt.s32.totalorder (!%p563_p2), %s3316_s22, 7  ;;  %s5037_s2 = sld [smem:[#allocation3_spill]] (!%p563_p2)  ;;  %v4059_v1 = vmov (!%p563_p2), 0.0   ;;  %vm637_vm0 = vcmask (!%p563_p2), 1046528   ;;  %vm649_vm1 = vcmask (!%p563_p2), 1045504   ;;  %vm4060_vm2 = vmmov (!%p563_p2), 0  }
   0xb   : > { %566 = sbr.rel (%p563_p2) target bundleno = 6029 (0x178d), region = 100  ;;  %3710 = vmatprep.subr.bf16.mxu0 (!%p563_p2), %v4059_v1  ;;  %s5038_s30 = sld [smem:[#allocation2_spill]] (!%p563_p2)  ;;  %3722 = vmatprep.mubr.msk.bf16.mxu0 (!%p563_p2), %vm4060_vm2, %v4059_v1  ;;  %vm661_vm3 = vcmask (!%p563_p2), 261120   ;;  %vm664_vm4 = vcmask (!%p563_p2), 523264   ;;  %vm723_vm5 = vcmask (!%p563_p2), 785408   ;;  %v4063_v33 = vmov (!%p563_p2), 0.0|0.0  }
   0xc   : > { %s4061_s3 = smov (!%p563_p2), 32   ;;  %s4062_s28 = smov (!%p563_p2), 64   ;;  %vm771_vm6 = vcmask (!%p563_p2), 130048   ;;  %v1010_v55 = vlaneseq (!%p563_p2)  ;;  %vm1213_vm7 = vcmask (!%p563_p2), 64512   ;;  %vm1262_vm8 = vcmask (!%p563_p2), 1043456  }
   0xd   : > { %s5040_s23 = sld [smem:[#allocation5_spill]] (!%p563_p2)  ;;  %s4065_s27 = smov (!%p563_p2), 112   ;;  %vm2639_vm9 = vcmask (!%p563_p2), 392192   ;;  %vm3255_vm10 = vcmask (!%p563_p2), 1040384   ;;  %vm3259_vm11 = vcmask (!%p563_p2), 517120  }
   0xe   : > { %v4238_v57 = vshrl.u32 (!%p563_p2), %v1010_v55, 7  ;;  %v3948_v55 = vld [vmem:[%s5015_s6 + $0x70] sm:$0xff] (!%p563_p2)   ;;  %s4066_s21 = smov (!%p563_p2), 96  }
  0x10   : > { %v3916_v0 = vld [vmem:[%s5037_s2] sm:$0xff] (!%p563_p2)   ;;  %v3917_v2 = vld [vmem:[%s5037_s2 + $0x8] sm:$0xff] (!%p563_p2)   ;;  %v3918_v3 = vld [vmem:[%s5037_s2 + $0x10] sm:$0xff] (!%p563_p2)   ;;  %v1012_v58 = vsub.s32 (!%p563_p2), 0, %v4238_v57  ;;  %v1017_v60 = vsub.s32 (!%p563_p2), 1, %v4238_v57 }
  0x11   : > { %3711 = vmatpush3.bf16.msra.mxu0 (!%p563_p2), %v3916_v0  ;;  %v3919_v13 = vld [vmem:[%s5037_s2 + $0x18] sm:$0xff] (!%p563_p2)   ;;  %v3920_v19 = vld [vmem:[%s5037_s2 + $0x20] sm:$0xff] (!%p563_p2)   ;;  %v3921_v21 = vld [vmem:[%s5037_s2 + $0x28] sm:$0xff] (!%p563_p2)  }
  0x12   : > { %s5043_s22 = smov (!%p620_p3, %s3316_s22), 7  ;;  %3712 = vmatprep.subr.bf16.mxu0 %v4059_v1 }
  0x13   : > { %s3886_s26 = smul.u32 24, %s5043_s22  ;;  %v770_v44 = vld [vmem:[%s5040_s23] sm:$0xff]  ;;  %s4068_s23 = smov 16  }
  0x15   : > { %s624_s0 = scalar_lea.vmem %s5038_s30, %s3886_s26  ;;  %3713 = vmatpush3.bf16.msra.mxu0 %v3917_v2  ;;  %s5039_s30 = sld [smem:[#allocation4_spill]] }
  0x16   : > { %v631_v4 = vld [vmem:[%s624_s0] sm:$0xff]  ;;  %v632_v5 = vld [vmem:[%s624_s0 + $0x8] sm:$0xff]  ;;  %v633_v6 = vld [vmem:[%s624_s0 + $0x10] sm:$0x3]  ;;  %3714 = vmatprep.subr.bf16.mxu0 %v4059_v1  ;;  %s5041_s26 = sld [smem:[#allocation6_spill]]  ;;  %s3463_s0 = sshll.u32 %s5043_s22, 4 }
  0x17   : > { %v638_v7 = vrot.slane %v631_v4, 1  ;;  %v639_v8 = vrot.slane %v632_v5, 1  ;;  %v641_v9 = vrot.slane %v633_v6, 1  ;;  %v653_v10 = vrot.slane %v633_v6, 2 }
  0x18   : > { %v650_v11 = vrot.slane %v631_v4, 2  ;;  %v651_v12 = vrot.slane %v632_v5, 2 }
  0x19   : > { %v640_v14 = vsel %vm637_vm0, %v638_v7, %v639_v8  ;;  %v642_v15 = vsel %vm637_vm0, %v639_v8, %v641_v9  ;;  %3715 = vmatpush3.bf16.msra.mxu0 %v3918_v3 }
  0x1a   : > { %v3906_v16 = vpack.i.bf16 %v642_v15, %v640_v14  ;;  %v652_v17 = vsel %vm649_vm1, %v650_v11, %v651_v12  ;;  %v654_v18 = vsel %vm649_vm1, %v651_v12, %v653_v10  ;;  %3716 = vmatprep.subr.bf16.mxu0 %v4059_v1  ;;  %v3922_v10 = vld [vmem:[%s5014_s5 + $0x4] ss:$8 sps:$4 sm:$0xff]   ;;  %v3924_v11 = vld [vmem:[%s5014_s5] ss:$8 sps:$4 sm:$0xff]   ;;  %v3925_v12 = vld [vmem:[%s5014_s5 + $0x14] ss:$8 sps:$4 sm:$0xff]  }
  0x1b   : > { %v3911_v20 = vpack.i.bf16 %v654_v18, %v652_v17  ;;  %v3324_v34 = vld [vmem:[%s5039_s30] ss:$0 sm:$0xff]  ;;  %1087 = vmatprep.subr.bf16.mxu1 %v3922_v10  ;;  %v4064_v14 = vmov 0   ;;  %v3928_v15 = vld [vmem:[%s5014_s5 + $0x24] ss:$8 sps:$4 sm:$0xff]  }
  0x1c   : > { %3907 = vrot.lane.b32.xlu0 %v3906_v16, %s4061_s3  ;;  %v845_v59 = vld [vmem:[%s5041_s26] sm:$0xff]  ;;  %1088 = vmatpush1.bf16.msra.mxu1 %v3924_v11  ;;  %v3931_v17 = vld [vmem:[%s5014_s5 + $0x34] ss:$8 sps:$4 sm:$0xff]   ;;  %v3933_v18 = vld [vmem:[%s5014_s5 + $0x30] ss:$8 sps:$4 sm:$0xff]  }
  0x1d   : > { %3717 = vmatpush3.bf16.msra.mxu0 %v3919_v13  ;;  %v1013_v61 = vrot.slane %v845_v59, %v1012_v58  ;;  %v1018_v0 = vrot.slane %v845_v59, %v1017_v60  ;;  %v3927_v13 = vld [vmem:[%s5014_s5 + $0x10] ss:$8 sps:$4 sm:$0xff]   ;;  %1119 = vmatprep.mubr.bf16.mxu1 %v4064_v14  ;;  %v3930_v16 = vld [vmem:[%s5014_s5 + $0x20] ss:$8 sps:$4 sm:$0xff]  }
  0x1e   : > { %3718 = vmatprep.subr.bf16.mxu0 %v4059_v1  ;;  %1089 = vmatprep.subr.bf16.mxu1 %v3925_v12 }
  0x20   : > { %3912 = vrot.lane.b32.xlu0 %v3911_v20, %s4062_s28  ;;  %1090 = vmatpush1.bf16.msra.mxu1 %v3927_v13 }
  0x21   : > { %3719 = vmatpush3.bf16.msra.mxu0 %v3920_v19  ;;  %1091 = vmatprep.subr.bf16.mxu1 %v3928_v15 }
  0x22   : > { %3720 = vmatprep.subr.bf16.mxu0 %v4059_v1 }
  0x24   : > { %1092 = vmatpush1.bf16.msra.mxu1 %v3930_v16 }
  0x25   : > { %3721 = vmatpush3.bf16.msra.mxu0 %v3921_v21  ;;  %1093 = vmatprep.subr.bf16.mxu1 %v3931_v17 }
  0x26   : > { %3849 = vmatprep.subr.bf16.mxu0 %v4063_v33 }
  0x28   : > { %1094 = vmatpush1.bf16.msra.mxu1 %v3933_v18 }
  0x8e   : > { %v3908_v22 = vpop.permute.xlu0 %3907 }
  0x8f   : > { %v3910_v23 = vunpack.i.h.bf16 %v3908_v22  ;;  %v3909_v24 = vunpack.i.l.bf16 %v3908_v22  ;;  %v1035_v22 = vsub.s32 2, %v4238_v57 }
  0x91   : > { %v663_v28 = vsel %vm661_vm3, %v632_v5, %v3910_v23  ;;  %v662_v29 = vsel %vm661_vm3, %v631_v4, %v3909_v24  ;;  %v1040_v23 = vsub.s32 3, %v4238_v57  ;;  %v1036_v24 = vrot.slane %v845_v59, %v1035_v22 }
  0x92   : > { %v3913_v25 = vpop.permute.xlu0 %3912 }
  0x93   : > { %v3915_v26 = vunpack.i.h.bf16 %v3913_v25  ;;  %v3914_v27 = vunpack.i.l.bf16 %v3913_v25 }
  0x95   : > { %v665_v30 = vsel %vm664_vm4, %v662_v29, %v3914_v27  ;;  %v666_v31 = vsel %vm664_vm4, %v663_v28, %v3915_v26  ;;  %v1041_v27 = vrot.slane %v845_v59, %v1040_v23 }
  0x96   : > { %v667_v32 = vpack.c.bf16 %v666_v31, %v665_v30  ;;  %v3934_v31 = vld [vmem:[%s5015_s6] sm:$0xff]  }
  0x98   : > { %3723 = vmatmul.mubr.msk.bf16.vlgmr.msra.gmra.mrb[0].mxu0 %vm723_vm5, %v667_v32 }
  0x99   : > { %3730 = vmatprep.mubr.msk.f32.mxu0 %vm4060_vm2, %v4059_v1 }
 0x16b   : > { %v761_v35 = vpop.f32.mrb[0].mxu0 }
 0x16c   : > { %v762_v36 = vadd.f32 %v3324_v34, %v761_v35  ;;  %v3724_v37 = vpop.f32.mrb[1].mxu0 }
 0x16d   : > { %v764_v38 = vpop.f32.mrb[2].mxu0 }
 0x16e   : > { %v765_v39 = vadd.f32 %v3324_v34, %v764_v38  ;;  %v3725_v40 = vpop.f32.mrb[3].mxu0  ;;  %v768_v41 = vmax.f32 %v762_v36, 0.0 }
 0x170   : > { %v769_v42 = vmax.f32 %v765_v39, 0.0 }
 0x172   : > { %v3850_v43 = vpack.c.bf16 %v769_v42, %v768_v41  ;;  %v3935_v41 = vld [vmem:[%s5015_s6 + $0x8] sm:$0xff]   ;;  %v3936_v42 = vld [vmem:[%s5015_s6 + $0x10] sm:$0xff]  }
 0x174   : > { %3851 = vmatpush3.bf16.msra.mxu0 %v3850_v43  ;;  %v3937_v43 = vld [vmem:[%s5015_s6 + $0x18] sm:$0xff]  }
 0x177   : > { %3731 = vmatmul.mubr.msk.f32.vlgmr.msra.gmra.mrb[4].mxu0 %vm771_vm6, %v770_v44  ;;  %v3938_v44 = vld [vmem:[%s5015_s6 + $0x20] sm:$0xff]  }
 0x24a   : > { %v4232_v45 = vpop.f32.mrb[4].mxu0 }
 0x24b   : > { %v3732_v46 = vpop.f32.mrb[5].mxu0  ;;  %v996_v47 = vsel %vm664_vm4, %v4232_v45, 0.0 }
 0x24c   : > { %997 = vadd.xlane.f32.xlu1 %v996_v47  ;;  %v3939_v46 = vld [vmem:[%s5015_s6 + $0x28] sm:$0xff]   ;;  %v3940_v47 = vld [vmem:[%s5015_s6 + $0x30] sm:$0xff]  }
 0x2d9   : > { %v998_v48 = vpop.xlane.xlu1 %997 }
 0x2da   : > { %v1000_v49 = vmul.f32 0.015625, %v998_v48  ;;  %v3941_v48 = vld [vmem:[%s5015_s6 + $0x38] sm:$0xff]  }
 0x2dc   : > { %v1001_v50 = vsub.f32 %v4232_v45, %v1000_v49  ;;  %v3942_v49 = vld [vmem:[%s5015_s6 + $0x40] sm:$0xff]  }
 0x2de   : > { %v1002_v51 = vmul.f32 %v1001_v50, %v1001_v50 }
 0x2e0   : > { %v1003_v52 = vsel %vm664_vm4, %v1002_v51, 0.0  ;;  %v3944_v51 = vld [vmem:[%s5015_s6 + $0x50] sm:$0xff]  }
 0x2e1   : > { %1004 = vadd.xlane.f32.xlu1 %v1003_v52  ;;  %v3945_v52 = vld [vmem:[%s5015_s6 + $0x58] sm:$0xff]  }
 0x36e   : > { %v1005_v53 = vpop.xlane.xlu1 %1004 }
 0x36f   : > { %v1006_v54 = vmul.f32 0.015625, %v1005_v53  ;;  %v3946_v53 = vld [vmem:[%s5015_s6 + $0x60] sm:$0xff]  }
 0x371   : > { %v1007_v56 = vadd.f32 1e-05, %v1006_v54  ;;  %v3947_v54 = vld [vmem:[%s5015_s6 + $0x68] sm:$0xff]  }
 0x373   : > { %4010 = vrsqrt.f32 %v1007_v56  ;;  %v3949_v56 = vld [vmem:[%s5015_s6 + $0x78] sm:$0xff]  }
 0x37d   : > { %v4011_v62 = vpop.eup %4010 }
 0x37e   : > { %v1009_v63 = vmul.f32 %v4011_v62, %v1001_v50  ;;  %v3943_v50 = vld [vmem:[%s5015_s6 + $0x48] sm:$0xff]  }
 0x380   : > { %v1014_v2 = vmul.f32 %v1013_v61, %v1009_v63 }
 0x382   : > { %v4249_v3 = vadd.f32 %v1018_v0, %v1014_v2 }
 0x384   : > { %v1020_v4 = vsel %vm664_vm4, %v4249_v3, 0.0 }
 0x385   : > { %1021 = vadd.xlane.f32.xlu0 %v1020_v4 }
 0x412   : > { %v1022_v5 = vpop.xlane.xlu0 %1021 }
 0x413   : > { %v1023_v6 = vmul.f32 0.015625, %v1022_v5 }
 0x415   : > { %v1024_v7 = vsub.f32 %v4249_v3, %v1023_v6 }
 0x417   : > { %v1025_v8 = vmul.f32 %v1024_v7, %v1024_v7 }
 0x419   : > { %v1026_v9 = vsel %vm664_vm4, %v1025_v8, 0.0 }
 0x41a   : > { %1027 = vadd.xlane.f32.xlu1 %v1026_v9 }
 0x4a7   : > { %v1028_v19 = vpop.xlane.xlu1 %1027 }
 0x4a8   : > { %v1029_v20 = vmul.f32 0.015625, %v1028_v19 }
 0x4aa   : > { %v1030_v21 = vadd.f32 1e-05, %v1029_v20 }
 0x4ac   : > { %4012 = vrsqrt.f32 %v1030_v21 }
 0x4b6   : > { %v4013_v25 = vpop.eup %4012 }
 0x4b7   : > { %v1032_v26 = vmul.f32 %v4013_v25, %v1024_v7 }
 0x4b9   : > { %v1037_v28 = vmul.f32 %v1036_v24, %v1032_v26 }
 0x4bb   : > { %v1042_v29 = vadd.f32 %v1041_v27, %v1037_v28 }
 0x4bd   : > { %v1043_v30 = vpack.c.bf16 %v1042_v29, %v1042_v29 }
 0x4bf   : > { %3341 = vmatmul.mubr.msk.bf16.vlgmr.msra.gmra.mrb[0].mxu1 %vm664_vm4, %v1043_v30 }
 0x4c0   : > { %3735 = vmatprep.mubr.msk.bf16.mxu1 %vm1213_vm7, %v3934_v31 }
 0x592   : > { %v1121_v32 = vpop.f32.mrb[0].mxu1 }
 0x593   : > { %v4287_v33 = vpack.c.bf16 %v1121_v32, %v1121_v32  ;;  %v1123_v34 = vpop.f32.mrb[1].mxu1 }
 0x594   : > { %v1129_v35 = vpack.c.bf16 %v1123_v34, %v1123_v34  ;;  %v1125_v36 = vpop.f32.mrb[2].mxu1 }
 0x595   : > { %1211 = vrot.lane.b32.xlu1 %v4287_v33, %s4062_s28  ;;  %v1126_v37 = vpop.f32.mrb[3].mxu1 }
 0x596   : > { %v1572_v38 = vsel %vm1262_vm8, %v1129_v35, 0  ;;  %3853 = vmatprep.subr.msk.bf16.mxu0 %vm1262_vm8, %v1129_v35 }
 0x597   : > { %3768 = vmatpush3.bf16.msra.mxu0 %v1572_v38 }
 0x607   : > { %v1212_v39 = vpop.permute.xlu1 %1211 }
 0x608   : > { %3852 = vmatprep.subr.msk.bf16.mxu1 %vm1262_vm8, %v1212_v39  ;;  %v1264_v40 = vsel %vm1262_vm8, %v1212_v39, 0 }
 0x609   : > { %3734 = vmatpush3.bf16.msra.mxu1 %v1264_v40  ;;  %v3950_v40 = vld [vmem:[%s5016_s7] sm:$0xff]  }
 0x60a   : > { %3769 = vmatprep.mubr.msk.bf16.mxu0 %vm1213_vm7, %v3950_v40 }
 0x60c   : > { %3736 = vmatmul.mubr.msk.bf16.vlgmr.msra.gmra.mrb[4].mxu1 %vm1213_vm7, %v3935_v41 }
 0x60d   : > { %3739 = vmatprep.mubr.msk.bf16.mxu1 %vm1213_vm7, %v3936_v42  ;;  %v3951_v42 = vld [vmem:[%s5016_s7 + $0x8] sm:$0xff]  }
 0x60e   : > { %3770 = vmatmul.mubr.msk.bf16.vlgmr.msra.gmra.mrb[8].mxu0 %vm1213_vm7, %v3951_v42 }
 0x614   : > { %3740 = vmatmul.mubr.msk.bf16.gmra.mrb[8].mxu1 %vm1213_vm7, %v3937_v43 }
 0x615   : > { %3743 = vmatprep.mubr.msk.bf16.mxu1 %vm1213_vm7, %v3938_v44 }
 0x61c   : > { %3744 = vmatmul.mubr.msk.bf16.gmra.mrb[12].mxu1 %vm1213_vm7, %v3939_v46 }
 0x61d   : > { %3747 = vmatprep.mubr.msk.bf16.mxu1 %vm1213_vm7, %v3940_v47 }
 0x624   : > { %3748 = vmatmul.mubr.msk.bf16.gmra.mrb[16].mxu1 %vm1213_vm7, %v3941_v48 }
 0x625   : > { %3751 = vmatprep.mubr.msk.bf16.mxu1 %vm1213_vm7, %v3942_v49 }
 0x62c   : > { %3752 = vmatmul.mubr.msk.bf16.gmra.mrb[20].mxu1 %vm1213_vm7, %v3943_v50  ;;  %v3952_v50 = vld [vmem:[%s5016_s7 + $0x10] sm:$0xff]  }
 0x62d   : > { %3755 = vmatprep.mubr.msk.bf16.mxu1 %vm1213_vm7, %v3944_v51  ;;  %3773 = vmatprep.mubr.msk.bf16.mxu0 %vm1213_vm7, %v3952_v50 }
 0x634   : > { %3756 = vmatmul.mubr.msk.bf16.gmra.mrb[24].mxu1 %vm1213_vm7, %v3945_v52  ;;  %v3953_v52 = vld [vmem:[%s5016_s7 + $0x18] sm:$0xff]  }
 0x635   : > { %3759 = vmatprep.mubr.msk.bf16.mxu1 %vm1213_vm7, %v3946_v53  ;;  %3774 = vmatmul.mubr.msk.bf16.gmra.mrb[12].mxu0 %vm1213_vm7, %v3953_v52 }
 0x63c   : > { %3760 = vmatmul.mubr.msk.bf16.gmra.mrb[28].mxu1 %vm1213_vm7, %v3947_v54 }
 0x63d   : > { %3763 = vmatprep.mubr.msk.bf16.mxu1 %vm1213_vm7, %v3948_v55 }
 0x644   : > { %3764 = vmatmul.mubr.msk.bf16.gmra.mrb[32].mxu1 %vm1213_vm7, %v3949_v56 }
 0x645   : > { %3524 = vmatprep.mubr.msk.bf16.mxu1 %vm771_vm6, %v4287_v33 }
 0x6df   : > { %v3737_v59 = vpop.f32.mrb[4].mxu1 }
 0x6e0   : > { %v1300_v61 = vpop.f32.mrb[5].mxu1 }
 0x6e1   : > { %v3738_v62 = vpop.f32.mrb[6].mxu1 }
 0x6e2   : > { %v4353_v63 = vpack.c.bf16 %v3738_v62, %v3737_v59  ;;  %v1303_v0 = vpop.f32.mrb[7].mxu1  ;;  %v3954_v59 = vld [vmem:[%s5016_s7 + $0x20] sm:$0xff]  }
 0x6e3   : > { %v4355_v2 = vpack.c.bf16 %v1303_v0, %v1300_v61  ;;  %v3955_v61 = vld [vmem:[%s5016_s7 + $0x28] sm:$0xff]   ;;  %3777 = vmatprep.mubr.msk.bf16.mxu0 %vm1213_vm7, %v3954_v59  ;;  %v3956_v0 = vld [vmem:[%s5016_s7 + $0x30] sm:$0xff]  }
 0x6e4   : > { %v1758_v37 = vsel %vm771_vm6, %v4353_v63, 0  ;;  %3778 = vmatmul.mubr.msk.bf16.gmra.mrb[16].mxu0 %vm1213_vm7, %v3955_v61  ;;  %v3771_v61 = vpop.f32.mrb[8].mxu0 }
 0x6e5   : > { %1918 = vrot.lane.b32.xlu1 %v4355_v2, %s4065_s27  ;;  %v1755_v29 = vsel %vm771_vm6, %v4355_v2, 0  ;;  %3781 = vmatprep.mubr.msk.bf16.mxu0 %vm1213_vm7, %v3956_v0 }
 0x6e7   : > { %v3741_v4 = vpop.f32.mrb[8].mxu1 }
 0x6e8   : > { %v1316_v5 = vpop.f32.mrb[9].mxu1 }
 0x6e9   : > { %v3742_v6 = vpop.f32.mrb[10].mxu1 }
 0x6ea   : > { %v4359_v7 = vpack.c.bf16 %v3742_v6, %v3741_v4  ;;  %v1319_v8 = vpop.f32.mrb[11].mxu1  ;;  %v3957_v4 = vld [vmem:[%s5016_s7 + $0x38] sm:$0xff]   ;;  %v3958_v6 = vld [vmem:[%s5016_s7 + $0x40] sm:$0xff]  }
 0x6eb   : > { %v4361_v9 = vpack.c.bf16 %v1319_v8, %v1316_v5  ;;  %v3959_v8 = vld [vmem:[%s5016_s7 + $0x48] sm:$0xff]  }
 0x6ec   : > { %v1764_v56 = vsel %vm771_vm6, %v4359_v7, 0  ;;  %3782 = vmatmul.mubr.msk.bf16.gmra.mrb[20].mxu0 %vm1213_vm7, %v3957_v4 }
 0x6ed   : > { %v1761_v47 = vsel %vm771_vm6, %v4361_v9, 0  ;;  %3785 = vmatprep.mubr.msk.bf16.mxu0 %vm1213_vm7, %v3958_v6 }
 0x6ef   : > { %v3745_v10 = vpop.f32.mrb[12].mxu1 }
 0x6f0   : > { %v1332_v11 = vpop.f32.mrb[13].mxu1 }
 0x6f1   : > { %v3746_v12 = vpop.f32.mrb[14].mxu1 }
 0x6f2   : > { %v4363_v13 = vpack.c.bf16 %v3746_v12, %v3745_v10  ;;  %v1335_v15 = vpop.f32.mrb[15].mxu1  ;;  %v3961_v12 = vld [vmem:[%s5016_s7 + $0x58] sm:$0xff]  }
 0x6f3   : > { %v4365_v16 = vpack.c.bf16 %v1335_v15, %v1332_v11  ;;  %v3960_v11 = vld [vmem:[%s5016_s7 + $0x50] sm:$0xff]   ;;  %v3962_v15 = vld [vmem:[%s5016_s7 + $0x60] sm:$0xff]  }
 0x6f4   : > { %v1770_v5 = vsel %vm771_vm6, %v4363_v13, 0  ;;  %3786 = vmatmul.mubr.msk.bf16.gmra.mrb[24].mxu0 %vm1213_vm7, %v3959_v8 }
 0x6f5   : > { %v1767_v62 = vsel %vm771_vm6, %v4365_v16, 0  ;;  %3789 = vmatprep.mubr.msk.bf16.mxu0 %vm1213_vm7, %v3960_v11 }
 0x6f7   : > { %v3749_v17 = vpop.f32.mrb[16].mxu1 }
 0x6f8   : > { %v1348_v18 = vpop.f32.mrb[17].mxu1 }
 0x6f9   : > { %v3750_v19 = vpop.f32.mrb[18].mxu1 }
 0x6fa   : > { %v4367_v20 = vpack.c.bf16 %v3750_v19, %v3749_v17  ;;  %v1351_v21 = vpop.f32.mrb[19].mxu1  ;;  %v3964_v19 = vld [vmem:[%s5016_s7 + $0x70] sm:$0xff]  }
 0x6fb   : > { %v4369_v22 = vpack.c.bf16 %v1351_v21, %v1348_v18  ;;  %v3963_v18 = vld [vmem:[%s5016_s7 + $0x68] sm:$0xff]   ;;  %v3965_v21 = vld [vmem:[%s5016_s7 + $0x78] sm:$0xff]  }
 0x6fc   : > { %3790 = vmatmul.mubr.msk.bf16.gmra.mrb[28].mxu0 %vm1213_vm7, %v3961_v12  ;;  %v1776_v17 = vsel %vm771_vm6, %v4367_v20, 0 }
 0x6fd   : > { %v1773_v10 = vsel %vm771_vm6, %v4369_v22, 0  ;;  %3793 = vmatprep.mubr.msk.bf16.mxu0 %vm1213_vm7, %v3962_v15 }
 0x6ff   : > { %v3753_v23 = vpop.f32.mrb[20].mxu1 }
 0x700   : > { %v1364_v24 = vpop.f32.mrb[21].mxu1 }
 0x701   : > { %v3754_v25 = vpop.f32.mrb[22].mxu1 }
 0x702   : > { %v4371_v26 = vpack.c.bf16 %v3754_v25, %v3753_v23  ;;  %v1367_v27 = vpop.f32.mrb[23].mxu1 }
 0x703   : > { %v4373_v28 = vpack.c.bf16 %v1367_v27, %v1364_v24 }
 0x704   : > { %1936 = vrot.lane.b32.xlu0 %v4371_v26, %s4065_s27  ;;  %3794 = vmatmul.mubr.msk.bf16.gmra.mrb[32].mxu0 %vm1213_vm7, %v3963_v18 }
 0x705   : > { %1934 = vrot.lane.b32.xlu1 %v4373_v28, %s4065_s27  ;;  %3854 = vmatprep.subr.msk.bf16.mxu1 %vm771_vm6, %v4373_v28 }
 0x706   : > { %3509 = vmatpush3.bf16.xpose.msra.mxu1 %v1755_v29  ;;  %3797 = vmatprep.mubr.msk.bf16.mxu0 %vm1213_vm7, %v3964_v19 }
 0x707   : > { %3855 = vmatprep.subr.msk.bf16.mxu1 %vm771_vm6, %v4371_v26  ;;  %v3757_v30 = vpop.f32.mrb[24].mxu1 }
 0x708   : > { %v1380_v31 = vpop.f32.mrb[25].mxu1 }
 0x709   : > { %1920 = vrot.lane.b32.xlu1 %v4353_v63, %s4065_s27  ;;  %v3758_v32 = vpop.f32.mrb[26].mxu1 }
 0x70a   : > { %v4387_v34 = vpack.c.bf16 %v3758_v32, %v3757_v30  ;;  %v1383_v35 = vpop.f32.mrb[27].mxu1 }
 0x70b   : > { %v4389_v36 = vpack.c.bf16 %v1383_v35, %v1380_v31 }
 0x70c   : > { %3798 = vmatmul.mubr.msk.bf16.gmra.mrb[36].mxu0 %vm1213_vm7, %v3965_v21 }
 0x70d   : > { %1922 = vrot.lane.b32.xlu1 %v4361_v9, %s4065_s27 }
 0x70e   : > { %3511 = vmatpush3.bf16.xpose.msra.mxu1 %v1758_v37 }
 0x70f   : > { %3856 = vmatprep.subr.msk.bf16.mxu1 %vm771_vm6, %v4389_v36  ;;  %v3761_v38 = vpop.f32.mrb[28].mxu1 }
 0x710   : > { %v1396_v39 = vpop.f32.mrb[29].mxu1 }
 0x711   : > { %1938 = vrot.lane.b32.xlu1 %v4389_v36, %s4065_s27  ;;  %v3762_v41 = vpop.f32.mrb[30].mxu1 }
 0x712   : > { %v4405_v43 = vpack.c.bf16 %v3762_v41, %v3761_v38  ;;  %v1399_v44 = vpop.f32.mrb[31].mxu1 }
 0x713   : > { %v4408_v46 = vpack.c.bf16 %v1399_v44, %v1396_v39 }
 0x715   : > { %1924 = vrot.lane.b32.xlu1 %v4359_v7, %s4065_s27  ;;  %1942 = vrot.lane.b32.xlu0 %v4408_v46, %s4065_s27 }
 0x716   : > { %3513 = vmatpush3.bf16.xpose.msra.mxu1 %v1761_v47 }
 0x717   : > { %3857 = vmatprep.subr.msk.bf16.mxu1 %vm771_vm6, %v4387_v34  ;;  %v3765_v48 = vpop.f32.mrb[32].mxu1 }
 0x718   : > { %v1412_v49 = vpop.f32.mrb[33].mxu1 }
 0x719   : > { %1940 = vrot.lane.b32.xlu1 %v4387_v34, %s4065_s27  ;;  %1944 = vrot.lane.b32.xlu0 %v4405_v43, %s4065_s27  ;;  %v3766_v51 = vpop.f32.mrb[34].mxu1 }
 0x71a   : > { %v4429_v53 = vpack.c.bf16 %v3766_v51, %v3765_v48  ;;  %v1415_v54 = vpop.f32.mrb[35].mxu1 }
 0x71b   : > { %v4432_v55 = vpack.c.bf16 %v1415_v54, %v1412_v49 }
 0x71d   : > { %1926 = vrot.lane.b32.xlu1 %v4365_v16, %s4065_s27  ;;  %1946 = vrot.lane.b32.xlu0 %v4432_v55, %s4065_s27 }
 0x71e   : > { %3515 = vmatpush3.bf16.xpose.msra.mxu1 %v1764_v56 }
 0x71f   : > { %3858 = vmatprep.subr.msk.bf16.mxu1 %vm771_vm6, %v4408_v46 }
 0x721   : > { %1928 = vrot.lane.b32.xlu1 %v4363_v13, %s4065_s27  ;;  %1948 = vrot.lane.b32.xlu0 %v4429_v53, %s4065_s27 }
 0x725   : > { %1930 = vrot.lane.b32.xlu1 %v4369_v22, %s4065_s27 }
 0x726   : > { %3517 = vmatpush3.bf16.xpose.msra.mxu1 %v1767_v62  ;;  %v1608_v62 = vpop.f32.mrb[9].mxu0 }
 0x727   : > { %3859 = vmatprep.subr.msk.bf16.mxu1 %vm771_vm6, %v4405_v43  ;;  %v3772_v0 = vpop.f32.mrb[10].mxu0 }
 0x728   : > { %v4535_v4 = vpack.c.bf16 %v3772_v0, %v3771_v61 }
 0x729   : > { %1932 = vrot.lane.b32.xlu1 %v4367_v20, %s4065_s27 }
 0x72d   : > { %1900 = vrot.lane.b32.xlu1 %v4287_v33, %s4065_s27 }
 0x72e   : > { %3519 = vmatpush3.bf16.xpose.msra.mxu1 %v1770_v5  ;;  %v1611_v5 = vpop.f32.mrb[11].mxu0 }
 0x72f   : > { %3860 = vmatprep.subr.msk.bf16.mxu1 %vm771_vm6, %v4432_v55  ;;  %v4537_v6 = vpack.c.bf16 %v1611_v5, %v1608_v62  ;;  %v3775_v8 = vpop.f32.mrb[12].mxu0 }
 0x736   : > { %3521 = vmatpush3.bf16.xpose.msra.mxu1 %v1773_v10  ;;  %v1624_v10 = vpop.f32.mrb[13].mxu0 }
 0x737   : > { %3861 = vmatprep.subr.msk.bf16.mxu1 %vm771_vm6, %v4429_v53  ;;  %v3776_v11 = vpop.f32.mrb[14].mxu0 }
 0x738   : > { %v4539_v12 = vpack.c.bf16 %v3776_v11, %v3775_v8  ;;  %v1627_v15 = vpop.f32.mrb[15].mxu0 }
 0x73e   : > { %3523 = vmatpush3.bf16.xpose.msra.mxu1 %v1776_v17  ;;  %v4541_v17 = vpack.c.bf16 %v1627_v15, %v1624_v10 }
 0x745   : > { %3525 = vmatmul.mubr.msk.bf16.vlgmr.msra.gmra.mrb[36].mxu1 %vm771_vm6, %v4287_v33 }
 0x757   : > { %v1919_v23 = vpop.permute.xlu1 %1918 }
 0x758   : > { %v1954_v25 = vsel %vm771_vm6, %v1919_v23, 0 }
 0x776   : > { %v1937_v27 = vpop.permute.xlu0 %1936 }
 0x777   : > { %v1935_v24 = vpop.permute.xlu1 %1934 }
 0x778   : > { %3862 = vmatprep.subr.msk.bf16.mxu1 %vm771_vm6, %v1935_v24 }
 0x779   : > { %3549 = vmatpush3.bf16.xpose.msra.mxu1 %v1954_v25 }
 0x77a   : > { %3863 = vmatprep.subr.msk.bf16.mxu1 %vm771_vm6, %v1937_v27 }
 0x77b   : > { %v1921_v29 = vpop.permute.xlu1 %1920 }
 0x77c   : > { %v1957_v31 = vsel %vm771_vm6, %v1921_v29, 0 }
 0x77f   : > { %v1923_v30 = vpop.permute.xlu1 %1922 }
 0x780   : > { %v1960_v37 = vsel %vm771_vm6, %v1923_v30, 0 }
 0x781   : > { %3551 = vmatpush3.bf16.xpose.msra.mxu1 %v1957_v31 }
 0x783   : > { %v1939_v32 = vpop.permute.xlu1 %1938 }
 0x784   : > { %3864 = vmatprep.subr.msk.bf16.mxu1 %vm771_vm6, %v1939_v32 }
 0x787   : > { %v1925_v35 = vpop.permute.xlu1 %1924  ;;  %v1943_v41 = vpop.permute.xlu0 %1942 }
 0x788   : > { %v1963_v40 = vsel %vm771_vm6, %v1925_v35, 0 }
 0x789   : > { %3553 = vmatpush3.bf16.xpose.msra.mxu1 %v1960_v37 }
 0x78b   : > { %v1941_v38 = vpop.permute.xlu1 %1940  ;;  %v1945_v48 = vpop.permute.xlu0 %1944 }
 0x78c   : > { %3865 = vmatprep.subr.msk.bf16.mxu1 %vm771_vm6, %v1941_v38 }
 0x78f   : > { %v1927_v39 = vpop.permute.xlu1 %1926  ;;  %v1947_v52 = vpop.permute.xlu0 %1946 }
 0x790   : > { %v1966_v47 = vsel %vm771_vm6, %v1927_v39, 0 }
 0x791   : > { %3555 = vmatpush3.bf16.xpose.msra.mxu1 %v1963_v40 }
 0x792   : > { %3866 = vmatprep.subr.msk.bf16.mxu1 %vm771_vm6, %v1943_v41 }
 0x793   : > { %v1929_v42 = vpop.permute.xlu1 %1928  ;;  %v1949_v56 = vpop.permute.xlu0 %1948 }
 0x794   : > { %v1969_v51 = vsel %vm771_vm6, %v1929_v42, 0 }
 0x797   : > { %v1931_v44 = vpop.permute.xlu1 %1930 }
 0x798   : > { %v1972_v54 = vsel %vm771_vm6, %v1931_v44, 0 }
 0x799   : > { %3557 = vmatpush3.bf16.xpose.msra.mxu1 %v1966_v47 }
 0x79a   : > { %3867 = vmatprep.subr.msk.bf16.mxu1 %vm771_vm6, %v1945_v48 }
 0x79b   : > { %v1933_v49 = vpop.permute.xlu1 %1932 }
 0x79c   : > { %v1975_v59 = vsel %vm771_vm6, %v1933_v49, 0 }
 0x79f   : > { %v1901_v50 = vpop.permute.xlu1 %1900 }
 0x7a0   : > { %3564 = vmatprep.mubr.msk.bf16.mxu1 %vm771_vm6, %v1901_v50 }
 0x7a1   : > { %3559 = vmatpush3.bf16.xpose.msra.mxu1 %v1969_v51 }
 0x7a2   : > { %3868 = vmatprep.subr.msk.bf16.mxu1 %vm771_vm6, %v1947_v52 }
 0x7a9   : > { %3561 = vmatpush3.bf16.xpose.msra.mxu1 %v1972_v54 }
 0x7aa   : > { %3869 = vmatprep.subr.msk.bf16.mxu1 %vm771_vm6, %v1949_v56 }
 0x7b1   : > { %3563 = vmatpush3.bf16.xpose.msra.mxu1 %v1975_v59 }
 0x7b7   : > { %v3779_v18 = vpop.f32.mrb[16].mxu0 }
 0x7b8   : > { %3565 = vmatmul.mubr.msk.bf16.vlgmr.msra.gmra.mrb[40].mxu1 %vm771_vm6, %v1901_v50  ;;  %v1640_v19 = vpop.f32.mrb[17].mxu0 }
 0x7b9   : > { %v3780_v21 = vpop.f32.mrb[18].mxu0 }
 0x7ba   : > { %v4543_v23 = vpack.c.bf16 %v3780_v21, %v3779_v18  ;;  %v1643_v24 = vpop.f32.mrb[19].mxu0 }
 0x7bb   : > { %v4545_v25 = vpack.c.bf16 %v1643_v24, %v1640_v19 }
 0x7bf   : > { %v3783_v27 = vpop.f32.mrb[20].mxu0 }
 0x7c0   : > { %v1656_v29 = vpop.f32.mrb[21].mxu0 }
 0x7c1   : > { %v3784_v30 = vpop.f32.mrb[22].mxu0 }
 0x7c2   : > { %v4547_v31 = vpack.c.bf16 %v3784_v30, %v3783_v27  ;;  %v1659_v32 = vpop.f32.mrb[23].mxu0 }
 0x7c3   : > { %v4549_v35 = vpack.c.bf16 %v1659_v32, %v1656_v29 }
 0x7c7   : > { %v3787_v37 = vpop.f32.mrb[24].mxu0 }
 0x7c8   : > { %v1672_v38 = vpop.f32.mrb[25].mxu0 }
 0x7c9   : > { %v3788_v39 = vpop.f32.mrb[26].mxu0 }
 0x7ca   : > { %v4551_v40 = vpack.c.bf16 %v3788_v39, %v3787_v37  ;;  %v1675_v41 = vpop.f32.mrb[27].mxu0 }
 0x7cb   : > { %v4553_v42 = vpack.c.bf16 %v1675_v41, %v1672_v38 }
 0x7cd   : > { %3526 = vmatprep.subr.bf16.mxu0 %v4553_v42 }
 0x7ce   : > { %3527 = vmatpush3.bf16.msra.mxu0 %v4537_v6 }
 0x7cf   : > { %v3791_v44 = vpop.f32.mrb[28].mxu0  ;;  %3528 = vmatprep.subr.bf16.mxu0 %v4551_v40 }
 0x7d0   : > { %v1688_v47 = vpop.f32.mrb[29].mxu0 }
 0x7d1   : > { %v3792_v48 = vpop.f32.mrb[30].mxu0 }
 0x7d2   : > { %v4558_v49 = vpack.c.bf16 %v3792_v48, %v3791_v44  ;;  %v1691_v50 = vpop.f32.mrb[31].mxu0  ;;  %3529 = vmatpush3.bf16.msra.mxu0 %v4535_v4 }
 0x7d3   : > { %v4561_v51 = vpack.c.bf16 %v1691_v50, %v1688_v47 }
 0x7d5   : > { %3530 = vmatprep.subr.bf16.mxu0 %v4561_v51 }
 0x7d6   : > { %3531 = vmatpush3.bf16.msra.mxu0 %v4541_v17 }
 0x7d7   : > { %3532 = vmatprep.subr.bf16.mxu0 %v4558_v49  ;;  %v3795_v62 = vpop.f32.mrb[32].mxu0 }
 0x7d8   : > { %v1704_v0 = vpop.f32.mrb[33].mxu0 }
 0x7d9   : > { %v3796_v5 = vpop.f32.mrb[34].mxu0 }
 0x7da   : > { %3533 = vmatpush3.bf16.msra.mxu0 %v4539_v12  ;;  %v4575_v8 = vpack.c.bf16 %v3796_v5, %v3795_v62  ;;  %v1707_v10 = vpop.f32.mrb[35].mxu0 }
 0x7db   : > { %v4577_v11 = vpack.c.bf16 %v1707_v10, %v1704_v0 }
 0x7dd   : > { %3534 = vmatprep.subr.bf16.mxu0 %v4577_v11 }
 0x7de   : > { %3535 = vmatpush3.bf16.msra.mxu0 %v4545_v25 }
 0x7df   : > { %v3799_v15 = vpop.f32.mrb[36].mxu0  ;;  %3536 = vmatprep.subr.bf16.mxu0 %v4575_v8 }
 0x7e0   : > { %v1720_v18 = vpop.f32.mrb[37].mxu0 }
 0x7e1   : > { %v3800_v19 = vpop.f32.mrb[38].mxu0 }
 0x7e2   : > { %v4583_v21 = vpack.c.bf16 %v3800_v19, %v3799_v15  ;;  %v1723_v24 = vpop.f32.mrb[39].mxu0  ;;  %3537 = vmatpush3.bf16.msra.mxu0 %v4543_v23 }
 0x7e3   : > { %v4586_v27 = vpack.c.bf16 %v1723_v24, %v1720_v18 }
 0x7e5   : > { %3538 = vmatprep.subr.bf16.mxu0 %v4586_v27 }
 0x7e6   : > { %3539 = vmatpush3.bf16.msra.mxu0 %v4549_v35 }
 0x7e7   : > { %3540 = vmatprep.subr.bf16.mxu0 %v4583_v21 }
 0x7ea   : > { %3541 = vmatpush3.bf16.msra.mxu0 %v4547_v31 }
 0x818   : > { %v1836_v52 = vpop.f32.mrb[36].mxu1 }
 0x819   : > { %v1838_v54 = vpop.f32.mrb[37].mxu1 }
 0x81a   : > { %v1840_v56 = vpop.f32.mrb[38].mxu1  ;;  %v1843_v59 = vmax.f32 %v1836_v52, %v1838_v54 }
 0x81b   : > { %v1841_v61 = vpop.f32.mrb[39].mxu1 }
 0x81c   : > { %1844 = vmax.xlane.f32.xlu0 %v1843_v59 }
 0x832   : > { %2091 = vrot.lane.b32.xlu0 %v4553_v42, %s4065_s27 }
 0x836   : > { %2077 = vrot.lane.b32.xlu0 %v4535_v4, %s4065_s27 }
 0x83a   : > { %2095 = vrot.lane.b32.xlu0 %v4561_v51, %s4065_s27 }
 0x83e   : > { %2079 = vrot.lane.b32.xlu0 %v4541_v17, %s4065_s27 }
 0x842   : > { %2097 = vrot.lane.b32.xlu0 %v4558_v49, %s4065_s27 }
 0x88b   : > { %v2035_v29 = vpop.f32.mrb[40].mxu1 }
 0x88c   : > { %v2037_v30 = vpop.f32.mrb[41].mxu1 }
 0x88d   : > { %v2039_v32 = vpop.f32.mrb[42].mxu1  ;;  %v2042_v37 = vmax.f32 %v2035_v29, %v2037_v30 }
 0x88e   : > { %v2040_v38 = vpop.f32.mrb[43].mxu1 }
 0x88f   : > { %2043 = vmax.xlane.f32.xlu1 %v2042_v37 }
 0x8a0   : > { %2075 = vrot.lane.b32.xlu1 %v4537_v6, %s4065_s27 }
 0x8a4   : > { %2093 = vrot.lane.b32.xlu1 %v4551_v40, %s4065_s27 }
 0x8a9   : > { %v1845_v39 = vpop.xlane.xlu0 %1844 }
 0x8aa   : > { %v1846_v41 = vsub.f32 %v1836_v52, %v1845_v39  ;;  %v1847_v44 = vsub.f32 %v1838_v54, %v1845_v39 }
 0x8ac   : > { %v1848_v47 = vmul.f32 1.442695, %v1846_v41  ;;  %v1850_v48 = vmul.f32 1.442695, %v1847_v44 }
 0x8ad   : > { %v2092_v50 = vpop.permute.xlu0 %2091 }
 0x8ae   : > { %4014 = vpow2.f32 %v1848_v47  ;;  %3566 = vmatprep.subr.bf16.mxu0 %v2092_v50 }
 0x8af   : > { %4016 = vpow2.f32 %v1850_v48 }
 0x8b1   : > { %v2078_v19 = vpop.permute.xlu0 %2077 }
 0x8b5   : > { %v2096_v24 = vpop.permute.xlu0 %2095 }
 0x8b8   : > { %v4015_v56 = vpop.eup %4014 }
 0x8b9   : > { %v4017_v59 = vpop.eup %4016  ;;  %v2080_v32 = vpop.permute.xlu0 %2079 }
 0x8ba   : > { %v1852_v61 = vadd.f32 %v4017_v59, %v4015_v56 }
 0x8bc   : > { %1853 = vadd.xlane.f32.xlu0 %v1852_v61 }
 0x8d2   : > { %2081 = vrot.lane.b32.xlu0 %v4539_v12, %s4065_s27 }
 0x8d6   : > { %2099 = vrot.lane.b32.xlu0 %v4577_v11, %s4065_s27 }
 0x8da   : > { %2083 = vrot.lane.b32.xlu0 %v4545_v25, %s4065_s27 }
 0x8de   : > { %2101 = vrot.lane.b32.xlu0 %v4575_v8, %s4065_s27 }
 0x8e2   : > { %2085 = vrot.lane.b32.xlu0 %v4543_v23, %s4065_s27 }
 0x8e6   : > { %2103 = vrot.lane.b32.xlu0 %v4586_v27, %s4065_s27 }
 0x8ea   : > { %2105 = vrot.lane.b32.xlu0 %v4583_v21, %s4065_s27 }
 0x8ee   : > { %2089 = vrot.lane.b32.xlu0 %v4547_v31, %s4065_s27 }
 0x8f2   : > { %2165 = vrot.lane.b32.xlu0 %v4355_v2, %s4066_s21 }
 0x8f6   : > { %2181 = vrot.lane.b32.xlu0 %v4373_v28, %s4066_s21 }
 0x8fa   : > { %2183 = vrot.lane.b32.xlu0 %v4371_v26, %s4066_s21 }
 0x8fe   : > { %2185 = vrot.lane.b32.xlu0 %v4389_v36, %s4066_s21 }
 0x902   : > { %2187 = vrot.lane.b32.xlu0 %v4387_v34, %s4066_s21 }
 0x906   : > { %2189 = vrot.lane.b32.xlu0 %v4408_v46, %s4066_s21 }
 0x90a   : > { %2191 = vrot.lane.b32.xlu0 %v4405_v43, %s4066_s21 }
 0x90e   : > { %2193 = vrot.lane.b32.xlu0 %v4432_v55, %s4066_s21 }
 0x912   : > { %2195 = vrot.lane.b32.xlu0 %v4429_v53, %s4066_s21 }
 0x91c   : > { %v2044_v52 = vpop.xlane.xlu1 %2043 }
 0x91d   : > { %v2045_v54 = vsub.f32 %v2035_v29, %v2044_v52  ;;  %v2046_v62 = vsub.f32 %v2037_v30, %v2044_v52  ;;  %v2098_v29 = vpop.permute.xlu0 %2097 }
 0x91f   : > { %v2047_v0 = vmul.f32 1.442695, %v2045_v54  ;;  %v2049_v5 = vmul.f32 1.442695, %v2046_v62 }
 0x920   : > { %v2076_v44 = vpop.permute.xlu1 %2075 }
 0x921   : > { %4018 = vpow2.f32 %v2047_v0 }
 0x922   : > { %4020 = vpow2.f32 %v2049_v5 }
 0x924   : > { %v2094_v61 = vpop.permute.xlu1 %2093 }
 0x92b   : > { %v4631_v10 = vpop.eup %4018 }
 0x92c   : > { %v4633_v15 = vpop.eup %4020 }
 0x92d   : > { %v2051_v18 = vadd.f32 %v4633_v15, %v4631_v10 }
 0x92f   : > { %2052 = vadd.xlane.f32.xlu1 %v2051_v18 }
 0x940   : > { %2087 = vrot.lane.b32.xlu1 %v4549_v35, %s4065_s27  ;;  %s4067_s27 = smov 80  }
 0x944   : > { %2167 = vrot.lane.b32.xlu1 %v4353_v63, %s4066_s21 }
 0x948   : > { %2169 = vrot.lane.b32.xlu1 %v4361_v9, %s4066_s21 }
 0x949   : > { %v1854_v30 = vpop.xlane.xlu0 %1853 }
 0x94a   : > { %4022 = vrcp.f32 %v1854_v30 }
 0x94c   : > { %2171 = vrot.lane.b32.xlu1 %v4359_v7, %s4066_s21 }
 0x94d   : > { %v2082_v37 = vpop.permute.xlu0 %2081 }
 0x950   : > { %2173 = vrot.lane.b32.xlu1 %v4365_v16, %s4066_s21 }
 0x951   : > { %v2100_v47 = vpop.permute.xlu0 %2099 }
 0x954   : > { %v4023_v38 = vpop.eup %4022  ;;  %2175 = vrot.lane.b32.xlu1 %v4363_v13, %s4066_s21 }
 0x955   : > { %v1856_v39 = vmul.f32 %v4023_v38, %v4015_v56  ;;  %v1857_v41 = vmul.f32 %v4023_v38, %v4017_v59  ;;  %v2084_v52 = vpop.permute.xlu0 %2083 }
 0x957   : > { %v1859_v48 = vpack.c.bf16 %v1857_v41, %v1857_v41  ;;  %v1858_v50 = vpack.c.bf16 %v1856_v39, %v1856_v39 }
 0x958   : > { %2177 = vrot.lane.b32.xlu1 %v4369_v22, %s4066_s21 }
 0x959   : > { %1892 = vmatprep.mubr.bf16.mxu0 %v1859_v48  ;;  %v2102_v56 = vpop.permute.xlu0 %2101 }
 0x95a   : > { %1893 = vmatmul.mubr.bf16.vlgmr.msra.gmra.mrb[40].mxu0 %v1858_v50 }
 0x95b   : > { %3567 = vmatpush3.bf16.msra.mxu0 %v2076_v44 }
 0x95c   : > { %3568 = vmatprep.subr.bf16.mxu0 %v2094_v61  ;;  %2179 = vrot.lane.b32.xlu1 %v4367_v20, %s4066_s21 }
 0x95d   : > { %v2086_v59 = vpop.permute.xlu0 %2085 }
 0x95f   : > { %3569 = vmatpush3.bf16.msra.mxu0 %v2078_v19 }
 0x960   : > { %3570 = vmatprep.subr.bf16.mxu0 %v2096_v24  ;;  %2163 = vrot.lane.b32.xlu1 %v4287_v33, %s4066_s21 }
 0x961   : > { %v2104_v54 = vpop.permute.xlu0 %2103 }
 0x963   : > { %3571 = vmatpush3.bf16.msra.mxu0 %v2080_v32 }
 0x964   : > { %3572 = vmatprep.subr.bf16.mxu0 %v2098_v29  ;;  %2322 = vrot.lane.b32.xlu1 %v4553_v42, %s4066_s21 }
 0x965   : > { %v2106_v62 = vpop.permute.xlu0 %2105 }
 0x967   : > { %3573 = vmatpush3.bf16.msra.mxu0 %v2082_v37 }
 0x968   : > { %2306 = vrot.lane.b32.xlu1 %v4537_v6, %s4066_s21  ;;  %3574 = vmatprep.subr.bf16.mxu0 %v2100_v47 }
 0x969   : > { %v2090_v0 = vpop.permute.xlu0 %2089 }
 0x96b   : > { %3575 = vmatpush3.bf16.msra.mxu0 %v2084_v52 }
 0x96c   : > { %2324 = vrot.lane.b32.xlu1 %v4551_v40, %s4066_s21  ;;  %3576 = vmatprep.subr.bf16.mxu0 %v2102_v56 }
 0x96d   : > { %v2166_v18 = vpop.permute.xlu0 %2165 }
 0x96e   : > { %v2201_v47 = vsel %vm771_vm6, %v2166_v18, 0 }
 0x96f   : > { %3577 = vmatpush3.bf16.msra.mxu0 %v2086_v59 }
 0x970   : > { %2308 = vrot.lane.b32.xlu1 %v4535_v4, %s4066_s21  ;;  %3578 = vmatprep.subr.bf16.mxu0 %v2104_v54 }
 0x971   : > { %v2182_v32 = vpop.permute.xlu0 %2181 }
 0x974   : > { %2328 = vrot.lane.b32.xlu1 %v4558_v49, %s4066_s21 }
 0x975   : > { %v2184_v48 = vpop.permute.xlu0 %2183 }
 0x978   : > { %2316 = vrot.lane.b32.xlu1 %v4543_v23, %s4066_s21 }
 0x979   : > { %v2186_v56 = vpop.permute.xlu0 %2185 }
 0x97c   : > { %2318 = vrot.lane.b32.xlu1 %v4549_v35, %s4066_s21 }
 0x97d   : > { %v2188_v54 = vpop.permute.xlu0 %2187 }
 0x980   : > { %2320 = vrot.lane.b32.xlu1 %v4547_v31, %s4066_s21 }
 0x981   : > { %v2190_v18 = vpop.permute.xlu0 %2189 }
 0x9bc   : > { %v2053_v5 = vpop.xlane.xlu1 %2052 }
 0x9bd   : > { %4024 = vrcp.f32 %v2053_v5 }
 0x9c0   : > { %v2088_v19 = vpop.permute.xlu1 %2087 }
 0x9c1   : > { %3579 = vmatpush3.bf16.msra.mxu0 %v2088_v19 }
 0x9c2   : > { %3580 = vmatprep.subr.bf16.mxu0 %v2106_v62 }
 0x9c4   : > { %v2168_v24 = vpop.permute.xlu1 %2167 }
 0x9c5   : > { %3581 = vmatpush3.bf16.msra.mxu0 %v2090_v0  ;;  %v2204_v52 = vsel %vm771_vm6, %v2168_v24, 0 }
 0x9c6   : > { %3870 = vmatprep.subr.msk.bf16.mxu0 %vm771_vm6, %v2182_v32 }
 0x9c7   : > { %v4025_v29 = vpop.eup %4024 }
 0x9c8   : > { %v2170_v30 = vpop.permute.xlu1 %2169  ;;  %v2056_v37 = vmul.f32 %v4025_v29, %v4633_v15  ;;  %v2055_v38 = vmul.f32 %v4025_v29, %v4631_v10  ;;  %v2192_v29 = vpop.permute.xlu0 %2191 }
 0x9c9   : > { %v2207_v59 = vsel %vm771_vm6, %v2170_v30, 0 }
 0x9ca   : > { %v2058_v39 = vpack.c.bf16 %v2056_v37, %v2056_v37  ;;  %v2057_v41 = vpack.c.bf16 %v2055_v38, %v2055_v38 }
 0x9cc   : > { %v2172_v44 = vpop.permute.xlu1 %2171  ;;  %2155 = vmatprep.mubr.bf16.mxu0 %v2058_v39  ;;  %v2194_v38 = vpop.permute.xlu0 %2193 }
 0x9cd   : > { %2156 = vmatmul.mubr.bf16.vlgmr.msra.gmra.mrb[44].mxu0 %v2057_v41  ;;  %v2210_v5 = vsel %vm771_vm6, %v2172_v44, 0 }
 0x9ce   : > { %3589 = vmatpush3.bf16.xpose.msra.mxu0 %v2201_v47 }
 0x9cf   : > { %3871 = vmatprep.subr.msk.bf16.mxu0 %vm771_vm6, %v2184_v48 }
 0x9d0   : > { %v2174_v50 = vpop.permute.xlu1 %2173  ;;  %v2196_v41 = vpop.permute.xlu0 %2195 }
 0x9d1   : > { %v2213_v32 = vsel %vm771_vm6, %v2174_v50, 0 }
 0x9d4   : > { %v2176_v61 = vpop.permute.xlu1 %2175 }
 0x9d5   : > { %v2216_v37 = vsel %vm771_vm6, %v2176_v61, 0 }
 0x9d6   : > { %3591 = vmatpush3.bf16.xpose.msra.mxu0 %v2204_v52 }
 0x9d7   : > { %3872 = vmatprep.subr.msk.bf16.mxu0 %vm771_vm6, %v2186_v56 }
 0x9d8   : > { %v2178_v10 = vpop.permute.xlu1 %2177 }
 0x9d9   : > { %v2219_v39 = vsel %vm771_vm6, %v2178_v10, 0 }
 0x9dc   : > { %v2180_v15 = vpop.permute.xlu1 %2179 }
 0x9dd   : > { %v2222_v44 = vsel %vm771_vm6, %v2180_v15, 0 }
 0x9de   : > { %3593 = vmatpush3.bf16.xpose.msra.mxu0 %v2207_v59 }
 0x9df   : > { %3873 = vmatprep.subr.msk.bf16.mxu0 %vm771_vm6, %v2188_v54 }
 0x9e0   : > { %v2164_v62 = vpop.permute.xlu1 %2163 }
 0x9e1   : > { %3604 = vmatprep.mubr.msk.bf16.mxu0 %vm771_vm6, %v2164_v62 }
 0x9e4   : > { %v2323_v0 = vpop.permute.xlu1 %2322 }
 0x9e5   : > { %3606 = vmatprep.subr.bf16.mxu1 %v2323_v0 }
 0x9e6   : > { %3595 = vmatpush3.bf16.xpose.msra.mxu0 %v2210_v5 }
 0x9e7   : > { %3874 = vmatprep.subr.msk.bf16.mxu0 %vm771_vm6, %v2190_v18 }
 0x9e8   : > { %v2307_v19 = vpop.permute.xlu1 %2306 }
 0x9e9   : > { %3607 = vmatpush3.bf16.msra.mxu1 %v2307_v19 }
 0x9ec   : > { %v2325_v24 = vpop.permute.xlu1 %2324 }
 0x9ed   : > { %3608 = vmatprep.subr.bf16.mxu1 %v2325_v24 }
 0x9ee   : > { %3597 = vmatpush3.bf16.xpose.msra.mxu0 %v2213_v32 }
 0x9ef   : > { %3875 = vmatprep.subr.msk.bf16.mxu0 %vm771_vm6, %v2192_v29 }
 0x9f0   : > { %v2309_v30 = vpop.permute.xlu1 %2308 }
 0x9f1   : > { %3609 = vmatpush3.bf16.msra.mxu1 %v2309_v30 }
 0x9f6   : > { %3599 = vmatpush3.bf16.xpose.msra.mxu0 %v2216_v37 }
 0x9f7   : > { %3876 = vmatprep.subr.msk.bf16.mxu0 %vm771_vm6, %v2194_v38 }
 0x9fe   : > { %3601 = vmatpush3.bf16.xpose.msra.mxu0 %v2219_v39 }
 0x9ff   : > { %3877 = vmatprep.subr.msk.bf16.mxu0 %vm771_vm6, %v2196_v41 }
 0xa06   : > { %3603 = vmatpush3.bf16.xpose.msra.mxu0 %v2222_v44 }
 0xa0d   : > { %3605 = vmatmul.mubr.msk.bf16.vlgmr.msra.gmra.mrb[48].mxu0 %vm771_vm6, %v2164_v62 }
 0xa2d   : > { %v3542_v47 = vpop.f32.mrb[40].mxu0 }
 0xa2e   : > { %v3543_v48 = vpop.f32.mrb[41].mxu0 }
 0xa2f   : > { %v4691_v50 = vadd.f32 %v3543_v48, %v3542_v47  ;;  %v3545_v61 = vpop.f32.mrb[42].mxu0 }
 0xa30   : > { %v3546_v52 = vpop.f32.mrb[43].mxu0 }
 0xaa0   : > { %v3582_v56 = vpop.f32.mrb[44].mxu0 }
 0xaa1   : > { %v3583_v59 = vpop.f32.mrb[45].mxu0 }
 0xaa2   : > { %v4693_v54 = vadd.f32 %v3583_v59, %v3582_v56  ;;  %v3585_v10 = vpop.f32.mrb[46].mxu0 }
 0xaa3   : > { %v3586_v0 = vpop.f32.mrb[47].mxu0 }
 0xae0   : > { %v2282_v5 = vpop.f32.mrb[48].mxu0 }
 0xae1   : > { %v2284_v18 = vpop.f32.mrb[49].mxu0 }
 0xae2   : > { %v2286_v19 = vpop.f32.mrb[50].mxu0  ;;  %v2289_v24 = vmax.f32 %v2282_v5, %v2284_v18 }
 0xae3   : > { %v2287_v15 = vpop.f32.mrb[51].mxu0 }
 0xae4   : > { %2290 = vmax.xlane.f32.xlu0 %v2289_v24 }
 0xafa   : > { %2326 = vrot.lane.b32.xlu0 %v4561_v51, %s4066_s21 }
 0xafe   : > { %2310 = vrot.lane.b32.xlu0 %v4541_v17, %s4066_s21 }
 0xb02   : > { %2312 = vrot.lane.b32.xlu0 %v4539_v12, %s4066_s21 }
 0xb06   : > { %2330 = vrot.lane.b32.xlu0 %v4577_v11, %s4066_s21 }
 0xb0a   : > { %2314 = vrot.lane.b32.xlu0 %v4545_v25, %s4066_s21 }
 0xb0e   : > { %2332 = vrot.lane.b32.xlu0 %v4575_v8, %s4066_s21 }
 0xb12   : > { %2334 = vrot.lane.b32.xlu0 %v4586_v27, %s4066_s21 }
 0xb16   : > { %2336 = vrot.lane.b32.xlu0 %v4583_v21, %s4066_s21  ;;  %s4069_s21 = smov 48  }
 0xb1a   : > { %2396 = vrot.lane.b32.xlu0 %v4355_v2, %s4067_s27 }
 0xb1e   : > { %2398 = vrot.lane.b32.xlu0 %v4353_v63, %s4067_s27 }
 0xb22   : > { %2400 = vrot.lane.b32.xlu0 %v4361_v9, %s4067_s27 }
 0xb26   : > { %2402 = vrot.lane.b32.xlu0 %v4359_v7, %s4067_s27 }
 0xb2a   : > { %2404 = vrot.lane.b32.xlu0 %v4365_v16, %s4067_s27 }
 0xb2e   : > { %2406 = vrot.lane.b32.xlu0 %v4363_v13, %s4067_s27 }
 0xb32   : > { %2408 = vrot.lane.b32.xlu0 %v4369_v22, %s4067_s27 }
 0xb36   : > { %2410 = vrot.lane.b32.xlu0 %v4367_v20, %s4067_s27  ;;  %v2329_v20 = vpop.permute.xlu1 %2328 }
 0xb3a   : > { %2394 = vrot.lane.b32.xlu0 %v4287_v33, %s4067_s27 }
 0xb3e   : > { %2553 = vrot.lane.b32.xlu0 %v4553_v42, %s4067_s27 }
 0xb42   : > { %2537 = vrot.lane.b32.xlu0 %v4537_v6, %s4067_s27 }
 0xb46   : > { %2539 = vrot.lane.b32.xlu0 %v4535_v4, %s4067_s27 }
 0xb4a   : > { %2543 = vrot.lane.b32.xlu0 %v4539_v12, %s4067_s27 }
 0xb4e   : > { %2545 = vrot.lane.b32.xlu0 %v4545_v25, %s4067_s27 }
 0xb52   : > { %2547 = vrot.lane.b32.xlu0 %v4543_v23, %s4067_s27 }
 0xb56   : > { %2549 = vrot.lane.b32.xlu0 %v4549_v35, %s4067_s27  ;;  %v2317_v35 = vpop.permute.xlu1 %2316 }
 0xb5a   : > { %v2319_v62 = vpop.permute.xlu1 %2318 }
 0xb5e   : > { %v2321_v30 = vpop.permute.xlu1 %2320 }
 0xb71   : > { %v2291_v33 = vpop.xlane.xlu0 %2290 }
 0xb72   : > { %v2292_v63 = vsub.f32 %v2282_v5, %v2291_v33  ;;  %v2293_v2 = vsub.f32 %v2284_v18, %v2291_v33 }
 0xb74   : > { %v2294_v7 = vmul.f32 1.442695, %v2292_v63  ;;  %v2296_v9 = vmul.f32 1.442695, %v2293_v2 }
 0xb75   : > { %v2327_v13 = vpop.permute.xlu0 %2326 }
 0xb76   : > { %4026 = vpow2.f32 %v2294_v7  ;;  %3610 = vmatprep.subr.bf16.mxu1 %v2327_v13 }
 0xb77   : > { %4028 = vpow2.f32 %v2296_v9 }
 0xb79   : > { %v2311_v16 = vpop.permute.xlu0 %2310 }
 0xb7a   : > { %3611 = vmatpush3.bf16.msra.mxu1 %v2311_v16 }
 0xb7b   : > { %3612 = vmatprep.subr.bf16.mxu1 %v2329_v20 }
 0xb7d   : > { %v2313_v22 = vpop.permute.xlu0 %2312 }
 0xb7e   : > { %3613 = vmatpush3.bf16.msra.mxu1 %v2313_v22 }
 0xb80   : > { %v4027_v4 = vpop.eup %4026 }
 0xb81   : > { %v4029_v6 = vpop.eup %4028  ;;  %v2331_v12 = vpop.permute.xlu0 %2330 }
 0xb82   : > { %3614 = vmatprep.subr.bf16.mxu1 %v2331_v12  ;;  %v2298_v23 = vadd.f32 %v4029_v6, %v4027_v4 }
 0xb84   : > { %2299 = vadd.xlane.f32.xlu1 %v2298_v23 }
 0xb85   : > { %v2315_v25 = vpop.permute.xlu0 %2314 }
 0xb86   : > { %3615 = vmatpush3.bf16.msra.mxu1 %v2315_v25 }
 0xb89   : > { %v2333_v42 = vpop.permute.xlu0 %2332 }
 0xb8a   : > { %3616 = vmatprep.subr.bf16.mxu1 %v2333_v42 }
 0xb8b   : > { %3617 = vmatpush3.bf16.msra.mxu1 %v2317_v35 }
 0xb8d   : > { %v2335_v32 = vpop.permute.xlu0 %2334 }
 0xb8e   : > { %3618 = vmatprep.subr.bf16.mxu1 %v2335_v32 }
 0xb8f   : > { %3619 = vmatpush3.bf16.msra.mxu1 %v2319_v62 }
 0xb91   : > { %v2337_v29 = vpop.permute.xlu0 %2336 }
 0xb92   : > { %3620 = vmatprep.subr.bf16.mxu1 %v2337_v29 }
 0xb93   : > { %3621 = vmatpush3.bf16.msra.mxu1 %v2321_v30 }
 0xb95   : > { %2412 = vrot.lane.b32.xlu1 %v4373_v28, %s4067_s27  ;;  %v2397_v37 = vpop.permute.xlu0 %2396 }
 0xb96   : > { %v2432_v10 = vsel %vm771_vm6, %v2397_v37, 0 }
 0xb99   : > { %2414 = vrot.lane.b32.xlu1 %v4371_v26, %s4067_s27  ;;  %v2399_v38 = vpop.permute.xlu0 %2398 }
 0xb9a   : > { %v2435_v0 = vsel %vm771_vm6, %v2399_v38, 0 }
 0xb9d   : > { %2416 = vrot.lane.b32.xlu1 %v4389_v36, %s4067_s27  ;;  %v2401_v39 = vpop.permute.xlu0 %2400 }
 0xb9e   : > { %v2438_v18 = vsel %vm771_vm6, %v2401_v39, 0 }
 0xba1   : > { %2418 = vrot.lane.b32.xlu1 %v4387_v34, %s4067_s27  ;;  %v2403_v41 = vpop.permute.xlu0 %2402 }
 0xba2   : > { %v2441_v24 = vsel %vm771_vm6, %v2403_v41, 0 }
 0xba5   : > { %2420 = vrot.lane.b32.xlu1 %v4408_v46, %s4067_s27  ;;  %v2405_v44 = vpop.permute.xlu0 %2404 }
 0xba6   : > { %v2444_v33 = vsel %vm771_vm6, %v2405_v44, 0 }
 0xba9   : > { %2422 = vrot.lane.b32.xlu1 %v4405_v43, %s4067_s27  ;;  %v2407_v28 = vpop.permute.xlu0 %2406 }
 0xbaa   : > { %v2447_v2 = vsel %vm771_vm6, %v2407_v28, 0 }
 0xbad   : > { %2424 = vrot.lane.b32.xlu1 %v4432_v55, %s4067_s27  ;;  %v2409_v26 = vpop.permute.xlu0 %2408 }
 0xbae   : > { %v2450_v9 = vsel %vm771_vm6, %v2409_v26, 0 }
 0xbb1   : > { %2426 = vrot.lane.b32.xlu1 %v4429_v53, %s4067_s27  ;;  %v2411_v36 = vpop.permute.xlu0 %2410 }
 0xbb2   : > { %v2453_v16 = vsel %vm771_vm6, %v2411_v36, 0 }
 0xbb5   : > { %v2395_v47 = vpop.permute.xlu0 %2394 }
 0xbb9   : > { %v2554_v48 = vpop.permute.xlu0 %2553 }
 0xbba   : > { %3646 = vmatprep.subr.bf16.mxu0 %v2554_v48 }
 0xbbd   : > { %v2538_v34 = vpop.permute.xlu0 %2537 }
 0xbbe   : > { %3647 = vmatpush3.bf16.msra.mxu0 %v2538_v34 }
 0xbc1   : > { %v2540_v30 = vpop.permute.xlu0 %2539 }
 0xc11   : > { %v2300_v61 = vpop.xlane.xlu1 %2299 }
 0xc12   : > { %4030 = vrcp.f32 %v2300_v61 }
 0xc15   : > { %v2413_v46 = vpop.permute.xlu1 %2412 }
 0xc16   : > { %3878 = vmatprep.subr.msk.bf16.mxu1 %vm771_vm6, %v2413_v46 }
 0xc19   : > { %v2415_v53 = vpop.permute.xlu1 %2414 }
 0xc1c   : > { %v4031_v43 = vpop.eup %4030 }
 0xc1d   : > { %v2303_v52 = vmul.f32 %v4031_v43, %v4029_v6  ;;  %v2302_v56 = vmul.f32 %v4031_v43, %v4027_v4  ;;  %v2417_v5 = vpop.permute.xlu1 %2416 }
 0xc1f   : > { %v2305_v59 = vpack.c.bf16 %v2303_v52, %v2303_v52  ;;  %v2304_v55 = vpack.c.bf16 %v2302_v56, %v2302_v56 }
 0xc21   : > { %2386 = vmatprep.mubr.bf16.mxu1 %v2305_v59  ;;  %v2419_v19 = vpop.permute.xlu1 %2418  ;;  %v3967_v59 = vld [vmem:[%s5017_s8 + $0x8] sm:$0xff]  }
 0xc22   : > { %2387 = vmatmul.mubr.bf16.vlgmr.msra.gmra.mrb[44].mxu1 %v2304_v55  ;;  %v3968_v55 = vld [vmem:[%s5017_s8 + $0x10] sm:$0xff]  }
 0xc23   : > { %3629 = vmatpush3.bf16.xpose.msra.mxu1 %v2432_v10  ;;  %3644 = vmatprep.mubr.msk.bf16.mxu1 %vm771_vm6, %v2395_v47  ;;  %v3969_v10 = vld [vmem:[%s5017_s8 + $0x18] sm:$0xff]  }
 0xc24   : > { %3879 = vmatprep.subr.msk.bf16.mxu1 %vm771_vm6, %v2415_v53 }
 0xc25   : > { %v2421_v15 = vpop.permute.xlu1 %2420 }
 0xc29   : > { %v2423_v63 = vpop.permute.xlu1 %2422 }
 0xc2b   : > { %3631 = vmatpush3.bf16.xpose.msra.mxu1 %v2435_v0 }
 0xc2c   : > { %3880 = vmatprep.subr.msk.bf16.mxu1 %vm771_vm6, %v2417_v5 }
 0xc2d   : > { %v2425_v7 = vpop.permute.xlu1 %2424 }
 0xc31   : > { %v2427_v13 = vpop.permute.xlu1 %2426 }
 0xc33   : > { %3633 = vmatpush3.bf16.xpose.msra.mxu1 %v2438_v18 }
 0xc34   : > { %3881 = vmatprep.subr.msk.bf16.mxu1 %vm771_vm6, %v2419_v19 }
 0xc3b   : > { %3635 = vmatpush3.bf16.xpose.msra.mxu1 %v2441_v24 }
 0xc3c   : > { %3882 = vmatprep.subr.msk.bf16.mxu1 %vm771_vm6, %v2421_v15 }
 0xc43   : > { %3637 = vmatpush3.bf16.xpose.msra.mxu1 %v2444_v33 }
 0xc44   : > { %3883 = vmatprep.subr.msk.bf16.mxu1 %vm771_vm6, %v2423_v63 }
 0xc4b   : > { %3639 = vmatpush3.bf16.xpose.msra.mxu1 %v2447_v2 }
 0xc4c   : > { %3884 = vmatprep.subr.msk.bf16.mxu1 %vm771_vm6, %v2425_v7 }
 0xc53   : > { %3641 = vmatpush3.bf16.xpose.msra.mxu1 %v2450_v9 }
 0xc54   : > { %3885 = vmatprep.subr.msk.bf16.mxu1 %vm771_vm6, %v2427_v13  ;;  %v3410_v13 = vld [vmem:[%s5018_s9] ss:$0 sm:$0xff] }
 0xc5b   : > { %3643 = vmatpush3.bf16.xpose.msra.mxu1 %v2453_v16 }
 0xc62   : > { %3645 = vmatmul.mubr.msk.bf16.vlgmr.msra.gmra.mrb[48].mxu1 %vm771_vm6, %v2395_v47 }
 0xcf5   : > { %v3622_v20 = vpop.f32.mrb[44].mxu1 }
 0xcf6   : > { %v3623_v22 = vpop.f32.mrb[45].mxu1 }
 0xcf7   : > { %v3624_v4 = vadd.f32 %v3623_v22, %v3622_v20  ;;  %v3625_v6 = vpop.f32.mrb[46].mxu1 }
 0xcf8   : > { %v3626_v12 = vpop.f32.mrb[47].mxu1 }
 0xd35   : > { %v2513_v23 = vpop.f32.mrb[48].mxu1 }
 0xd36   : > { %v2515_v25 = vpop.f32.mrb[49].mxu1 }
 0xd37   : > { %v2517_v35 = vpop.f32.mrb[50].mxu1  ;;  %v2520_v42 = vmax.f32 %v2513_v23, %v2515_v25 }
 0xd38   : > { %v2518_v62 = vpop.f32.mrb[51].mxu1 }
 0xd39   : > { %2521 = vmax.xlane.f32.xlu1 %v2520_v42  ;;  %v3972_v62 = vld [vmem:[%s5019_s10 + $0x4] ss:$8 sps:$4 sm:$0xff]  }
 0xd4a   : > { %2555 = vrot.lane.b32.xlu1 %v4551_v40, %s4067_s27 }
 0xd4e   : > { %2557 = vrot.lane.b32.xlu1 %v4561_v51, %s4067_s27 }
 0xd52   : > { %2541 = vrot.lane.b32.xlu1 %v4541_v17, %s4067_s27 }
 0xd56   : > { %2559 = vrot.lane.b32.xlu1 %v4558_v49, %s4067_s27 }
 0xd5a   : > { %2561 = vrot.lane.b32.xlu1 %v4577_v11, %s4067_s27  ;;  %v2544_v11 = vpop.permute.xlu0 %2543 }
 0xd5e   : > { %2563 = vrot.lane.b32.xlu1 %v4575_v8, %s4067_s27 }
 0xd62   : > { %2565 = vrot.lane.b32.xlu1 %v4586_v27, %s4067_s27 }
 0xd66   : > { %2567 = vrot.lane.b32.xlu1 %v4583_v21, %s4067_s27 }
 0xd6a   : > { %2626 = vrot.lane.b32.xlu1 %v4693_v54, %s4068_s23  ;;  %v2546_v54 = vpop.permute.xlu0 %2545  ;;  %s629_s23 = scalar_lea.vmem %s5029_s20, %s3463_s0 }
 0xd6e   : > { %v2548_v44 = vpop.permute.xlu0 %2547 }
 0xd72   : > { %v2550_v36 = vpop.permute.xlu0 %2549 }
 0xdc6   : > { %v2522_v40 = vpop.xlane.xlu1 %2521 }
 0xdc7   : > { %v2523_v17 = vsub.f32 %v2513_v23, %v2522_v40  ;;  %v2524_v51 = vsub.f32 %v2515_v25, %v2522_v40  ;;  %v3975_v40 = vld [vmem:[%s5019_s10 + $0x14] ss:$8 sps:$4 sm:$0xff]  }
 0xdc9   : > { %v2525_v32 = vmul.f32 1.442695, %v2523_v17  ;;  %v2527_v49 = vmul.f32 1.442695, %v2524_v51  ;;  %v3973_v17 = vld [vmem:[%s5019_s10 + $0x10] ss:$8 sps:$4 sm:$0xff]  }
 0xdca   : > { %v2556_v29 = vpop.permute.xlu1 %2555  ;;  %v3978_v51 = vld [vmem:[%s5019_s10 + $0x24] ss:$8 sps:$4 sm:$0xff]  }
 0xdcb   : > { %4032 = vpow2.f32 %v2525_v32  ;;  %3648 = vmatprep.subr.bf16.mxu0 %v2556_v29  ;;  %v3976_v32 = vld [vmem:[%s5019_s10 + $0x20] ss:$8 sps:$4 sm:$0xff]   ;;  %v3981_v29 = vld [vmem:[%s5019_s10 + $0x34] ss:$8 sps:$4 sm:$0xff]  }
 0xdcc   : > { %4034 = vpow2.f32 %v2527_v49  ;;  %3649 = vmatpush3.bf16.msra.mxu0 %v2540_v30  ;;  %v3979_v49 = vld [vmem:[%s5019_s10 + $0x30] ss:$8 sps:$4 sm:$0xff]  }
 0xdce   : > { %v2558_v8 = vpop.permute.xlu1 %2557 }
 0xdcf   : > { %3650 = vmatprep.subr.bf16.mxu0 %v2558_v8 }
 0xdd2   : > { %v2542_v27 = vpop.permute.xlu1 %2541 }
 0xdd3   : > { %3651 = vmatpush3.bf16.msra.mxu0 %v2542_v27  ;;  %v2731_v27 = vsub.s32 4, %v4238_v57 }
 0xdd5   : > { %v4033_v21 = vpop.eup %4032 }
 0xdd6   : > { %v4035_v37 = vpop.eup %4034  ;;  %v2560_v38 = vpop.permute.xlu1 %2559 }
 0xdd7   : > { %3652 = vmatprep.subr.bf16.mxu0 %v2560_v38  ;;  %v2529_v39 = vadd.f32 %v4035_v37, %v4033_v21 }
 0xdd8   : > { %3653 = vmatpush3.bf16.msra.mxu0 %v2544_v11 }
 0xdd9   : > { %2530 = vadd.xlane.f32.xlu0 %v2529_v39 }
 0xdda   : > { %v2562_v41 = vpop.permute.xlu1 %2561 }
 0xddb   : > { %3654 = vmatprep.subr.bf16.mxu0 %v2562_v41 }
 0xddc   : > { %3655 = vmatpush3.bf16.msra.mxu0 %v2546_v54 }
 0xdde   : > { %v2564_v28 = vpop.permute.xlu1 %2563 }
 0xddf   : > { %3656 = vmatprep.subr.bf16.mxu0 %v2564_v28 }
 0xde0   : > { %3657 = vmatpush3.bf16.msra.mxu0 %v2548_v44 }
 0xde2   : > { %v2566_v26 = vpop.permute.xlu1 %2565 }
 0xde3   : > { %3658 = vmatprep.subr.bf16.mxu0 %v2566_v26 }
 0xde4   : > { %3659 = vmatpush3.bf16.msra.mxu0 %v2550_v36  ;;  %v3982_v36 = vld [vmem:[%s5021_s12 + $0x40] sm:$0xff]  }
 0xde5   : > { %3673 = vmatprep.subr.bf16.mxu1 %v3982_v36 }
 0xde6   : > { %v2568_v47 = vpop.permute.xlu1 %2567 }
 0xde7   : > { %3660 = vmatprep.subr.bf16.mxu0 %v2568_v47  ;;  %v3983_v47 = vld [vmem:[%s5021_s12] sm:$0xff]  }
 0xde8   : > { %3674 = vmatpush3.bf16.msra.mxu1 %v3983_v47 }
 0xdea   : > { %v2627_v24 = vpop.permute.xlu1 %2626 }
 0xdeb   : > { %v2637_v33 = vsel %vm771_vm6, %v4691_v50, %v2627_v24  ;;  %v935_v24 = vld [vmem:[%s5020_s11] sm:$0x3] }
 0xdef   : > { %2551 = vrot.lane.b32.xlu0 %v4547_v31, %s4067_s27  ;;  %v3966_v31 = vld [vmem:[%s5017_s8] sm:$0xff]  }
 0xdf3   : > { %2630 = vrot.lane.b32.xlu0 %v3624_v4, %s4061_s3 }
 0xe66   : > { %v2531_v48 = vpop.xlane.xlu0 %2530 }
 0xe67   : > { %4036 = vrcp.f32 %v2531_v48  ;;  %v3984_v48 = vld [vmem:[%s5021_s12 + $0x48] sm:$0xff]  }
 0xe68   : > { %3675 = vmatprep.subr.bf16.mxu1 %v3984_v48 }
 0xe6a   : > { %v2552_v34 = vpop.permute.xlu0 %2551 }
 0xe6b   : > { %3661 = vmatpush3.bf16.msra.mxu0 %v2552_v34  ;;  %v3985_v34 = vld [vmem:[%s5021_s12 + $0x8] sm:$0xff]  }
 0xe6c   : > { %3801 = vmatprep.subr.bf16.mxu0 %v4059_v1  ;;  %3676 = vmatpush3.bf16.msra.mxu1 %v3985_v34 }
 0xe6e   : > { %v2631_v15 = vpop.permute.xlu0 %2630 }
 0xe6f   : > { %v2638_v63 = vsel %vm661_vm3, %v2637_v33, %v2631_v15  ;;  %v2744_v15 = vrot.slane %v935_v24, %v1012_v58  ;;  %v2748_v33 = vrot.slane %v935_v24, %v1017_v60  ;;  %v3093_v24 = vsub.s32 7, %v4238_v57 }
 0xe71   : > { %v4037_v61 = vpop.eup %4036 }
 0xe72   : > { %v2534_v46 = vmul.f32 %v4037_v61, %v4035_v37  ;;  %v2533_v43 = vmul.f32 %v4037_v61, %v4033_v21  ;;  %v2736_v21 = vsub.s32 5, %v4238_v57  ;;  %v4860_v37 = vld [vmem:[%s5041_s26] sm:$0xff]  ;;  %v3986_v61 = vld [vmem:[%s5021_s12 + $0x50] sm:$0xff]  }
 0xe73   : > { %v2732_v38 = vrot.slane %v4860_v37, %v2731_v27  ;;  %3677 = vmatprep.subr.bf16.mxu1 %v3986_v61  ;;  %v3425_v27 = vld [vmem:[%s5022_s13] ss:$0 sm:$0xff] }
 0xe74   : > { %v2536_v52 = vpack.c.bf16 %v2534_v46, %v2534_v46  ;;  %v2535_v56 = vpack.c.bf16 %v2533_v43, %v2533_v43  ;;  %v2737_v41 = vrot.slane %v4860_v37, %v2736_v21  ;;  %v3987_v46 = vld [vmem:[%s5021_s12 + $0x10] sm:$0xff]   ;;  %v3988_v43 = vld [vmem:[%s5021_s12 + $0x58] sm:$0xff]  }
 0xe75   : > { %3678 = vmatpush3.bf16.msra.mxu1 %v3987_v46 }
 0xe76   : > { %2617 = vmatprep.mubr.bf16.mxu0 %v2536_v52  ;;  %v3989_v52 = vld [vmem:[%s5021_s12 + $0x18] sm:$0xff]   ;;  %3679 = vmatprep.subr.bf16.mxu1 %v3988_v43 }
 0xe77   : > { %2618 = vmatmul.mubr.bf16.vlgmr.msra.gmra.mrb[52].mxu0 %v2535_v56  ;;  %v3990_v56 = vld [vmem:[%s5021_s12 + $0x60] sm:$0xff]  }
 0xe78   : > { %3809 = vmatprep.mubr.msk.bf16.mxu0 %vm4060_vm2, %v4059_v1  ;;  %3802 = vmatpush3.bf16.msra.mxu0 %v3966_v31  ;;  %v3991_v31 = vld [vmem:[%s5021_s12 + $0x20] sm:$0xff]  }
 0xe79   : > { %3803 = vmatprep.subr.bf16.mxu0 %v4059_v1  ;;  %3680 = vmatpush3.bf16.msra.mxu1 %v3989_v52 }
 0xe7a   : > { %3681 = vmatprep.subr.bf16.mxu1 %v3990_v56 }
 0xe7c   : > { %3804 = vmatpush3.bf16.msra.mxu0 %v3967_v59  ;;  %v3992_v59 = vld [vmem:[%s5021_s12 + $0x68] sm:$0xff]  }
 0xe7d   : > { %3805 = vmatprep.subr.bf16.mxu0 %v4059_v1  ;;  %3682 = vmatpush3.bf16.msra.mxu1 %v3991_v31 }
 0xe7e   : > { %3683 = vmatprep.subr.bf16.mxu1 %v3992_v59 }
 0xe80   : > { %3806 = vmatpush3.bf16.msra.mxu0 %v3968_v55  ;;  %v3993_v55 = vld [vmem:[%s5021_s12 + $0x28] sm:$0xff]  }
 0xe81   : > { %3807 = vmatprep.subr.bf16.mxu0 %v4059_v1  ;;  %3684 = vmatpush3.bf16.msra.mxu1 %v3993_v55  ;;  %v4002_v55 = vld [vmem:[%s5025_s16] sm:$0xff]  }
 0xe84   : > { %3808 = vmatpush3.bf16.msra.mxu0 %v3969_v10  ;;  %v3994_v10 = vld [vmem:[%s5021_s12 + $0x70] sm:$0xff]  }
 0xe85   : > { %2794 = vmatprep.subr.bf16.mxu0 %v3972_v62  ;;  %3685 = vmatprep.subr.bf16.mxu1 %v3994_v10  ;;  %v4004_v10 = vld [vmem:[%s5025_s16 + $0x10] sm:$0xff]  }
 0xf4a   : > { %v3662_v53 = vpop.f32.mrb[52].mxu0 }
 0xf4b   : > { %v3663_v0 = vpop.f32.mrb[53].mxu0 }
 0xf4c   : > { %v3664_v5 = vadd.f32 %v3663_v0, %v3662_v53  ;;  %v3665_v18 = vpop.f32.mrb[54].mxu0  ;;  %v3995_v53 = vld [vmem:[%s5021_s12 + $0x30] sm:$0xff]   ;;  %v3996_v0 = vld [vmem:[%s5021_s12 + $0x78] sm:$0xff]  }
 0xf4d   : > { %v3666_v19 = vpop.f32.mrb[55].mxu0  ;;  %3686 = vmatpush3.bf16.msra.mxu1 %v3995_v53  ;;  %v3998_v18 = vld [vmem:[%s5023_s14] sm:$0xff]   ;;  %v4005_v53 = vld [vmem:[%s5025_s16 + $0x18] sm:$0xff]  }
 0xf4e   : > { %2634 = vrot.lane.b32.xlu1 %v3664_v5, %s4069_s21  ;;  %v3997_v5 = vld [vmem:[%s5021_s12 + $0x38] sm:$0xff]   ;;  %3687 = vmatprep.subr.bf16.mxu1 %v3996_v0  ;;  %v3999_v19 = vld [vmem:[%s5023_s14 + $0x8] sm:$0xff]  }
 0xf51   : > { %3688 = vmatpush3.bf16.msra.mxu1 %v3997_v5 }
 0xf52   : > { %3837 = vmatprep.subr.bf16.mxu1 %v4059_v1 }
 0xfc0   : > { %v2635_v2 = vpop.permute.xlu1 %2634 }
 0xfc1   : > { %v2640_v7 = vsel %vm2639_vm9, %v2638_v63, %v2635_v2 }
 0xfc2   : > { %v2641_v9 = vpack.c.bf16 %v2640_v7, %v2640_v7 }
 0xfc4   : > { %3810 = vmatmul.mubr.msk.bf16.vlgmr.msra.gmra.mrb[56].mxu0 %vm664_vm4, %v2641_v9 }
 0xfc5   : > { %2826 = vmatprep.mubr.bf16.mxu0 %v4064_v14 }
0x1097   : > { %v2709_v16 = vpop.f32.mrb[56].mxu0 }
0x1098   : > { %v2710_v20 = vadd.f32 %v3410_v13, %v2709_v16  ;;  %v3811_v22 = vpop.f32.mrb[57].mxu0 }
0x1099   : > { %v2712_v4 = vpop.f32.mrb[58].mxu0 }
0x109a   : > { %v4824_v6 = vadd.f32 %v2710_v20, %v4249_v3  ;;  %v3812_v50 = vpop.f32.mrb[59].mxu0  ;;  %v3970_v3 = vld [vmem:[%s5019_s10] ss:$8 sps:$4 sm:$0xff]  }
0x109b   : > { %2795 = vmatpush1.bf16.msra.mxu0 %v3970_v3 }
0x109c   : > { %v2716_v12 = vsel %vm664_vm4, %v4824_v6, 0.0  ;;  %2796 = vmatprep.subr.bf16.mxu0 %v3975_v40 }
0x109d   : > { %2717 = vadd.xlane.f32.xlu0 %v2716_v12 }
0x109f   : > { %2797 = vmatpush1.bf16.msra.mxu0 %v3973_v17 }
0x10a0   : > { %2798 = vmatprep.subr.bf16.mxu0 %v3978_v51 }
0x10a3   : > { %2799 = vmatpush1.bf16.msra.mxu0 %v3976_v32 }
0x10a4   : > { %2800 = vmatprep.subr.bf16.mxu0 %v3981_v29 }
0x10a7   : > { %2801 = vmatpush1.bf16.msra.mxu0 %v3979_v49 }
0x10a8   : > { %3813 = vmatprep.subr.bf16.mxu0 %v4059_v1 }
0x112a   : > { %v2718_v23 = vpop.xlane.xlu0 %2717 }
0x112b   : > { %v2719_v25 = vmul.f32 0.015625, %v2718_v23 }
0x112d   : > { %v2720_v14 = vsub.f32 %v4824_v6, %v2719_v25 }
0x112f   : > { %v2721_v35 = vmul.f32 %v2720_v14, %v2720_v14 }
0x1131   : > { %v2722_v42 = vsel %vm664_vm4, %v2721_v35, 0.0 }
0x1132   : > { %2723 = vadd.xlane.f32.xlu1 %v2722_v42 }
0x11bf   : > { %v2724_v30 = vpop.xlane.xlu1 %2723 }
0x11c0   : > { %v2725_v8 = vmul.f32 0.015625, %v2724_v30  ;;  %v4000_v30 = vld [vmem:[%s5023_s14 + $0x10] sm:$0xff]  }
0x11c2   : > { %v2726_v11 = vadd.f32 1e-05, %v2725_v8  ;;  %v4001_v8 = vld [vmem:[%s5023_s14 + $0x18] sm:$0xff]  }
0x11c4   : > { %4038 = vrsqrt.f32 %v2726_v11 }
0x11ce   : > { %v4039_v54 = vpop.eup %4038 }
0x11cf   : > { %v2728_v39 = vmul.f32 %v4039_v54, %v2720_v14 }
0x11d1   : > { %v2733_v44 = vmul.f32 %v2732_v38, %v2728_v39 }
0x11d3   : > { %v2738_v28 = vadd.f32 %v2737_v41, %v2733_v44 }
0x11d5   : > { %v2739_v26 = vpack.c.bf16 %v2738_v28, %v2738_v28 }
0x11d7   : > { %3424 = vmatmul.mubr.msk.bf16.vlgmr.msra.gmra.mrb[60].mxu0 %vm664_vm4, %v2739_v26  ;;  %v3442_v26 = vld [vmem:[%s5024_s15] ss:$0 sm:$0xff] }
0x11d8   : > { %3821 = vmatprep.mubr.msk.bf16.mxu0 %vm4060_vm2, %v4059_v1  ;;  %3814 = vmatpush3.bf16.msra.mxu0 %v3998_v18 }
0x11d9   : > { %3815 = vmatprep.subr.bf16.mxu0 %v4059_v1 }
0x11dc   : > { %3816 = vmatpush3.bf16.msra.mxu0 %v3999_v19  ;;  %v3088_v19 = vsub.s32 6, %v4238_v57  ;;  %v4007_v57 = vld [vmem:[%s5027_s18 + $0x8] sm:$0xff]  }
0x11dd   : > { %3817 = vmatprep.subr.bf16.mxu0 %v4059_v1 }
0x11e0   : > { %3818 = vmatpush3.bf16.msra.mxu0 %v4000_v30 }
0x11e1   : > { %3819 = vmatprep.subr.bf16.mxu0 %v4059_v1 }
0x11e4   : > { %3820 = vmatpush3.bf16.msra.mxu0 %v4001_v8 }
0x11e5   : > { %3825 = vmatprep.subr.bf16.mxu0 %v4059_v1 }
0x12aa   : > { %v2828_v63 = vpop.f32.mrb[60].mxu0 }
0x12ab   : > { %v2829_v2 = vadd.f32 %v2828_v63, %v2744_v15  ;;  %v2830_v7 = vpop.f32.mrb[61].mxu0  ;;  %v3089_v15 = vrot.slane %v4860_v37, %v3088_v19 }
0x12ac   : > { %v2831_v9 = vadd.f32 %v2830_v7, %v2748_v33  ;;  %v2832_v13 = vpop.f32.mrb[62].mxu0 }
0x12ad   : > { %v2835_v16 = vmul.f32 %v2829_v2, %v2829_v2  ;;  %v2833_v20 = vpop.f32.mrb[63].mxu0 }
0x12ae   : > { %v2836_v22 = vmul.f32 %v2831_v9, %v2831_v9  ;;  %v4009_v20 = vld [vmem:[%s5027_s18 + $0x18] sm:$0xff]  }
0x12af   : > { %v2837_v4 = vmul.f32 %v2835_v16, %v2829_v2  ;;  %v4006_v16 = vld [vmem:[%s5027_s18] sm:$0xff]  }
0x12b0   : > { %v2838_v50 = vmul.f32 %v2836_v22, %v2831_v9  ;;  %v3448_v22 = vld [vmem:[%s5026_s17] ss:$0 sm:$0xff] }
0x12b1   : > { %v2839_v12 = vmul.f32 0.044715, %v2837_v4 }
0x12b2   : > { %v2840_v23 = vmul.f32 0.044715, %v2838_v50 }
0x12b3   : > { %v2841_v25 = vadd.f32 %v2839_v12, %v2829_v2 }
0x12b4   : > { %v2842_v14 = vadd.f32 %v2840_v23, %v2831_v9 }
0x12b5   : > { %v2843_v35 = vmul.f32 0.7978846, %v2841_v25 }
0x12b6   : > { %v2844_v42 = vmul.f32 0.7978846, %v2842_v14 }
0x12b7   : > { %4040 = vtanh.f32 %v2843_v35 }
0x12b8   : > { %4042 = vtanh.f32 %v2844_v42 }
0x12c1   : > { %v4041_v58 = vpop.eup %4040 }
0x12c2   : > { %v4043_v60 = vpop.eup %4042  ;;  %v2847_v62 = vadd.f32 1.0, %v4041_v58 }
0x12c3   : > { %v2848_v3 = vadd.f32 1.0, %v4043_v60 }
0x12c4   : > { %v2849_v40 = vmul.f32 0.5, %v2847_v62  ;;  %v3455_v62 = vld [vmem:[%s5028_s19] ss:$0 sm:$0xff] }
0x12c5   : > { %v2850_v17 = vmul.f32 0.5, %v2848_v3 }
0x12c6   : > { %v2851_v51 = vmul.f32 %v2849_v40, %v2829_v2  ;;  %v3094_v2 = vrot.slane %v4860_v37, %v3093_v24  ;;  %v4008_v37 = vld [vmem:[%s5027_s18 + $0x10] sm:$0xff]  }
0x12c7   : > { %v2852_v32 = vmul.f32 %v2850_v17, %v2831_v9 }
0x12c8   : > { %v2853_v29 = vpack.c.bf16 %v2851_v51, %v2851_v51 }
0x12c9   : > { %v2854_v49 = vpack.c.bf16 %v2852_v32, %v2852_v32 }
0x12cb   : > { %2989 = vmatprep.mubr.bf16.mxu1 %v2854_v49 }
0x12cc   : > { %2990 = vmatmul.mubr.bf16.vlgmr.msra.gmra.mrb[52].mxu1 %v2853_v29 }
0x12cd   : > { %3845 = vmatprep.mubr.msk.bf16.mxu1 %vm4060_vm2, %v4059_v1  ;;  %3838 = vmatpush3.bf16.msra.mxu1 %v4006_v16 }
0x12ce   : > { %3839 = vmatprep.subr.bf16.mxu1 %v4059_v1 }
0x12d1   : > { %3840 = vmatpush3.bf16.msra.mxu1 %v4007_v57 }
0x12d2   : > { %3841 = vmatprep.subr.bf16.mxu1 %v4059_v1 }
0x12d5   : > { %3842 = vmatpush3.bf16.msra.mxu1 %v4008_v37 }
0x12d6   : > { %3843 = vmatprep.subr.bf16.mxu1 %v4059_v1 }
0x12d9   : > { %3844 = vmatpush3.bf16.msra.mxu1 %v4009_v20 }
0x139f   : > { %v3689_v11 = vpop.f32.mrb[52].mxu1 }
0x13a0   : > { %v3690_v21 = vpop.f32.mrb[53].mxu1 }
0x13a1   : > { %v3691_v38 = vadd.f32 %v3690_v21, %v3689_v11  ;;  %v3692_v54 = vpop.f32.mrb[54].mxu1 }
0x13a2   : > { %v3693_v39 = vpop.f32.mrb[55].mxu1 }
0x13a3   : > { %v2992_v41 = vadd.f32 %v3691_v38, %v3425_v27 }
0x13a5   : > { %v2997_v44 = vadd.f32 %v2992_v41, %v4824_v6 }
0x13a7   : > { %v2998_v28 = vpack.c.bf16 %v2997_v44, %v2997_v44 }
0x13a9   : > { %3822 = vmatmul.mubr.msk.bf16.vlgmr.msra.gmra.mrb[64].mxu0 %vm664_vm4, %v2998_v28 }
0x13aa   : > { %3833 = vmatprep.mubr.msk.bf16.mxu0 %vm4060_vm2, %v4059_v1  ;;  %3826 = vmatpush3.bf16.msra.mxu0 %v4002_v55 }
0x13ab   : > { %3827 = vmatprep.subr.bf16.mxu0 %v4059_v1 }
0x147c   : > { %v3066_v36 = vpop.f32.mrb[64].mxu0 }
0x147d   : > { %v3067_v47 = vadd.f32 %v3442_v26, %v3066_v36  ;;  %v3823_v48 = vpop.f32.mrb[65].mxu0 }
0x147e   : > { %v3069_v34 = vpop.f32.mrb[66].mxu0 }
0x147f   : > { %v4952_v61 = vadd.f32 %v3067_v47, %v4232_v45  ;;  %v3824_v46 = vpop.f32.mrb[67].mxu0  ;;  %v4003_v45 = vld [vmem:[%s5025_s16 + $0x8] sm:$0xff]  }
0x1480   : > { %3828 = vmatpush3.bf16.msra.mxu0 %v4003_v45 }
0x1481   : > { %v3073_v6 = vsel %vm664_vm4, %v4952_v61, 0.0  ;;  %3829 = vmatprep.subr.bf16.mxu0 %v4059_v1 }
0x1482   : > { %3074 = vadd.xlane.f32.xlu0 %v3073_v6 }
0x1484   : > { %3830 = vmatpush3.bf16.msra.mxu0 %v4004_v10 }
0x1485   : > { %3831 = vmatprep.subr.bf16.mxu0 %v4059_v1 }
0x1488   : > { %3832 = vmatpush3.bf16.msra.mxu0 %v4005_v53 }
0x150f   : > { %v3075_v43 = vpop.xlane.xlu0 %3074 }
0x1510   : > { %v3076_v52 = vmul.f32 0.015625, %v3075_v43 }
0x1512   : > { %v3077_v56 = vsub.f32 %v4952_v61, %v3076_v52 }
0x1514   : > { %v3078_v31 = vmul.f32 %v3077_v56, %v3077_v56 }
0x1516   : > { %v3079_v59 = vsel %vm664_vm4, %v3078_v31, 0.0 }
0x1517   : > { %3080 = vadd.xlane.f32.xlu0 %v3079_v59 }
0x15a4   : > { %v3081_v0 = vpop.xlane.xlu0 %3080 }
0x15a5   : > { %v3082_v5 = vmul.f32 0.015625, %v3081_v0 }
0x15a7   : > { %v3083_v18 = vadd.f32 1e-05, %v3082_v5 }
0x15a9   : > { %4044 = vrsqrt.f32 %v3083_v18 }
0x15b3   : > { %v4045_v33 = vpop.eup %4044 }
0x15b4   : > { %v3085_v63 = vmul.f32 %v4045_v33, %v3077_v56 }
0x15b6   : > { %v3090_v7 = vmul.f32 %v3089_v15, %v3085_v63 }
0x15b8   : > { %v3095_v9 = vadd.f32 %v3094_v2, %v3090_v7 }
0x15ba   : > { %v3096_v13 = vpack.c.bf16 %v3095_v9, %v3095_v9 }
0x15bc   : > { %3834 = vmatmul.mubr.msk.bf16.vlgmr.msra.gmra.mrb[68].mxu0 %vm664_vm4, %v3096_v13 }
0x168f   : > { %v3164_v4 = vpop.f32.mrb[68].mxu0 }
0x1690   : > { %v3165_v50 = vadd.f32 %v3448_v22, %v3164_v4  ;;  %v3835_v12 = vpop.f32.mrb[69].mxu0 }
0x1691   : > { %v3167_v23 = vpop.f32.mrb[70].mxu0 }
0x1692   : > { %v3454_v25 = vmul.f32 -1.442695, %v3165_v50  ;;  %v3836_v14 = vpop.f32.mrb[71].mxu0 }
0x1694   : > { %4046 = vpow2.f32 %v3454_v25 }
0x169e   : > { %v4047_v35 = vpop.eup %4046 }
0x169f   : > { %v3173_v42 = vadd.f32 1.0, %v4047_v35 }
0x16a1   : > { %4048 = vrcp.f32 %v3173_v42 }
0x16ab   : > { %v4049_v1 = vpop.eup %4048 }
0x16ac   : > { %v3176_v58 = vmul.f32 %v4049_v1, %v3165_v50 }
0x16ae   : > { %v3177_v60 = vpack.c.bf16 %v3176_v58, %v3176_v58 }
0x16b0   : > { %3846 = vmatmul.mubr.msk.bf16.vlgmr.msra.gmra.mrb[56].mxu1 %vm664_vm4, %v3177_v60 }
0x1783   : > { %v3245_v3 = vpop.f32.mrb[56].mxu1 }
0x1784   : > { %v3246_v40 = vadd.f32 %v3455_v62, %v3245_v3  ;;  %v3847_v17 = vpop.f32.mrb[57].mxu1 }
0x1785   : > { %v3248_v51 = vpop.f32.mrb[58].mxu1 }
0x1786   : > { %v3251_v32 = vadd.f32 %v3246_v40, %v4952_v61  ;;  %v3848_v49 = vpop.f32.mrb[59].mxu1 }
0x1788   : > { %v3253_v29 = vrot.slane %v3251_v32, 7 }
0x178a   : > { %v3256_v30 = vsel %vm3255_vm10, 0.0, %v3253_v29  ;;  %v3257_v8 = vsel %vm3255_vm10, %v3253_v29, 0.0 }
0x178b   : > { %3258 = vst.msk [vmem:[%s629_s23] sm:$0xff] %vm664_vm4, %v3256_v30 }
0x178c   : > { %3260 = vst.msk [vmem:[%s629_s23 + $0x8] sm:$0x3] %vm3259_vm11, %v3257_v8 }
0x178d PF: > { %s30_s1 = sadd.s32 1, %s4057_s1  }
0x178e   : > { %p27_p4 = scmp.ge.s32.totalorder %s30_s1, 10  }
0x1790   :  { %29 = sbr.rel (!%p27_p4) target bundleno = 6 (0x6), region = 130 }

</bundles_post_ra>
